<compile_context>
chip_gen: v6e
topology: v6e:2x2x1
jax: 0.10.0
libtpu: 0.0.40
codegen_flags: <defaults>
</compile_context>

<pallas_src>
import functools
import math

import numpy as np
import jax
import jax.numpy as jnp
from jax.experimental import pallas as pl
from jax.experimental.pallas import tpu as pltpu  # noqa: F401  (TPU backend kept imported)

# ------------------------------ config --------------------------------------
BATCH = 2                     # kernel assumes B == 2 (batch rides the lane axis)
STYLE_DIM = 32
N_MLP = 2
SIZE = 8                      # output resolution (8x8, starts at 4x4)
CH4 = 16
CH8 = 16
LR_MUL_MAPPING = 0.01
SQRT2 = math.sqrt(2.0)
HW4, HW8 = 16, SIZE * SIZE

_k1 = np.array([1.0, 3.0, 3.0, 1.0], dtype=np.float64)
BLUR_BASE = (np.outer(_k1, _k1) / (_k1.sum() ** 2)).astype(np.float32)  # sums to 1

assert CH4 == CH8, "weight tap-stacking below assumes equal channel counts"
assert BATCH == 2, "kernel lane layout assumes a batch of 2"

# ---- packed-buffer layout constants (shared by pack_params and the kernel) ----
PB_MAPW = 0                                      # n_mlp blocks of (32, 32)
PB_STYLEW = PB_MAPW + N_MLP * STYLE_DIM          # 64 : (80, 32)
PB_CONST = PB_STYLEW + 5 * CH4                   # 144: (16, 32) batch-tiled const
PB_WSQ = PB_CONST + CH4                          # 160: 3 blocks of (16, 16)
PB_BIAS = PB_WSQ + 3 * CH4                       # 208: bias-column block (80 rows)
PB_ROWS = PB_BIAS + 5 * CH4                      # 288
BC_STYLE, BC_MAP0, BC_CONV0, BC_RGB0 = 0, 1, 3, 6  # bias columns in the bias block

WV_CONV = (0, 144, 288)                          # per-tap-stacked conv weights
WV_RGB = (432, 448)                              # padded (16,16) 1x1 RGB weights
WV_ROWS = 464

GB_CONV1, GB_UP, GB_CONV2, GB_USKIP = 0, 288, 576, 1728
GB_ROWS = 1760


# ----------------- constant gather/blur matrices (host, numpy) ---------------
def _fir2d_np(x, kern, pad0, pad1):
    """upfirdn2d with up=down=1 on a single 2D image (same math as the blur)."""
    kh, kw = kern.shape
    xp = np.pad(x, ((pad0, pad1), (pad0, pad1)))
    kf = kern[::-1, ::-1]
    ho = xp.shape[0] - kh + 1
    wo = xp.shape[1] - kw + 1
    out = np.zeros((ho, wo), np.float64)
    for u in range(kh):
        for v in range(kw):
            out += kf[u, v] * xp[u:u + ho, v:v + wo]
    return out


def _linmap_matrix(fn, h_in, w_in):
    """M such that flatten(fn(x)) == flatten(x) @ M for any (h_in, w_in) image."""
    rows = []
    for p in range(h_in * w_in):
        e = np.zeros((h_in, w_in), np.float64)
        e[p // w_in, p % w_in] = 1.0
        rows.append(np.asarray(fn(e), np.float64).reshape(-1))
    return np.stack(rows, axis=0).astype(np.float32)


@functools.lru_cache(maxsize=None)
def _conv_tap_mats(h, k=3):
    """G_k for a 'same' KxK conv (zero padding folded in): tap_k(x) == x @ G_k."""
    pad = k // 2
    mats = []
    for ki in range(k):
        for kj in range(k):
            def tap(e, ki=ki, kj=kj):
                ep = np.pad(e, ((pad, pad), (pad, pad)))
                return ep[ki:ki + h, kj:kj + h]
            mats.append(_linmap_matrix(tap, h, h))
    return np.stack(mats, axis=0)                      # (k*k, h*h, h*h)


@functools.lru_cache(maxsize=None)
def _upconv_tap_mats(h, k=3):
    """G_k with conv_transpose2d(stride=2) zero-stuff/pad AND the trailing
    Blur([1,3,3,1], pad=(1,1), x4) folded in."""
    blur_k = (BLUR_BASE * 4.0).astype(np.float64)
    mats = []
    for ki in range(k):
        for kj in range(k):
            def tap(e, ki=ki, kj=kj):
                z = np.zeros((2 * h - 1, 2 * h - 1), np.float64)
                z[::2, ::2] = e                        # zero-dilate (stride 2)
                zp = np.pad(z, ((k - 1, k - 1), (k - 1, k - 1)))
                ho = zp.shape[0] - k + 1
                t = zp[ki:ki + ho, kj:kj + ho]         # conv_transpose tap
                return _fir2d_np(t, blur_k, 1, 1)      # fused blur
            mats.append(_linmap_matrix(tap, h, h))
    return np.stack(mats, axis=0)                      # (k*k, h*h, (2h)*(2h))


@functools.lru_cache(maxsize=None)
def _skip_upsample_mat(h):
    """U for the skip Upsample (zero-stuff x2 + upfirdn blur, pad=(2,1))."""
    blur_k = (BLUR_BASE * 4.0).astype(np.float64)

    def up(e):
        z = np.zeros((2 * h, 2 * h), np.float64)
        z[::2, ::2] = e
        return _fir2d_np(z, blur_k, 2, 1)

    return _linmap_matrix(up, h, h)                    # (h*h, (2h)*(2h))


# ------------------------------ param packing --------------------------------
def pack_params(params):
    """Run ONCE per parameter set: build 3 packed device constant buffers."""
    c, sd = CH4, STYLE_DIM
    map_scale = (1.0 / math.sqrt(sd)) * LR_MUL_MAPPING
    mod_scale = 1.0 / math.sqrt(sd)
    conv_scale = 1.0 / math.sqrt(c * 9)
    rgb_scale = 1.0 / math.sqrt(c)

    def npa(a):
        return np.asarray(a, np.float64)

    def wvert_of(w, flip):
        w = npa(w)                                     # (cout, cin, 3, 3)
        if flip:                                       # conv_transpose == flipped taps
            w = w[:, :, ::-1, ::-1]
        # rows ordered tap-major then cout: row = (ki*3+kj)*cout + o
        return conv_scale * np.transpose(w, (2, 3, 0, 1)).reshape(9 * c, c)

    def wsq_of(w):
        w = npa(w)
        return (conv_scale ** 2) * (w * w).sum(axis=(2, 3))    # (cout, cin)

    def blockdiag(m):
        a, b = m.shape
        z = np.zeros((BATCH * a, BATCH * b), np.float64)
        for i in range(BATCH):
            z[i * a:(i + 1) * a, i * b:(i + 1) * b] = m
        return z

    layers = [params["conv1"], params["convs"][0], params["convs"][1],
              params["to_rgb1"], params["to_rgbs"][0]]

    # ---- pbuf (f32): mapping / style / const / Wsq / bias columns ------------
    pb = np.zeros((PB_ROWS, 32), np.float64)
    for l in range(N_MLP):
        pb[PB_MAPW + l * 32:PB_MAPW + (l + 1) * 32] = \
            map_scale * npa(params["mapping"][l]["w"])
        pb[PB_BIAS:PB_BIAS + 32, BC_MAP0 + l] = \
            LR_MUL_MAPPING * npa(params["mapping"][l]["b"])
    for i, p in enumerate(layers):
        pb[PB_STYLEW + i * c:PB_STYLEW + (i + 1) * c] = mod_scale * npa(p["mod_w"])
        pb[PB_BIAS + i * c:PB_BIAS + (i + 1) * c, BC_STYLE] = npa(p["mod_b"])
    pb[PB_CONST:PB_CONST + c] = np.tile(npa(params["const"]).reshape(c, HW4),
                                        (1, BATCH))
    for i, p in enumerate([params["conv1"], params["convs"][0], params["convs"][1]]):
        pb[PB_WSQ + i * c:PB_WSQ + (i + 1) * c, 0:c] = wsq_of(p["weight"])
        pb[PB_BIAS:PB_BIAS + c, BC_CONV0 + i] = npa(p["act_bias"])
    for i, p in enumerate([params["to_rgb1"], params["to_rgbs"][0]]):
        pb[PB_BIAS:PB_BIAS + 3, BC_RGB0 + i] = npa(p["bias"]).reshape(3)

    # ---- wvert (bf16): per-tap-stacked conv weights + 1x1 RGB weights --------
    wv = np.zeros((WV_ROWS, c), np.float64)
    wv[WV_CONV[0]:WV_CONV[0] + 9 * c] = wvert_of(params["conv1"]["weight"], False)
    wv[WV_CONV[1]:WV_CONV[1] + 9 * c] = wvert_of(params["convs"][0]["weight"], True)
    wv[WV_CONV[2]:WV_CONV[2] + 9 * c] = wvert_of(params["convs"][1]["weight"], False)
    wv[WV_RGB[0]:WV_RGB[0] + 3] = rgb_scale * npa(params["to_rgb1"]["weight"]).reshape(3, c)
    wv[WV_RGB[1]:WV_RGB[1] + 3] = rgb_scale * npa(params["to_rgbs"][0]["weight"]).reshape(3, c)

    # ---- gbuf (bf16): batch-blockdiag constant conv/blur/upsample operators --
    # (blur/0-1 gather coefficients are exactly representable in bf16)
    g4 = _conv_tap_mats(4)          # (9, 16, 16)
    gup = _upconv_tap_mats(4)       # (9, 16, 64)
    g8 = _conv_tap_mats(8)          # (9, 64, 64)
    uskip = _skip_upsample_mat(4)   # (16, 64)
    gb = np.zeros((GB_ROWS, 128), np.float64)
    for k in range(9):
        gb[GB_CONV1 + k * 32:GB_CONV1 + (k + 1) * 32, 0:32] = blockdiag(g4[k])
        gb[GB_UP + k * 32:GB_UP + (k + 1) * 32, 0:128] = blockdiag(gup[k])
        gb[GB_CONV2 + k * 128:GB_CONV2 + (k + 1) * 128, 0:128] = blockdiag(g8[k])
    gb[GB_USKIP:GB_USKIP + 32, 0:128] = blockdiag(uskip)

    packed = dict(pbuf=jnp.asarray(pb, jnp.float32),
                  wvert=jnp.asarray(wv, jnp.bfloat16),
                  gbuf=jnp.asarray(gb, jnp.bfloat16))
    statics = dict(
        n_mlp=N_MLP,
        noise_weights=(float(params["conv1"]["noise_weight"]),
                       float(params["convs"][0]["noise_weight"]),
                       float(params["convs"][1]["noise_weight"])),
    )
    return packed, statics


# ------------------------- the single fused kernel ---------------------------
def _generator_kernel(zt_ref, noise_ref, pbuf_ref, wvert_ref, gbuf_ref, out_ref,
                      *, input_is_w, n_mlp, noise_weights):
    f32, bf16 = jnp.float32, jnp.bfloat16
    B, C = BATCH, CH4

    def lrelu(v):
        return jnp.where(v >= 0.0, v, 0.2 * v) * SQRT2

    # --- mapping network (transposed layout: style_dim=sublanes, batch=lanes) -
    w = zt_ref[...]                                              # (32, B)
    if not input_is_w:
        w = w * jax.lax.rsqrt(jnp.mean(w * w, axis=0, keepdims=True) + 1e-8)
        for l in range(n_mlp):
            wm = pbuf_ref[PB_MAPW + l * 32:PB_MAPW + (l + 1) * 32, :]
            bm = pbuf_ref[PB_BIAS:PB_BIAS + 32, BC_MAP0 + l:BC_MAP0 + l + 1]
            w = lrelu(jnp.dot(wm, w, preferred_element_type=f32) + bm)

    # --- all five style linears as one matmul -> (80, B) ----------------------
    styles = jnp.dot(pbuf_ref[PB_STYLEW:PB_STYLEW + 5 * C, :], w,
                     preferred_element_type=f32) \
        + pbuf_ref[PB_BIAS:PB_BIAS + 5 * C, BC_STYLE:BC_STYLE + 1]

    # lane selectors: lanes [0, hw) -> sample 0, [hw, 2hw) -> sample 1
    sel4 = jax.lax.broadcasted_iota(jnp.int32, (1, B * HW4), 1) >= HW4
    sel8 = jax.lax.broadcasted_iota(jnp.int32, (1, B * HW8), 1) >= HW8

    def per_sample(cols, sel):
        # (R, B=2) -> (R, B*hw): each sample's column broadcast over its lanes
        return jnp.where(sel, cols[:, 1:2], cols[:, 0:1])

    def bias(col, rows=C):
        return pbuf_ref[PB_BIAS:PB_BIAS + rows, col:col + 1]

    def styled_conv(x, s, wv_off, wsq_off, g_off, hw_in, hw_out,
                    b_col, nw, noise_lo, sel_in, sel_out):
        # x: (C, B*hw_in) f32, s: (C, B) style.  Modulate the INPUT, run the
        # conv with constant tap-stacked weights + blockdiag gather/blur maps,
        # demodulate the OUTPUT analytically.
        xs = (x * per_sample(s, sel_in)).astype(bf16)
        wv = wvert_ref[wv_off:wv_off + 9 * C, :]                 # (144, C) bf16
        u = jnp.dot(wv, xs, preferred_element_type=f32)          # (144, B*hw_in)
        acc = None
        for k in range(9):
            gk = gbuf_ref[g_off + k * B * hw_in:g_off + (k + 1) * B * hw_in,
                          0:B * hw_out]                          # bf16 blockdiag
            y = jnp.dot(u[k * C:(k + 1) * C, :].astype(bf16), gk,
                        preferred_element_type=f32)              # (C, B*hw_out)
            acc = y if acc is None else acc + y
        wsq = pbuf_ref[wsq_off:wsq_off + C, 0:C]                 # (C, C) f32
        d = jax.lax.rsqrt(jnp.dot(wsq, s * s, preferred_element_type=f32) + 1e-8)
        out = acc * per_sample(d, sel_out)
        if nw != 0.0:   # static skip when NoiseInjection weight is zero
            out = out + nw * noise_ref[:, noise_lo:noise_lo + B * hw_out]
        return lrelu(out + b_col)

    def to_rgb(x, s, wr_off, b_col, sel):
        xs = (x * per_sample(s, sel)).astype(bf16)
        wr = wvert_ref[wr_off:wr_off + C, :]                     # (16, C), rows 3.. zero
        return jnp.dot(wr, xs, preferred_element_type=f32) + b_col

    # --- 4x4: conv1 ------------------------------------------------------------
    x = pbuf_ref[PB_CONST:PB_CONST + C, :]                       # batch-tiled const
    x = styled_conv(x, styles[0:C, :], WV_CONV[0], PB_WSQ, GB_CONV1,
                    HW4, HW4, bias(BC_CONV0), noise_weights[0], 0, sel4, sel4)
    # --- to_rgb1 (1x1, no demodulation) ----------------------------------------
    skip = to_rgb(x, styles[3 * C:4 * C, :], WV_RGB[0], bias(BC_RGB0), sel4)
    # --- 4x4 -> 8x8 upsampling conv (conv_transpose + blur folded into G) -------
    x = styled_conv(x, styles[C:2 * C, :], WV_CONV[1], PB_WSQ + C, GB_UP,
                    HW4, HW8, bias(BC_CONV0 + 1), noise_weights[1],
                    B * HW4, sel4, sel8)
    # --- 8x8 conv ---------------------------------------------------------------
    x = styled_conv(x, styles[2 * C:3 * C, :], WV_CONV[2], PB_WSQ + 2 * C, GB_CONV2,
                    HW8, HW8, bias(BC_CONV0 + 2), noise_weights[2],
                    B * (HW4 + HW8), sel8, sel8)
    # --- to_rgb2 + blur-upsampled skip ------------------------------------------
    rgb = to_rgb(x, styles[4 * C:5 * C, :], WV_RGB[1], bias(BC_RGB0 + 1), sel8)
    rgb = rgb + jnp.dot(skip.astype(bf16),
                        gbuf_ref[GB_USKIP:GB_USKIP + B * C, :],
                        preferred_element_type=f32)
    out_ref[...] = rgb[0:3, :]                                   # (3, B*64)


# ------------------------------ forward wrapper -------------------------------
def make_noise(noise_key, b):
    # TODO(synk): noise comes from jax.random here instead of torch's in-forward
    # randn (NoiseInjection with noise=None); same semantics, different RNG.
    nk = jax.random.split(noise_key, 3)
    return (jax.random.normal(nk[0], (b, 1, 4, 4), jnp.float32),
            jax.random.normal(nk[1], (b, 1, SIZE, SIZE), jnp.float32),
            jax.random.normal(nk[2], (b, 1, SIZE, SIZE), jnp.float32))


def make_generator(params, input_is_w=False):
    """Pack params once; return a jitted forward(z, noise_key) -> (B, 3, 8, 8)."""
    packed, statics = pack_params(params)
    pbuf, wvert, gbuf = packed["pbuf"], packed["wvert"], packed["gbuf"]
    kern = functools.partial(_generator_kernel, input_is_w=input_is_w, **statics)

    call = pl.pallas_call(
        kern,
        out_shape=jax.ShapeDtypeStruct((3, BATCH * HW8), jnp.float32),
    )

    @jax.jit
    def forward(z, noise_key):
        assert z.shape == (BATCH, STYLE_DIM)
        n4, n8a, n8b = make_noise(noise_key, BATCH)
        noise = jnp.concatenate([n4.reshape(1, BATCH * HW4),
                                 n8a.reshape(1, BATCH * HW8),
                                 n8b.reshape(1, BATCH * HW8)], axis=1)   # (1, 288)
        out = call(z.T, noise, pbuf, wvert, gbuf)                        # (3, B*64)
        return out.reshape(3, BATCH, HW8).transpose(1, 0, 2).reshape(
            BATCH, 3, SIZE, SIZE)

    return forward


# ------------------------------ parameters ------------------------------------
def make_generator_params(key):
    keys = iter(jax.random.split(key, 32))
    lr_mul = LR_MUL_MAPPING
    p = {"mapping": []}
    for _ in range(N_MLP):
        p["mapping"].append({
            "w": jax.random.normal(next(keys), (STYLE_DIM, STYLE_DIM), jnp.float32) / lr_mul,
            "b": jnp.zeros((STYLE_DIM,), jnp.float32),
        })
    p["const"] = jax.random.normal(next(keys), (1, CH4, 4, 4), jnp.float32)

    def styled_conv(cin, cout, k):
        return {
            "weight": jax.random.normal(next(keys), (cout, cin, k, k), jnp.float32),
            "mod_w": jax.random.normal(next(keys), (cin, STYLE_DIM), jnp.float32),
            "mod_b": jnp.ones((cin,), jnp.float32),       # EqualLinear(bias_init=1)
            "noise_weight": 0.0,                          # NoiseInjection init = zeros
            "act_bias": jnp.zeros((cout,), jnp.float32),  # FusedLeakyReLU bias
        }

    def to_rgb(cin):
        return {
            "weight": jax.random.normal(next(keys), (3, cin, 1, 1), jnp.float32),
            "mod_w": jax.random.normal(next(keys), (cin, STYLE_DIM), jnp.float32),
            "mod_b": jnp.ones((cin,), jnp.float32),
            "bias": jnp.zeros((1, 3, 1, 1), jnp.float32),
        }

    p["conv1"] = styled_conv(CH4, CH4, 3)
    p["to_rgb1"] = to_rgb(CH4)
    p["convs"] = [styled_conv(CH4, CH8, 3), styled_conv(CH8, CH8, 3)]
    p["to_rgbs"] = [to_rgb(CH8)]
    return p


# ------------------- pure-JAX reference (correctness check) -------------------
def _ref_blur(x, kernel2d, pad):
    b, c, h, w = x.shape
    k = np.asarray(kernel2d, np.float32)
    kh, kw = k.shape
    p0, p1 = pad
    xp = jnp.pad(x, ((0, 0), (0, 0), (p0, p1), (p0, p1)))
    kf = k[::-1, ::-1]
    ho, wo = h + p0 + p1 - kh + 1, w + p0 + p1 - kw + 1
    out = jnp.zeros((b, c, ho, wo), jnp.float32)
    for u in range(kh):
        for v in range(kw):
            out = out + float(kf[u, v]) * xp[:, :, u:u + ho, v:v + wo]
    return out


def _ref_im2col(x, k, pad):
    b, c, h, w = x.shape
    xp = jnp.pad(x, ((0, 0), (0, 0), (pad, pad), (pad, pad)))
    ho, wo = h + 2 * pad - k + 1, w + 2 * pad - k + 1
    cols = [xp[:, :, i:i + ho, j:j + wo] for i in range(k) for j in range(k)]
    return jnp.stack(cols, axis=2).reshape(b, c * k * k, ho * wo), ho, wo


def _ref_modconv(x, weight, style, demodulate, upsample):
    b, cin, h, w = x.shape
    cout, _, k, _ = weight.shape
    scale = 1.0 / math.sqrt(cin * k * k)
    wmod = scale * weight[None] * style[:, None, :, None, None]
    if demodulate:
        d = jax.lax.rsqrt(jnp.sum(wmod * wmod, axis=(2, 3, 4), keepdims=True) + 1e-8)
        wmod = wmod * d
    if not upsample:
        patches, ho, wo = _ref_im2col(x, k, k // 2)
        out = jnp.einsum("bos,bsp->bop", wmod.reshape(b, cout, cin * k * k), patches)
        return out.reshape(b, cout, ho, wo)
    z = jnp.zeros((b, cin, 2 * h - 1, 2 * w - 1), x.dtype).at[:, :, ::2, ::2].set(x)
    zp = jnp.pad(z, ((0, 0), (0, 0), (k - 1, k - 1), (k - 1, k - 1)))
    patches, ho, wo = _ref_im2col(zp, k, 0)
    wflip = wmod[:, :, :, ::-1, ::-1].reshape(b, cout, cin * k * k)
    out = jnp.einsum("bos,bsp->bop", wflip, patches).reshape(b, cout, ho, wo)
    return _ref_blur(out, BLUR_BASE * 4.0, (1, 1))


def _ref_equal_linear(x, w, b, lr_mul=1.0, fused_lrelu=False):
    scale = (1.0 / math.sqrt(w.shape[1])) * lr_mul
    y = x @ (w.T * scale) + b * lr_mul
    if fused_lrelu:
        y = jnp.where(y >= 0.0, y, 0.2 * y) * SQRT2
    return y


def reference_forward(params, x, noises, input_is_w=False):
    if input_is_w:
        w = x
    else:
        w = x * jax.lax.rsqrt(jnp.mean(x * x, axis=1, keepdims=True) + 1e-8)
        for layer in params["mapping"]:
            w = _ref_equal_linear(w, layer["w"], layer["b"],
                                  lr_mul=LR_MUL_MAPPING, fused_lrelu=True)
    b = x.shape[0]

    def style_of(p):
        return _ref_equal_linear(w, p["mod_w"], p["mod_b"])

    def styled_conv(h, p, noise, upsample=False):
        out = _ref_modconv(h, p["weight"], style_of(p), True, upsample)
        out = out + p["noise_weight"] * noise + p["act_bias"].reshape(1, -1, 1, 1)
        return jnp.where(out >= 0.0, out, 0.2 * out) * SQRT2

    def to_rgb(h, p, skip=None):
        out = _ref_modconv(h, p["weight"], style_of(p), False, False) + p["bias"]
        if skip is not None:
            bb, c, hh, ww = skip.shape
            z = jnp.zeros((bb, c, 2 * hh, 2 * ww), skip.dtype).at[:, :, ::2, ::2].set(skip)
            out = out + _ref_blur(z, BLUR_BASE * 4.0, (2, 1))
        return out

    h = jnp.broadcast_to(params["const"], (b, CH4, 4, 4))
    h = styled_conv(h, params["conv1"], noises[0])
    skip = to_rgb(h, params["to_rgb1"])
    h = styled_conv(h, params["convs"][0], noises[1], upsample=True)
    h = styled_conv(h, params["convs"][1], noises[2])
    skip = to_rgb(h, params["to_rgbs"][0], skip)
    return skip


# ------------------------------------ main ------------------------------------
if __name__ == "__main__":
    key = jax.random.PRNGKey(0)
    pkey, zkey, nkey = jax.random.split(key, 3)
    params = make_generator_params(pkey)
    z = jax.random.normal(zkey, (BATCH, STYLE_DIM), jnp.float32)

    generator = make_generator(params, input_is_w=False)   # packs params ONCE
    img = jax.block_until_ready(generator(z, nkey))

    assert img.shape == (BATCH, 3, SIZE, SIZE), img.shape
    assert bool(jnp.all(jnp.isfinite(img)))

    # numerical self-check vs a pure-JAX (XLA) f32 reference of the same graph.
    # Conv-stage matmuls in the kernel use bf16 operands (f32 accumulation),
    # hence the slightly relaxed tolerance.
    ref = reference_forward(params, z, make_noise(nkey, BATCH), input_is_w=False)
    ref = jax.block_until_ready(ref)
    num = float(jnp.linalg.norm((img - ref).ravel()))
    den = float(jnp.linalg.norm(ref.ravel())) + 1e-6
    assert num / den < 3e-2, f"kernel/reference mismatch: rel_l2={num / den:.3e}"

    print("KERNEL_OK")
</pallas_src>

<mosaic_0001>
module attributes {stable_mosaic.version = 11 : i64} {
  func.func @_generator_kernel(%arg0: memref<32x2xf32, #tpu.memory_space<vmem>>, %arg1: memref<1x288xf32, #tpu.memory_space<vmem>>, %arg2: memref<288x32xf32, #tpu.memory_space<vmem>>, %arg3: memref<464x16xbf16, #tpu.memory_space<vmem>>, %arg4: memref<1760x128xbf16, #tpu.memory_space<vmem>>, %arg5: memref<3x128xf32, #tpu.memory_space<vmem>>) attributes {dimension_semantics = [], scalar_prefetch = 0 : i64, scratch_operands = 0 : i64, tpu.core_type = #tpu.core_type<tc>} {
    %c0 = arith.constant 0 : index
    %c0_0 = arith.constant 0 : index
    %0 = vector.load %arg0[%c0, %c0_0] : memref<32x2xf32, #tpu.memory_space<vmem>>, vector<32x2xf32>
    %1 = arith.mulf %0, %0 : vector<32x2xf32>
    %cst = arith.constant dense<0.000000e+00> : vector<2xf32>
    %2 = vector.multi_reduction <add>, %1, %cst [0] : vector<32x2xf32> to vector<2xf32>
    %3 = vector.shape_cast %2 : vector<2xf32> to vector<1x2xf32>
    %cst_1 = arith.constant 3.200000e+01 : f32
    %4 = vector.broadcast %cst_1 : f32 to vector<1x2xf32>
    %5 = arith.divf %3, %4 : vector<1x2xf32>
    %cst_2 = arith.constant 9.99999993E-9 : f32
    %6 = vector.broadcast %cst_2 : f32 to vector<1x2xf32>
    %7 = arith.addf %5, %6 : vector<1x2xf32>
    %8 = math.rsqrt %7 : vector<1x2xf32>
    %9 = vector.broadcast %8 : vector<1x2xf32> to vector<32x2xf32>
    %10 = arith.mulf %0, %9 : vector<32x2xf32>
    %c0_3 = arith.constant 0 : index
    %c0_4 = arith.constant 0 : index
    %11 = vector.load %arg2[%c0_3, %c0_4] : memref<288x32xf32, #tpu.memory_space<vmem>>, vector<32x32xf32>
    %c208 = arith.constant 208 : index
    %c1 = arith.constant 1 : index
    %12 = vector.load %arg2[%c208, %c1] : memref<288x32xf32, #tpu.memory_space<vmem>>, vector<32x1xf32>
    %cst_5 = arith.constant dense<0.000000e+00> : vector<32x2xf32>
    %13 = tpu.matmul %11, %10, %cst_5 {dimension_numbers = #tpu.dot_dimension_numbers<[1], [0], [0], [1], [0, 0, 1, 1], [], []>} : vector<32x32xf32>, vector<32x2xf32>, vector<32x2xf32> -> vector<32x2xf32>
    %14 = vector.broadcast %12 : vector<32x1xf32> to vector<32x2xf32>
    %15 = arith.addf %13, %14 : vector<32x2xf32>
    %cst_6 = arith.constant 0.000000e+00 : f32
    %16 = vector.broadcast %cst_6 : f32 to vector<32x2xf32>
    %17 = arith.cmpf oge, %15, %16 : vector<32x2xf32>
    %cst_7 = arith.constant 2.000000e-01 : f32
    %18 = vector.broadcast %cst_7 : f32 to vector<32x2xf32>
    %19 = arith.mulf %18, %15 : vector<32x2xf32>
    %20 = arith.select %17, %15, %19 : vector<32x2xi1>, vector<32x2xf32>
    %cst_8 = arith.constant 1.41421354 : f32
    %21 = vector.broadcast %cst_8 : f32 to vector<32x2xf32>
    %22 = arith.mulf %20, %21 : vector<32x2xf32>
    %c32 = arith.constant 32 : index
    %c0_9 = arith.constant 0 : index
    %23 = vector.load %arg2[%c32, %c0_9] : memref<288x32xf32, #tpu.memory_space<vmem>>, vector<32x32xf32>
    %c208_10 = arith.constant 208 : index
    %c2 = arith.constant 2 : index
    %24 = vector.load %arg2[%c208_10, %c2] : memref<288x32xf32, #tpu.memory_space<vmem>>, vector<32x1xf32>
    %cst_11 = arith.constant dense<0.000000e+00> : vector<32x2xf32>
    %25 = tpu.matmul %23, %22, %cst_11 {dimension_numbers = #tpu.dot_dimension_numbers<[1], [0], [0], [1], [0, 0, 1, 1], [], []>} : vector<32x32xf32>, vector<32x2xf32>, vector<32x2xf32> -> vector<32x2xf32>
    %26 = vector.broadcast %24 : vector<32x1xf32> to vector<32x2xf32>
    %27 = arith.addf %25, %26 : vector<32x2xf32>
    %cst_12 = arith.constant 0.000000e+00 : f32
    %28 = vector.broadcast %cst_12 : f32 to vector<32x2xf32>
    %29 = arith.cmpf oge, %27, %28 : vector<32x2xf32>
    %cst_13 = arith.constant 2.000000e-01 : f32
    %30 = vector.broadcast %cst_13 : f32 to vector<32x2xf32>
    %31 = arith.mulf %30, %27 : vector<32x2xf32>
    %32 = arith.select %29, %27, %31 : vector<32x2xi1>, vector<32x2xf32>
    %cst_14 = arith.constant 1.41421354 : f32
    %33 = vector.broadcast %cst_14 : f32 to vector<32x2xf32>
    %34 = arith.mulf %32, %33 : vector<32x2xf32>
    %c64 = arith.constant 64 : index
    %c0_15 = arith.constant 0 : index
    %35 = vector.load %arg2[%c64, %c0_15] : memref<288x32xf32, #tpu.memory_space<vmem>>, vector<80x32xf32>
    %cst_16 = arith.constant dense<0.000000e+00> : vector<80x2xf32>
    %36 = tpu.matmul %35, %34, %cst_16 {dimension_numbers = #tpu.dot_dimension_numbers<[1], [0], [0], [1], [0, 0, 1, 1], [], []>} : vector<80x32xf32>, vector<32x2xf32>, vector<80x2xf32> -> vector<80x2xf32>
    %c208_17 = arith.constant 208 : index
    %c0_18 = arith.constant 0 : index
    %37 = vector.load %arg2[%c208_17, %c0_18] : memref<288x32xf32, #tpu.memory_space<vmem>>, vector<80x1xf32>
    %38 = vector.broadcast %37 : vector<80x1xf32> to vector<80x2xf32>
    %39 = arith.addf %36, %38 : vector<80x2xf32>
    %40 = tpu.iota {dimensions = array<i32: 1>} : vector<1x32xi32>
    %c16_i32 = arith.constant 16 : i32
    %41 = vector.broadcast %c16_i32 : i32 to vector<1x32xi32>
    %42 = arith.cmpi sge, %40, %41 : vector<1x32xi32>
    %43 = tpu.iota {dimensions = array<i32: 1>} : vector<1x128xi32>
    %c64_i32 = arith.constant 64 : i32
    %44 = vector.broadcast %c64_i32 : i32 to vector<1x128xi32>
    %45 = arith.cmpi sge, %43, %44 : vector<1x128xi32>
    %c144 = arith.constant 144 : index
    %c0_19 = arith.constant 0 : index
    %46 = vector.load %arg2[%c144, %c0_19] : memref<288x32xf32, #tpu.memory_space<vmem>>, vector<16x32xf32>
    %47 = vector.extract_strided_slice %39 {offsets = [0, 0], sizes = [16, 2], strides = [1, 1]} : vector<80x2xf32> to vector<16x2xf32>
    %c208_20 = arith.constant 208 : index
    %c3 = arith.constant 3 : index
    %48 = vector.load %arg2[%c208_20, %c3] : memref<288x32xf32, #tpu.memory_space<vmem>>, vector<16x1xf32>
    %49 = vector.extract_strided_slice %47 {offsets = [0, 1], sizes = [16, 1], strides = [1, 1]} : vector<16x2xf32> to vector<16x1xf32>
    %50 = vector.extract_strided_slice %47 {offsets = [0, 0], sizes = [16, 1], strides = [1, 1]} : vector<16x2xf32> to vector<16x1xf32>
    %51 = vector.shape_cast %42 : vector<1x32xi1> to vector<1x32xi1>
    %52 = vector.broadcast %51 : vector<1x32xi1> to vector<16x32xi1>
    %53 = vector.shape_cast %49 : vector<16x1xf32> to vector<16x1xf32>
    %54 = vector.broadcast %53 : vector<16x1xf32> to vector<16x32xf32>
    %55 = vector.shape_cast %50 : vector<16x1xf32> to vector<16x1xf32>
    %56 = vector.broadcast %55 : vector<16x1xf32> to vector<16x32xf32>
    %57 = arith.select %52, %54, %56 : vector<16x32xi1>, vector<16x32xf32>
    %58 = arith.mulf %46, %57 : vector<16x32xf32>
    %59 = arith.truncf %58 : vector<16x32xf32> to vector<16x32xbf16>
    %c0_21 = arith.constant 0 : index
    %c0_22 = arith.constant 0 : index
    %60 = vector.load %arg3[%c0_21, %c0_22] : memref<464x16xbf16, #tpu.memory_space<vmem>>, vector<144x16xbf16>
    %cst_23 = arith.constant dense<0.000000e+00> : vector<144x32xf32>
    %61 = tpu.matmul %60, %59, %cst_23 {dimension_numbers = #tpu.dot_dimension_numbers<[1], [0], [0], [1], [0, 0, 1, 1], [], []>} : vector<144x16xbf16>, vector<16x32xbf16>, vector<144x32xf32> -> vector<144x32xf32>
    %c0_24 = arith.constant 0 : index
    %c0_25 = arith.constant 0 : index
    %62 = vector.load %arg4[%c0_24, %c0_25] : memref<1760x128xbf16, #tpu.memory_space<vmem>>, vector<32x32xbf16>
    %63 = vector.extract_strided_slice %61 {offsets = [0, 0], sizes = [16, 32], strides = [1, 1]} : vector<144x32xf32> to vector<16x32xf32>
    %64 = arith.truncf %63 : vector<16x32xf32> to vector<16x32xbf16>
    %cst_26 = arith.constant dense<0.000000e+00> : vector<16x32xf32>
    %65 = tpu.matmul %64, %62, %cst_26 {dimension_numbers = #tpu.dot_dimension_numbers<[1], [0], [0], [1], [0, 0, 1, 1], [], []>} : vector<16x32xbf16>, vector<32x32xbf16>, vector<16x32xf32> -> vector<16x32xf32>
    %c32_27 = arith.constant 32 : index
    %c0_28 = arith.constant 0 : index
    %66 = vector.load %arg4[%c32_27, %c0_28] : memref<1760x128xbf16, #tpu.memory_space<vmem>>, vector<32x32xbf16>
    %67 = vector.extract_strided_slice %61 {offsets = [16, 0], sizes = [16, 32], strides = [1, 1]} : vector<144x32xf32> to vector<16x32xf32>
    %68 = arith.truncf %67 : vector<16x32xf32> to vector<16x32xbf16>
    %cst_29 = arith.constant dense<0.000000e+00> : vector<16x32xf32>
    %69 = tpu.matmul %68, %66, %cst_29 {dimension_numbers = #tpu.dot_dimension_numbers<[1], [0], [0], [1], [0, 0, 1, 1], [], []>} : vector<16x32xbf16>, vector<32x32xbf16>, vector<16x32xf32> -> vector<16x32xf32>
    %70 = arith.addf %65, %69 : vector<16x32xf32>
    %c64_30 = arith.constant 64 : index
    %c0_31 = arith.constant 0 : index
    %71 = vector.load %arg4[%c64_30, %c0_31] : memref<1760x128xbf16, #tpu.memory_space<vmem>>, vector<32x32xbf16>
    %72 = vector.extract_strided_slice %61 {offsets = [32, 0], sizes = [16, 32], strides = [1, 1]} : vector<144x32xf32> to vector<16x32xf32>
    %73 = arith.truncf %72 : vector<16x32xf32> to vector<16x32xbf16>
    %cst_32 = arith.constant dense<0.000000e+00> : vector<16x32xf32>
    %74 = tpu.matmul %73, %71, %cst_32 {dimension_numbers = #tpu.dot_dimension_numbers<[1], [0], [0], [1], [0, 0, 1, 1], [], []>} : vector<16x32xbf16>, vector<32x32xbf16>, vector<16x32xf32> -> vector<16x32xf32>
    %75 = arith.addf %70, %74 : vector<16x32xf32>
    %c96 = arith.constant 96 : index
    %c0_33 = arith.constant 0 : index
    %76 = vector.load %arg4[%c96, %c0_33] : memref<1760x128xbf16, #tpu.memory_space<vmem>>, vector<32x32xbf16>
    %77 = vector.extract_strided_slice %61 {offsets = [48, 0], sizes = [16, 32], strides = [1, 1]} : vector<144x32xf32> to vector<16x32xf32>
    %78 = arith.truncf %77 : vector<16x32xf32> to vector<16x32xbf16>
    %cst_34 = arith.constant dense<0.000000e+00> : vector<16x32xf32>
    %79 = tpu.matmul %78, %76, %cst_34 {dimension_numbers = #tpu.dot_dimension_numbers<[1], [0], [0], [1], [0, 0, 1, 1], [], []>} : vector<16x32xbf16>, vector<32x32xbf16>, vector<16x32xf32> -> vector<16x32xf32>
    %80 = arith.addf %75, %79 : vector<16x32xf32>
    %c128 = arith.constant 128 : index
    %c0_35 = arith.constant 0 : index
    %81 = vector.load %arg4[%c128, %c0_35] : memref<1760x128xbf16, #tpu.memory_space<vmem>>, vector<32x32xbf16>
    %82 = vector.extract_strided_slice %61 {offsets = [64, 0], sizes = [16, 32], strides = [1, 1]} : vector<144x32xf32> to vector<16x32xf32>
    %83 = arith.truncf %82 : vector<16x32xf32> to vector<16x32xbf16>
    %cst_36 = arith.constant dense<0.000000e+00> : vector<16x32xf32>
    %84 = tpu.matmul %83, %81, %cst_36 {dimension_numbers = #tpu.dot_dimension_numbers<[1], [0], [0], [1], [0, 0, 1, 1], [], []>} : vector<16x32xbf16>, vector<32x32xbf16>, vector<16x32xf32> -> vector<16x32xf32>
    %85 = arith.addf %80, %84 : vector<16x32xf32>
    %c160 = arith.constant 160 : index
    %c0_37 = arith.constant 0 : index
    %86 = vector.load %arg4[%c160, %c0_37] : memref<1760x128xbf16, #tpu.memory_space<vmem>>, vector<32x32xbf16>
    %87 = vector.extract_strided_slice %61 {offsets = [80, 0], sizes = [16, 32], strides = [1, 1]} : vector<144x32xf32> to vector<16x32xf32>
    %88 = arith.truncf %87 : vector<16x32xf32> to vector<16x32xbf16>
    %cst_38 = arith.constant dense<0.000000e+00> : vector<16x32xf32>
    %89 = tpu.matmul %88, %86, %cst_38 {dimension_numbers = #tpu.dot_dimension_numbers<[1], [0], [0], [1], [0, 0, 1, 1], [], []>} : vector<16x32xbf16>, vector<32x32xbf16>, vector<16x32xf32> -> vector<16x32xf32>
    %90 = arith.addf %85, %89 : vector<16x32xf32>
    %c192 = arith.constant 192 : index
    %c0_39 = arith.constant 0 : index
    %91 = vector.load %arg4[%c192, %c0_39] : memref<1760x128xbf16, #tpu.memory_space<vmem>>, vector<32x32xbf16>
    %92 = vector.extract_strided_slice %61 {offsets = [96, 0], sizes = [16, 32], strides = [1, 1]} : vector<144x32xf32> to vector<16x32xf32>
    %93 = arith.truncf %92 : vector<16x32xf32> to vector<16x32xbf16>
    %cst_40 = arith.constant dense<0.000000e+00> : vector<16x32xf32>
    %94 = tpu.matmul %93, %91, %cst_40 {dimension_numbers = #tpu.dot_dimension_numbers<[1], [0], [0], [1], [0, 0, 1, 1], [], []>} : vector<16x32xbf16>, vector<32x32xbf16>, vector<16x32xf32> -> vector<16x32xf32>
    %95 = arith.addf %90, %94 : vector<16x32xf32>
    %c224 = arith.constant 224 : index
    %c0_41 = arith.constant 0 : index
    %96 = vector.load %arg4[%c224, %c0_41] : memref<1760x128xbf16, #tpu.memory_space<vmem>>, vector<32x32xbf16>
    %97 = vector.extract_strided_slice %61 {offsets = [112, 0], sizes = [16, 32], strides = [1, 1]} : vector<144x32xf32> to vector<16x32xf32>
    %98 = arith.truncf %97 : vector<16x32xf32> to vector<16x32xbf16>
    %cst_42 = arith.constant dense<0.000000e+00> : vector<16x32xf32>
    %99 = tpu.matmul %98, %96, %cst_42 {dimension_numbers = #tpu.dot_dimension_numbers<[1], [0], [0], [1], [0, 0, 1, 1], [], []>} : vector<16x32xbf16>, vector<32x32xbf16>, vector<16x32xf32> -> vector<16x32xf32>
    %100 = arith.addf %95, %99 : vector<16x32xf32>
    %c256 = arith.constant 256 : index
    %c0_43 = arith.constant 0 : index
    %101 = vector.load %arg4[%c256, %c0_43] : memref<1760x128xbf16, #tpu.memory_space<vmem>>, vector<32x32xbf16>
    %102 = vector.extract_strided_slice %61 {offsets = [128, 0], sizes = [16, 32], strides = [1, 1]} : vector<144x32xf32> to vector<16x32xf32>
    %103 = arith.truncf %102 : vector<16x32xf32> to vector<16x32xbf16>
    %cst_44 = arith.constant dense<0.000000e+00> : vector<16x32xf32>
    %104 = tpu.matmul %103, %101, %cst_44 {dimension_numbers = #tpu.dot_dimension_numbers<[1], [0], [0], [1], [0, 0, 1, 1], [], []>} : vector<16x32xbf16>, vector<32x32xbf16>, vector<16x32xf32> -> vector<16x32xf32>
    %105 = arith.addf %100, %104 : vector<16x32xf32>
    %c160_45 = arith.constant 160 : index
    %c0_46 = arith.constant 0 : index
    %106 = vector.load %arg2[%c160_45, %c0_46] : memref<288x32xf32, #tpu.memory_space<vmem>>, vector<16x16xf32>
    %107 = arith.mulf %47, %47 : vector<16x2xf32>
    %cst_47 = arith.constant dense<0.000000e+00> : vector<16x2xf32>
    %108 = tpu.matmul %106, %107, %cst_47 {dimension_numbers = #tpu.dot_dimension_numbers<[1], [0], [0], [1], [0, 0, 1, 1], [], []>} : vector<16x16xf32>, vector<16x2xf32>, vector<16x2xf32> -> vector<16x2xf32>
    %cst_48 = arith.constant 9.99999993E-9 : f32
    %109 = vector.broadcast %cst_48 : f32 to vector<16x2xf32>
    %110 = arith.addf %108, %109 : vector<16x2xf32>
    %111 = math.rsqrt %110 : vector<16x2xf32>
    %112 = vector.extract_strided_slice %111 {offsets = [0, 1], sizes = [16, 1], strides = [1, 1]} : vector<16x2xf32> to vector<16x1xf32>
    %113 = vector.extract_strided_slice %111 {offsets = [0, 0], sizes = [16, 1], strides = [1, 1]} : vector<16x2xf32> to vector<16x1xf32>
    %114 = vector.shape_cast %42 : vector<1x32xi1> to vector<1x32xi1>
    %115 = vector.broadcast %114 : vector<1x32xi1> to vector<16x32xi1>
    %116 = vector.shape_cast %112 : vector<16x1xf32> to vector<16x1xf32>
    %117 = vector.broadcast %116 : vector<16x1xf32> to vector<16x32xf32>
    %118 = vector.shape_cast %113 : vector<16x1xf32> to vector<16x1xf32>
    %119 = vector.broadcast %118 : vector<16x1xf32> to vector<16x32xf32>
    %120 = arith.select %115, %117, %119 : vector<16x32xi1>, vector<16x32xf32>
    %121 = arith.mulf %105, %120 : vector<16x32xf32>
    %122 = vector.broadcast %48 : vector<16x1xf32> to vector<16x32xf32>
    %123 = arith.addf %121, %122 : vector<16x32xf32>
    %cst_49 = arith.constant 0.000000e+00 : f32
    %124 = vector.broadcast %cst_49 : f32 to vector<16x32xf32>
    %125 = arith.cmpf oge, %123, %124 : vector<16x32xf32>
    %cst_50 = arith.constant 2.000000e-01 : f32
    %126 = vector.broadcast %cst_50 : f32 to vector<16x32xf32>
    %127 = arith.mulf %126, %123 : vector<16x32xf32>
    %128 = arith.select %125, %123, %127 : vector<16x32xi1>, vector<16x32xf32>
    %cst_51 = arith.constant 1.41421354 : f32
    %129 = vector.broadcast %cst_51 : f32 to vector<16x32xf32>
    %130 = arith.mulf %128, %129 : vector<16x32xf32>
    %131 = vector.extract_strided_slice %39 {offsets = [48, 0], sizes = [16, 2], strides = [1, 1]} : vector<80x2xf32> to vector<16x2xf32>
    %c208_52 = arith.constant 208 : index
    %c6 = arith.constant 6 : index
    %132 = vector.load %arg2[%c208_52, %c6] : memref<288x32xf32, #tpu.memory_space<vmem>>, vector<16x1xf32>
    %133 = vector.extract_strided_slice %131 {offsets = [0, 1], sizes = [16, 1], strides = [1, 1]} : vector<16x2xf32> to vector<16x1xf32>
    %134 = vector.extract_strided_slice %131 {offsets = [0, 0], sizes = [16, 1], strides = [1, 1]} : vector<16x2xf32> to vector<16x1xf32>
    %135 = vector.shape_cast %42 : vector<1x32xi1> to vector<1x32xi1>
    %136 = vector.broadcast %135 : vector<1x32xi1> to vector<16x32xi1>
    %137 = vector.shape_cast %133 : vector<16x1xf32> to vector<16x1xf32>
    %138 = vector.broadcast %137 : vector<16x1xf32> to vector<16x32xf32>
    %139 = vector.shape_cast %134 : vector<16x1xf32> to vector<16x1xf32>
    %140 = vector.broadcast %139 : vector<16x1xf32> to vector<16x32xf32>
    %141 = arith.select %136, %138, %140 : vector<16x32xi1>, vector<16x32xf32>
    %142 = arith.mulf %130, %141 : vector<16x32xf32>
    %143 = arith.truncf %142 : vector<16x32xf32> to vector<16x32xbf16>
    %c432 = arith.constant 432 : index
    %c0_53 = arith.constant 0 : index
    %144 = vector.load %arg3[%c432, %c0_53] : memref<464x16xbf16, #tpu.memory_space<vmem>>, vector<16x16xbf16>
    %cst_54 = arith.constant dense<0.000000e+00> : vector<16x32xf32>
    %145 = tpu.matmul %144, %143, %cst_54 {dimension_numbers = #tpu.dot_dimension_numbers<[1], [0], [0], [1], [0, 0, 1, 1], [], []>} : vector<16x16xbf16>, vector<16x32xbf16>, vector<16x32xf32> -> vector<16x32xf32>
    %146 = vector.broadcast %132 : vector<16x1xf32> to vector<16x32xf32>
    %147 = arith.addf %145, %146 : vector<16x32xf32>
    %148 = vector.extract_strided_slice %39 {offsets = [16, 0], sizes = [16, 2], strides = [1, 1]} : vector<80x2xf32> to vector<16x2xf32>
    %c208_55 = arith.constant 208 : index
    %c4 = arith.constant 4 : index
    %149 = vector.load %arg2[%c208_55, %c4] : memref<288x32xf32, #tpu.memory_space<vmem>>, vector<16x1xf32>
    %150 = vector.extract_strided_slice %148 {offsets = [0, 1], sizes = [16, 1], strides = [1, 1]} : vector<16x2xf32> to vector<16x1xf32>
    %151 = vector.extract_strided_slice %148 {offsets = [0, 0], sizes = [16, 1], strides = [1, 1]} : vector<16x2xf32> to vector<16x1xf32>
    %152 = vector.shape_cast %42 : vector<1x32xi1> to vector<1x32xi1>
    %153 = vector.broadcast %152 : vector<1x32xi1> to vector<16x32xi1>
    %154 = vector.shape_cast %150 : vector<16x1xf32> to vector<16x1xf32>
    %155 = vector.broadcast %154 : vector<16x1xf32> to vector<16x32xf32>
    %156 = vector.shape_cast %151 : vector<16x1xf32> to vector<16x1xf32>
    %157 = vector.broadcast %156 : vector<16x1xf32> to vector<16x32xf32>
    %158 = arith.select %153, %155, %157 : vector<16x32xi1>, vector<16x32xf32>
    %159 = arith.mulf %130, %158 : vector<16x32xf32>
    %160 = arith.truncf %159 : vector<16x32xf32> to vector<16x32xbf16>
    %c144_56 = arith.constant 144 : index
    %c0_57 = arith.constant 0 : index
    %161 = vector.load %arg3[%c144_56, %c0_57] : memref<464x16xbf16, #tpu.memory_space<vmem>>, vector<144x16xbf16>
    %cst_58 = arith.constant dense<0.000000e+00> : vector<144x32xf32>
    %162 = tpu.matmul %161, %160, %cst_58 {dimension_numbers = #tpu.dot_dimension_numbers<[1], [0], [0], [1], [0, 0, 1, 1], [], []>} : vector<144x16xbf16>, vector<16x32xbf16>, vector<144x32xf32> -> vector<144x32xf32>
    %c288 = arith.constant 288 : index
    %c0_59 = arith.constant 0 : index
    %163 = vector.load %arg4[%c288, %c0_59] : memref<1760x128xbf16, #tpu.memory_space<vmem>>, vector<32x128xbf16>
    %164 = vector.extract_strided_slice %162 {offsets = [0, 0], sizes = [16, 32], strides = [1, 1]} : vector<144x32xf32> to vector<16x32xf32>
    %165 = arith.truncf %164 : vector<16x32xf32> to vector<16x32xbf16>
    %cst_60 = arith.constant dense<0.000000e+00> : vector<16x128xf32>
    %166 = tpu.matmul %165, %163, %cst_60 {dimension_numbers = #tpu.dot_dimension_numbers<[1], [0], [0], [1], [0, 0, 1, 1], [], []>} : vector<16x32xbf16>, vector<32x128xbf16>, vector<16x128xf32> -> vector<16x128xf32>
    %c320 = arith.constant 320 : index
    %c0_61 = arith.constant 0 : index
    %167 = vector.load %arg4[%c320, %c0_61] : memref<1760x128xbf16, #tpu.memory_space<vmem>>, vector<32x128xbf16>
    %168 = vector.extract_strided_slice %162 {offsets = [16, 0], sizes = [16, 32], strides = [1, 1]} : vector<144x32xf32> to vector<16x32xf32>
    %169 = arith.truncf %168 : vector<16x32xf32> to vector<16x32xbf16>
    %cst_62 = arith.constant dense<0.000000e+00> : vector<16x128xf32>
    %170 = tpu.matmul %169, %167, %cst_62 {dimension_numbers = #tpu.dot_dimension_numbers<[1], [0], [0], [1], [0, 0, 1, 1], [], []>} : vector<16x32xbf16>, vector<32x128xbf16>, vector<16x128xf32> -> vector<16x128xf32>
    %171 = arith.addf %166, %170 : vector<16x128xf32>
    %c352 = arith.constant 352 : index
    %c0_63 = arith.constant 0 : index
    %172 = vector.load %arg4[%c352, %c0_63] : memref<1760x128xbf16, #tpu.memory_space<vmem>>, vector<32x128xbf16>
    %173 = vector.extract_strided_slice %162 {offsets = [32, 0], sizes = [16, 32], strides = [1, 1]} : vector<144x32xf32> to vector<16x32xf32>
    %174 = arith.truncf %173 : vector<16x32xf32> to vector<16x32xbf16>
    %cst_64 = arith.constant dense<0.000000e+00> : vector<16x128xf32>
    %175 = tpu.matmul %174, %172, %cst_64 {dimension_numbers = #tpu.dot_dimension_numbers<[1], [0], [0], [1], [0, 0, 1, 1], [], []>} : vector<16x32xbf16>, vector<32x128xbf16>, vector<16x128xf32> -> vector<16x128xf32>
    %176 = arith.addf %171, %175 : vector<16x128xf32>
    %c384 = arith.constant 384 : index
    %c0_65 = arith.constant 0 : index
    %177 = vector.load %arg4[%c384, %c0_65] : memref<1760x128xbf16, #tpu.memory_space<vmem>>, vector<32x128xbf16>
    %178 = vector.extract_strided_slice %162 {offsets = [48, 0], sizes = [16, 32], strides = [1, 1]} : vector<144x32xf32> to vector<16x32xf32>
    %179 = arith.truncf %178 : vector<16x32xf32> to vector<16x32xbf16>
    %cst_66 = arith.constant dense<0.000000e+00> : vector<16x128xf32>
    %180 = tpu.matmul %179, %177, %cst_66 {dimension_numbers = #tpu.dot_dimension_numbers<[1], [0], [0], [1], [0, 0, 1, 1], [], []>} : vector<16x32xbf16>, vector<32x128xbf16>, vector<16x128xf32> -> vector<16x128xf32>
    %181 = arith.addf %176, %180 : vector<16x128xf32>
    %c416 = arith.constant 416 : index
    %c0_67 = arith.constant 0 : index
    %182 = vector.load %arg4[%c416, %c0_67] : memref<1760x128xbf16, #tpu.memory_space<vmem>>, vector<32x128xbf16>
    %183 = vector.extract_strided_slice %162 {offsets = [64, 0], sizes = [16, 32], strides = [1, 1]} : vector<144x32xf32> to vector<16x32xf32>
    %184 = arith.truncf %183 : vector<16x32xf32> to vector<16x32xbf16>
    %cst_68 = arith.constant dense<0.000000e+00> : vector<16x128xf32>
    %185 = tpu.matmul %184, %182, %cst_68 {dimension_numbers = #tpu.dot_dimension_numbers<[1], [0], [0], [1], [0, 0, 1, 1], [], []>} : vector<16x32xbf16>, vector<32x128xbf16>, vector<16x128xf32> -> vector<16x128xf32>
    %186 = arith.addf %181, %185 : vector<16x128xf32>
    %c448 = arith.constant 448 : index
    %c0_69 = arith.constant 0 : index
    %187 = vector.load %arg4[%c448, %c0_69] : memref<1760x128xbf16, #tpu.memory_space<vmem>>, vector<32x128xbf16>
    %188 = vector.extract_strided_slice %162 {offsets = [80, 0], sizes = [16, 32], strides = [1, 1]} : vector<144x32xf32> to vector<16x32xf32>
    %189 = arith.truncf %188 : vector<16x32xf32> to vector<16x32xbf16>
    %cst_70 = arith.constant dense<0.000000e+00> : vector<16x128xf32>
    %190 = tpu.matmul %189, %187, %cst_70 {dimension_numbers = #tpu.dot_dimension_numbers<[1], [0], [0], [1], [0, 0, 1, 1], [], []>} : vector<16x32xbf16>, vector<32x128xbf16>, vector<16x128xf32> -> vector<16x128xf32>
    %191 = arith.addf %186, %190 : vector<16x128xf32>
    %c480 = arith.constant 480 : index
    %c0_71 = arith.constant 0 : index
    %192 = vector.load %arg4[%c480, %c0_71] : memref<1760x128xbf16, #tpu.memory_space<vmem>>, vector<32x128xbf16>
    %193 = vector.extract_strided_slice %162 {offsets = [96, 0], sizes = [16, 32], strides = [1, 1]} : vector<144x32xf32> to vector<16x32xf32>
    %194 = arith.truncf %193 : vector<16x32xf32> to vector<16x32xbf16>
    %cst_72 = arith.constant dense<0.000000e+00> : vector<16x128xf32>
    %195 = tpu.matmul %194, %192, %cst_72 {dimension_numbers = #tpu.dot_dimension_numbers<[1], [0], [0], [1], [0, 0, 1, 1], [], []>} : vector<16x32xbf16>, vector<32x128xbf16>, vector<16x128xf32> -> vector<16x128xf32>
    %196 = arith.addf %191, %195 : vector<16x128xf32>
    %c512 = arith.constant 512 : index
    %c0_73 = arith.constant 0 : index
    %197 = vector.load %arg4[%c512, %c0_73] : memref<1760x128xbf16, #tpu.memory_space<vmem>>, vector<32x128xbf16>
    %198 = vector.extract_strided_slice %162 {offsets = [112, 0], sizes = [16, 32], strides = [1, 1]} : vector<144x32xf32> to vector<16x32xf32>
    %199 = arith.truncf %198 : vector<16x32xf32> to vector<16x32xbf16>
    %cst_74 = arith.constant dense<0.000000e+00> : vector<16x128xf32>
    %200 = tpu.matmul %199, %197, %cst_74 {dimension_numbers = #tpu.dot_dimension_numbers<[1], [0], [0], [1], [0, 0, 1, 1], [], []>} : vector<16x32xbf16>, vector<32x128xbf16>, vector<16x128xf32> -> vector<16x128xf32>
    %201 = arith.addf %196, %200 : vector<16x128xf32>
    %c544 = arith.constant 544 : index
    %c0_75 = arith.constant 0 : index
    %202 = vector.load %arg4[%c544, %c0_75] : memref<1760x128xbf16, #tpu.memory_space<vmem>>, vector<32x128xbf16>
    %203 = vector.extract_strided_slice %162 {offsets = [128, 0], sizes = [16, 32], strides = [1, 1]} : vector<144x32xf32> to vector<16x32xf32>
    %204 = arith.truncf %203 : vector<16x32xf32> to vector<16x32xbf16>
    %cst_76 = arith.constant dense<0.000000e+00> : vector<16x128xf32>
    %205 = tpu.matmul %204, %202, %cst_76 {dimension_numbers = #tpu.dot_dimension_numbers<[1], [0], [0], [1], [0, 0, 1, 1], [], []>} : vector<16x32xbf16>, vector<32x128xbf16>, vector<16x128xf32> -> vector<16x128xf32>
    %206 = arith.addf %201, %205 : vector<16x128xf32>
    %c176 = arith.constant 176 : index
    %c0_77 = arith.constant 0 : index
    %207 = vector.load %arg2[%c176, %c0_77] : memref<288x32xf32, #tpu.memory_space<vmem>>, vector<16x16xf32>
    %208 = arith.mulf %148, %148 : vector<16x2xf32>
    %cst_78 = arith.constant dense<0.000000e+00> : vector<16x2xf32>
    %209 = tpu.matmul %207, %208, %cst_78 {dimension_numbers = #tpu.dot_dimension_numbers<[1], [0], [0], [1], [0, 0, 1, 1], [], []>} : vector<16x16xf32>, vector<16x2xf32>, vector<16x2xf32> -> vector<16x2xf32>
    %cst_79 = arith.constant 9.99999993E-9 : f32
    %210 = vector.broadcast %cst_79 : f32 to vector<16x2xf32>
    %211 = arith.addf %209, %210 : vector<16x2xf32>
    %212 = math.rsqrt %211 : vector<16x2xf32>
    %213 = vector.extract_strided_slice %212 {offsets = [0, 1], sizes = [16, 1], strides = [1, 1]} : vector<16x2xf32> to vector<16x1xf32>
    %214 = vector.extract_strided_slice %212 {offsets = [0, 0], sizes = [16, 1], strides = [1, 1]} : vector<16x2xf32> to vector<16x1xf32>
    %215 = vector.shape_cast %45 : vector<1x128xi1> to vector<1x128xi1>
    %216 = vector.broadcast %215 : vector<1x128xi1> to vector<16x128xi1>
    %217 = vector.shape_cast %213 : vector<16x1xf32> to vector<16x1xf32>
    %218 = vector.broadcast %217 : vector<16x1xf32> to vector<16x128xf32>
    %219 = vector.shape_cast %214 : vector<16x1xf32> to vector<16x1xf32>
    %220 = vector.broadcast %219 : vector<16x1xf32> to vector<16x128xf32>
    %221 = arith.select %216, %218, %220 : vector<16x128xi1>, vector<16x128xf32>
    %222 = arith.mulf %206, %221 : vector<16x128xf32>
    %223 = vector.broadcast %149 : vector<16x1xf32> to vector<16x128xf32>
    %224 = arith.addf %222, %223 : vector<16x128xf32>
    %cst_80 = arith.constant 0.000000e+00 : f32
    %225 = vector.broadcast %cst_80 : f32 to vector<16x128xf32>
    %226 = arith.cmpf oge, %224, %225 : vector<16x128xf32>
    %cst_81 = arith.constant 2.000000e-01 : f32
    %227 = vector.broadcast %cst_81 : f32 to vector<16x128xf32>
    %228 = arith.mulf %227, %224 : vector<16x128xf32>
    %229 = arith.select %226, %224, %228 : vector<16x128xi1>, vector<16x128xf32>
    %cst_82 = arith.constant 1.41421354 : f32
    %230 = vector.broadcast %cst_82 : f32 to vector<16x128xf32>
    %231 = arith.mulf %229, %230 : vector<16x128xf32>
    %232 = vector.extract_strided_slice %39 {offsets = [32, 0], sizes = [16, 2], strides = [1, 1]} : vector<80x2xf32> to vector<16x2xf32>
    %c208_83 = arith.constant 208 : index
    %c5 = arith.constant 5 : index
    %233 = vector.load %arg2[%c208_83, %c5] : memref<288x32xf32, #tpu.memory_space<vmem>>, vector<16x1xf32>
    %234 = vector.extract_strided_slice %232 {offsets = [0, 1], sizes = [16, 1], strides = [1, 1]} : vector<16x2xf32> to vector<16x1xf32>
    %235 = vector.extract_strided_slice %232 {offsets = [0, 0], sizes = [16, 1], strides = [1, 1]} : vector<16x2xf32> to vector<16x1xf32>
    %236 = vector.shape_cast %45 : vector<1x128xi1> to vector<1x128xi1>
    %237 = vector.broadcast %236 : vector<1x128xi1> to vector<16x128xi1>
    %238 = vector.shape_cast %234 : vector<16x1xf32> to vector<16x1xf32>
    %239 = vector.broadcast %238 : vector<16x1xf32> to vector<16x128xf32>
    %240 = vector.shape_cast %235 : vector<16x1xf32> to vector<16x1xf32>
    %241 = vector.broadcast %240 : vector<16x1xf32> to vector<16x128xf32>
    %242 = arith.select %237, %239, %241 : vector<16x128xi1>, vector<16x128xf32>
    %243 = arith.mulf %231, %242 : vector<16x128xf32>
    %244 = arith.truncf %243 : vector<16x128xf32> to vector<16x128xbf16>
    %c288_84 = arith.constant 288 : index
    %c0_85 = arith.constant 0 : index
    %245 = vector.load %arg3[%c288_84, %c0_85] : memref<464x16xbf16, #tpu.memory_space<vmem>>, vector<144x16xbf16>
    %cst_86 = arith.constant dense<0.000000e+00> : vector<144x128xf32>
    %246 = tpu.matmul %245, %244, %cst_86 {dimension_numbers = #tpu.dot_dimension_numbers<[1], [0], [0], [1], [0, 0, 1, 1], [], []>} : vector<144x16xbf16>, vector<16x128xbf16>, vector<144x128xf32> -> vector<144x128xf32>
    %c576 = arith.constant 576 : index
    %c0_87 = arith.constant 0 : index
    %247 = vector.load %arg4[%c576, %c0_87] : memref<1760x128xbf16, #tpu.memory_space<vmem>>, vector<128x128xbf16>
    %248 = vector.extract_strided_slice %246 {offsets = [0, 0], sizes = [16, 128], strides = [1, 1]} : vector<144x128xf32> to vector<16x128xf32>
    %249 = arith.truncf %248 : vector<16x128xf32> to vector<16x128xbf16>
    %cst_88 = arith.constant dense<0.000000e+00> : vector<16x128xf32>
    %250 = tpu.matmul %249, %247, %cst_88 {dimension_numbers = #tpu.dot_dimension_numbers<[1], [0], [0], [1], [0, 0, 1, 1], [], []>} : vector<16x128xbf16>, vector<128x128xbf16>, vector<16x128xf32> -> vector<16x128xf32>
    %c704 = arith.constant 704 : index
    %c0_89 = arith.constant 0 : index
    %251 = vector.load %arg4[%c704, %c0_89] : memref<1760x128xbf16, #tpu.memory_space<vmem>>, vector<128x128xbf16>
    %252 = vector.extract_strided_slice %246 {offsets = [16, 0], sizes = [16, 128], strides = [1, 1]} : vector<144x128xf32> to vector<16x128xf32>
    %253 = arith.truncf %252 : vector<16x128xf32> to vector<16x128xbf16>
    %cst_90 = arith.constant dense<0.000000e+00> : vector<16x128xf32>
    %254 = tpu.matmul %253, %251, %cst_90 {dimension_numbers = #tpu.dot_dimension_numbers<[1], [0], [0], [1], [0, 0, 1, 1], [], []>} : vector<16x128xbf16>, vector<128x128xbf16>, vector<16x128xf32> -> vector<16x128xf32>
    %255 = arith.addf %250, %254 : vector<16x128xf32>
    %c832 = arith.constant 832 : index
    %c0_91 = arith.constant 0 : index
    %256 = vector.load %arg4[%c832, %c0_91] : memref<1760x128xbf16, #tpu.memory_space<vmem>>, vector<128x128xbf16>
    %257 = vector.extract_strided_slice %246 {offsets = [32, 0], sizes = [16, 128], strides = [1, 1]} : vector<144x128xf32> to vector<16x128xf32>
    %258 = arith.truncf %257 : vector<16x128xf32> to vector<16x128xbf16>
    %cst_92 = arith.constant dense<0.000000e+00> : vector<16x128xf32>
    %259 = tpu.matmul %258, %256, %cst_92 {dimension_numbers = #tpu.dot_dimension_numbers<[1], [0], [0], [1], [0, 0, 1, 1], [], []>} : vector<16x128xbf16>, vector<128x128xbf16>, vector<16x128xf32> -> vector<16x128xf32>
    %260 = arith.addf %255, %259 : vector<16x128xf32>
    %c960 = arith.constant 960 : index
    %c0_93 = arith.constant 0 : index
    %261 = vector.load %arg4[%c960, %c0_93] : memref<1760x128xbf16, #tpu.memory_space<vmem>>, vector<128x128xbf16>
    %262 = vector.extract_strided_slice %246 {offsets = [48, 0], sizes = [16, 128], strides = [1, 1]} : vector<144x128xf32> to vector<16x128xf32>
    %263 = arith.truncf %262 : vector<16x128xf32> to vector<16x128xbf16>
    %cst_94 = arith.constant dense<0.000000e+00> : vector<16x128xf32>
    %264 = tpu.matmul %263, %261, %cst_94 {dimension_numbers = #tpu.dot_dimension_numbers<[1], [0], [0], [1], [0, 0, 1, 1], [], []>} : vector<16x128xbf16>, vector<128x128xbf16>, vector<16x128xf32> -> vector<16x128xf32>
    %265 = arith.addf %260, %264 : vector<16x128xf32>
    %c1088 = arith.constant 1088 : index
    %c0_95 = arith.constant 0 : index
    %266 = vector.load %arg4[%c1088, %c0_95] : memref<1760x128xbf16, #tpu.memory_space<vmem>>, vector<128x128xbf16>
    %267 = vector.extract_strided_slice %246 {offsets = [64, 0], sizes = [16, 128], strides = [1, 1]} : vector<144x128xf32> to vector<16x128xf32>
    %268 = arith.truncf %267 : vector<16x128xf32> to vector<16x128xbf16>
    %cst_96 = arith.constant dense<0.000000e+00> : vector<16x128xf32>
    %269 = tpu.matmul %268, %266, %cst_96 {dimension_numbers = #tpu.dot_dimension_numbers<[1], [0], [0], [1], [0, 0, 1, 1], [], []>} : vector<16x128xbf16>, vector<128x128xbf16>, vector<16x128xf32> -> vector<16x128xf32>
    %270 = arith.addf %265, %269 : vector<16x128xf32>
    %c1216 = arith.constant 1216 : index
    %c0_97 = arith.constant 0 : index
    %271 = vector.load %arg4[%c1216, %c0_97] : memref<1760x128xbf16, #tpu.memory_space<vmem>>, vector<128x128xbf16>
    %272 = vector.extract_strided_slice %246 {offsets = [80, 0], sizes = [16, 128], strides = [1, 1]} : vector<144x128xf32> to vector<16x128xf32>
    %273 = arith.truncf %272 : vector<16x128xf32> to vector<16x128xbf16>
    %cst_98 = arith.constant dense<0.000000e+00> : vector<16x128xf32>
    %274 = tpu.matmul %273, %271, %cst_98 {dimension_numbers = #tpu.dot_dimension_numbers<[1], [0], [0], [1], [0, 0, 1, 1], [], []>} : vector<16x128xbf16>, vector<128x128xbf16>, vector<16x128xf32> -> vector<16x128xf32>
    %275 = arith.addf %270, %274 : vector<16x128xf32>
    %c1344 = arith.constant 1344 : index
    %c0_99 = arith.constant 0 : index
    %276 = vector.load %arg4[%c1344, %c0_99] : memref<1760x128xbf16, #tpu.memory_space<vmem>>, vector<128x128xbf16>
    %277 = vector.extract_strided_slice %246 {offsets = [96, 0], sizes = [16, 128], strides = [1, 1]} : vector<144x128xf32> to vector<16x128xf32>
    %278 = arith.truncf %277 : vector<16x128xf32> to vector<16x128xbf16>
    %cst_100 = arith.constant dense<0.000000e+00> : vector<16x128xf32>
    %279 = tpu.matmul %278, %276, %cst_100 {dimension_numbers = #tpu.dot_dimension_numbers<[1], [0], [0], [1], [0, 0, 1, 1], [], []>} : vector<16x128xbf16>, vector<128x128xbf16>, vector<16x128xf32> -> vector<16x128xf32>
    %280 = arith.addf %275, %279 : vector<16x128xf32>
    %c1472 = arith.constant 1472 : index
    %c0_101 = arith.constant 0 : index
    %281 = vector.load %arg4[%c1472, %c0_101] : memref<1760x128xbf16, #tpu.memory_space<vmem>>, vector<128x128xbf16>
    %282 = vector.extract_strided_slice %246 {offsets = [112, 0], sizes = [16, 128], strides = [1, 1]} : vector<144x128xf32> to vector<16x128xf32>
    %283 = arith.truncf %282 : vector<16x128xf32> to vector<16x128xbf16>
    %cst_102 = arith.constant dense<0.000000e+00> : vector<16x128xf32>
    %284 = tpu.matmul %283, %281, %cst_102 {dimension_numbers = #tpu.dot_dimension_numbers<[1], [0], [0], [1], [0, 0, 1, 1], [], []>} : vector<16x128xbf16>, vector<128x128xbf16>, vector<16x128xf32> -> vector<16x128xf32>
    %285 = arith.addf %280, %284 : vector<16x128xf32>
    %c1600 = arith.constant 1600 : index
    %c0_103 = arith.constant 0 : index
    %286 = vector.load %arg4[%c1600, %c0_103] : memref<1760x128xbf16, #tpu.memory_space<vmem>>, vector<128x128xbf16>
    %287 = vector.extract_strided_slice %246 {offsets = [128, 0], sizes = [16, 128], strides = [1, 1]} : vector<144x128xf32> to vector<16x128xf32>
    %288 = arith.truncf %287 : vector<16x128xf32> to vector<16x128xbf16>
    %cst_104 = arith.constant dense<0.000000e+00> : vector<16x128xf32>
    %289 = tpu.matmul %288, %286, %cst_104 {dimension_numbers = #tpu.dot_dimension_numbers<[1], [0], [0], [1], [0, 0, 1, 1], [], []>} : vector<16x128xbf16>, vector<128x128xbf16>, vector<16x128xf32> -> vector<16x128xf32>
    %290 = arith.addf %285, %289 : vector<16x128xf32>
    %c192_105 = arith.constant 192 : index
    %c0_106 = arith.constant 0 : index
    %291 = vector.load %arg2[%c192_105, %c0_106] : memref<288x32xf32, #tpu.memory_space<vmem>>, vector<16x16xf32>
    %292 = arith.mulf %232, %232 : vector<16x2xf32>
    %cst_107 = arith.constant dense<0.000000e+00> : vector<16x2xf32>
    %293 = tpu.matmul %291, %292, %cst_107 {dimension_numbers = #tpu.dot_dimension_numbers<[1], [0], [0], [1], [0, 0, 1, 1], [], []>} : vector<16x16xf32>, vector<16x2xf32>, vector<16x2xf32> -> vector<16x2xf32>
    %cst_108 = arith.constant 9.99999993E-9 : f32
    %294 = vector.broadcast %cst_108 : f32 to vector<16x2xf32>
    %295 = arith.addf %293, %294 : vector<16x2xf32>
    %296 = math.rsqrt %295 : vector<16x2xf32>
    %297 = vector.extract_strided_slice %296 {offsets = [0, 1], sizes = [16, 1], strides = [1, 1]} : vector<16x2xf32> to vector<16x1xf32>
    %298 = vector.extract_strided_slice %296 {offsets = [0, 0], sizes = [16, 1], strides = [1, 1]} : vector<16x2xf32> to vector<16x1xf32>
    %299 = vector.shape_cast %45 : vector<1x128xi1> to vector<1x128xi1>
    %300 = vector.broadcast %299 : vector<1x128xi1> to vector<16x128xi1>
    %301 = vector.shape_cast %297 : vector<16x1xf32> to vector<16x1xf32>
    %302 = vector.broadcast %301 : vector<16x1xf32> to vector<16x128xf32>
    %303 = vector.shape_cast %298 : vector<16x1xf32> to vector<16x1xf32>
    %304 = vector.broadcast %303 : vector<16x1xf32> to vector<16x128xf32>
    %305 = arith.select %300, %302, %304 : vector<16x128xi1>, vector<16x128xf32>
    %306 = arith.mulf %290, %305 : vector<16x128xf32>
    %307 = vector.broadcast %233 : vector<16x1xf32> to vector<16x128xf32>
    %308 = arith.addf %306, %307 : vector<16x128xf32>
    %cst_109 = arith.constant 0.000000e+00 : f32
    %309 = vector.broadcast %cst_109 : f32 to vector<16x128xf32>
    %310 = arith.cmpf oge, %308, %309 : vector<16x128xf32>
    %cst_110 = arith.constant 2.000000e-01 : f32
    %311 = vector.broadcast %cst_110 : f32 to vector<16x128xf32>
    %312 = arith.mulf %311, %308 : vector<16x128xf32>
    %313 = arith.select %310, %308, %312 : vector<16x128xi1>, vector<16x128xf32>
    %cst_111 = arith.constant 1.41421354 : f32
    %314 = vector.broadcast %cst_111 : f32 to vector<16x128xf32>
    %315 = arith.mulf %313, %314 : vector<16x128xf32>
    %316 = vector.extract_strided_slice %39 {offsets = [64, 0], sizes = [16, 2], strides = [1, 1]} : vector<80x2xf32> to vector<16x2xf32>
    %c208_112 = arith.constant 208 : index
    %c7 = arith.constant 7 : index
    %317 = vector.load %arg2[%c208_112, %c7] : memref<288x32xf32, #tpu.memory_space<vmem>>, vector<16x1xf32>
    %318 = vector.extract_strided_slice %316 {offsets = [0, 1], sizes = [16, 1], strides = [1, 1]} : vector<16x2xf32> to vector<16x1xf32>
    %319 = vector.extract_strided_slice %316 {offsets = [0, 0], sizes = [16, 1], strides = [1, 1]} : vector<16x2xf32> to vector<16x1xf32>
    %320 = vector.shape_cast %45 : vector<1x128xi1> to vector<1x128xi1>
    %321 = vector.broadcast %320 : vector<1x128xi1> to vector<16x128xi1>
    %322 = vector.shape_cast %318 : vector<16x1xf32> to vector<16x1xf32>
    %323 = vector.broadcast %322 : vector<16x1xf32> to vector<16x128xf32>
    %324 = vector.shape_cast %319 : vector<16x1xf32> to vector<16x1xf32>
    %325 = vector.broadcast %324 : vector<16x1xf32> to vector<16x128xf32>
    %326 = arith.select %321, %323, %325 : vector<16x128xi1>, vector<16x128xf32>
    %327 = arith.mulf %315, %326 : vector<16x128xf32>
    %328 = arith.truncf %327 : vector<16x128xf32> to vector<16x128xbf16>
    %c448_113 = arith.constant 448 : index
    %c0_114 = arith.constant 0 : index
    %329 = vector.load %arg3[%c448_113, %c0_114] : memref<464x16xbf16, #tpu.memory_space<vmem>>, vector<16x16xbf16>
    %cst_115 = arith.constant dense<0.000000e+00> : vector<16x128xf32>
    %330 = tpu.matmul %329, %328, %cst_115 {dimension_numbers = #tpu.dot_dimension_numbers<[1], [0], [0], [1], [0, 0, 1, 1], [], []>} : vector<16x16xbf16>, vector<16x128xbf16>, vector<16x128xf32> -> vector<16x128xf32>
    %331 = vector.broadcast %317 : vector<16x1xf32> to vector<16x128xf32>
    %332 = arith.addf %330, %331 : vector<16x128xf32>
    %333 = arith.truncf %147 : vector<16x32xf32> to vector<16x32xbf16>
    %c1728 = arith.constant 1728 : index
    %c0_116 = arith.constant 0 : index
    %334 = vector.load %arg4[%c1728, %c0_116] : memref<1760x128xbf16, #tpu.memory_space<vmem>>, vector<32x128xbf16>
    %cst_117 = arith.constant dense<0.000000e+00> : vector<16x128xf32>
    %335 = tpu.matmul %333, %334, %cst_117 {dimension_numbers = #tpu.dot_dimension_numbers<[1], [0], [0], [1], [0, 0, 1, 1], [], []>} : vector<16x32xbf16>, vector<32x128xbf16>, vector<16x128xf32> -> vector<16x128xf32>
    %336 = arith.addf %332, %335 : vector<16x128xf32>
    %337 = vector.extract_strided_slice %336 {offsets = [0, 0], sizes = [3, 128], strides = [1, 1]} : vector<16x128xf32> to vector<3x128xf32>
    %c0_118 = arith.constant 0 : index
    %c0_119 = arith.constant 0 : index
    %338 = vector.load %arg5[%c0_118, %c0_119] : memref<3x128xf32, #tpu.memory_space<vmem>>, vector<3x128xf32>
    tpu.vector_store %arg5[%c0_118, %c0_119], %337 {strides = array<i32>} : memref<3x128xf32, #tpu.memory_space<vmem>>, vector<3x128xf32>,
    return
  }
}

</mosaic_0001>

<bundles_post_ra>
// kernel: forward.1
= control target key start
LH: loop header
LB: loop body
LE: loop exit
PB: predicated region body
PF: predicated region fallthrough
CT: control target
= control target key end

     0   :  { %10 = vsyncpa [#allocation3], 0  ;;  %s5854_s0 = inlined_call_operand.vmem [shape: f32[32,2], index: 0, kind: input, shape index: {}]   ;;  %s5855_s1 = inlined_call_operand.vmem [shape: f32[1,288], index: 1, kind: input, shape index: {}]   ;;  %s5856_s2 = inlined_call_operand.vmem [shape: f32[288,32], index: 2, kind: input, shape index: {}]   ;;  %s5857_s3 = inlined_call_operand.hbm [shape: bf16[464,16], index: 3, kind: input, shape index: {}]   ;;  %s5858_s4 = inlined_call_operand.hbm [shape: bf16[1760,128], index: 4, kind: input, shape index: {}]   ;;  %s5859_s5 = inlined_call_operand.vmem [shape: f32[3,128], index: 5, kind: output, shape index: {}]  }
   0x1   :  { %11 = vsyncpa [#allocation5], 0  ;;  %s5159_s18 = smov [#allocation2]  }
   0x2   :  { %s23_s19 = sshll.u32 %s5159_s18, 4  ;;  %s24_s19 = int_to_ptr.vmem [resolvable:$true] %s23_s19 }
   0x3   :  { %s5123_s20 = scalar_lea.vmem %s24_s19, 3712  ;;  %p5128_p1 = scmp.lt.s32.totalorder %s24_s19, %s24_s19 }
   0x4   :  { %p5124_p0 = scmp.ne.s32.totalorder %s24_s19, %s5123_s20  ;;  %p5129_p2 = scmp.lt.s32.totalorder %s5123_s20, %s5123_s20 }
   0x6   :  { %p5130_p3 = por %p5129_p2, %p5128_p1 }
   0x8   :  { %p5131_p4 = pnand %p5130_p3, %p5124_p0 }
   0xa   :  { %5134 = shalt.err (!%p5131_p4)
}
   0xb   :  { %s5160_s1 = smov 64   ;;  %s5161_s21 = smov 4  }
   0xc   :  { %29 = dma.hbm_to_vmem [thread:$0]  %s5857_s3, 3712, %s24_s19, [#allocation3], %s5160_s1, %s5160_s1, %s5161_s21  }
   0xd   :  { %s5162_s24 = smov [#allocation4]  }
   0xe   :  { %s35_s25 = sshll.u32 %s5162_s24, 4  ;;  %s36_s25 = int_to_ptr.vmem [resolvable:$true] %s35_s25 }
   0xf   :  { %s5143_s26 = scalar_lea.vmem %s36_s25, 14080  ;;  %p5148_p6 = scmp.lt.s32.totalorder %s36_s25, %s36_s25 }
  0x10   :  { %p5144_p5 = scmp.ne.s32.totalorder %s36_s25, %s5143_s26  ;;  %p5149_p7 = scmp.lt.s32.totalorder %s5143_s26, %s5143_s26 }
  0x12   :  { %p5150_p8 = por %p5149_p7, %p5148_p6 }
  0x14   :  { %p5151_p9 = pnand %p5150_p8, %p5144_p5 }
  0x16   :  { %5154 = shalt.err (!%p5151_p9)
}
  0x17   :  { %41 = dma.hbm_to_vmem [thread:$0]  %s5858_s4, 14080, %s36_s25, [#allocation5], %s5160_s1, %s5160_s1, %s5161_s21  }
  0x18   :  { %5155 = dma.done.wait [#allocation3], 3712  }
  0x19   :  { %5156 = vsyncadd [#allocation3], 4294963584 }
  0x1a   :  { %5157 = dma.done.wait [#allocation5], 14080  }
  0x1b   :  { %5158 = vsyncadd [#allocation5], 4294953216  ;;  %v5163_v0 = vmov 1   ;;  %vm107_vm0 = vcmask 261120   ;;  %v49_v1 = vld [vmem:[%s5854_s0] sm:$0xff]  ;;  %v50_v2 = vld [vmem:[%s5854_s0 + $0x8] sm:$0xff] }
  0x1c   :  { %4921 = vset.pattern.permute.xlu1 %v5163_v0  ;;  %4920 = vset.pattern.permute.xlu0 %v5163_v0  ;;  %v51_v3 = vld [vmem:[%s5854_s0 + $0x10] sm:$0xff]  ;;  %vm57_vm1 = vcmask 15360   ;;  %v52_v4 = vld [vmem:[%s5854_s0 + $0x18] sm:$0xff]  ;;  %v53_v5 = vmul.f32 %v49_v1, %v49_v1  ;;  %v54_v6 = vmul.f32 %v50_v2, %v50_v2  ;;  %v79_v8 = vld [vmem:[%s5856_s2] sm:$0xff]  ;;  %v5164_v38 = vmov 2  }
  0x1d   :  { %v55_v7 = vmul.f32 %v51_v3, %v51_v3  ;;  %v56_v9 = vmul.f32 %v52_v4, %v52_v4  ;;  %4376 = vmatprep.mubr.msk.f32.mxu0 %vm107_vm0, %v79_v8  ;;  %v5230_v10 = vld [vmem:[%s5856_s2 + $0xe8] sm:$0xff]  ;;  %v5239_v14 = vld [vmem:[%s5856_s2 + $0xd8] sm:$0xff]  ;;  %v5244_v15 = vld [vmem:[%s5856_s2 + $0xe0] sm:$0xff]  ;;  %vm5167_vm10 = vmmov 0   ;;  %vm665_vm12 = vcmask 130048  }
  0x1e   :  { %v58_v11 = vsel %vm57_vm1, %v53_v5, 0.0  ;;  %v59_v12 = vsel %vm57_vm1, %v54_v6, 0.0  ;;  %104 = vperm.xlu0 %4920, %v5230_v10   ;;  %94 = vperm.xlu1 %4921, %v5239_v14   ;;  %v5251_v18 = vld [vmem:[%s5856_s2 + $0xd0] sm:$0xff]  ;;  %v80_v34 = vld [vmem:[%s5856_s2 + $0x8] sm:$0xff]  ;;  %v82_v36 = vld [vmem:[%s5856_s2 + $0x18] sm:$0xff] }
  0x1f   :  { %v61_v13 = vsel %vm57_vm1, %v55_v7, 0.0  ;;  %v60_v16 = vadd.f32 %v59_v12, %v58_v11  ;;  %v63_v17 = vsel %vm57_vm1, %v56_v9, 0.0  ;;  %v81_v35 = vld [vmem:[%s5856_s2 + $0x10] sm:$0xff]  ;;  %v221_v37 = vld [vmem:[%s5856_s2 + $0x20] sm:$0xff]  ;;  %v222_v63 = vld [vmem:[%s5856_s2 + $0x28] sm:$0xff] }
  0x20   :  { %4390 = vmatprep.mubr.msk.f32.mxu1 %vm107_vm0, %v221_v37 }
  0x21   :  { %v62_v19 = vadd.f32 %v61_v13, %v60_v16 }
  0x22   :  { %99 = vperm.xlu0 %4920, %v5244_v15   ;;  %89 = vperm.xlu1 %4921, %v5251_v18  }
  0x23   :  { %v64_v20 = vadd.f32 %v63_v17, %v62_v19 }
  0x25   :  { %v65_v21 = vrot.slane %v64_v20, 4 }
  0x26   :  { %4923 = vset.pattern.permute.xlu1 %v5164_v38  ;;  %4922 = vset.pattern.permute.xlu0 %v5164_v38 }
  0x27   :  { %v66_v22 = vadd.f32 %v65_v21, %v64_v20  ;;  %234 = vperm.xlu1 %4923, %v5244_v15   ;;  %238 = vperm.xlu0 %4922, %v5230_v10  }
  0x29   :  { %v67_v23 = vrot.slane %v66_v22, 2 }
  0x2b   :  { %v68_v24 = vadd.f32 %v67_v23, %v66_v22  ;;  %230 = vperm.xlu1 %4923, %v5239_v14   ;;  %226 = vperm.xlu0 %4922, %v5251_v18  }
  0x2d   :  { %v69_v25 = vrot.slane %v68_v24, 1 }
  0x2f   :  { %v70_v26 = vadd.f32 %v69_v25, %v68_v24 }
  0x31   :  { %v72_v27 = vmul.f32 0.03125, %v70_v26 }
  0x33   :  { %v73_v28 = vadd.f32 1e-08, %v72_v27 }
  0x35   :  { %5097 = vrsqrt.f32 %v73_v28 }
  0x42   :  { %v5098_v29 = vpop.eup %5097 }
  0x43   :  { %v78_v30 = vmul.f32 %v5098_v29, %v52_v4  ;;  %v77_v31 = vmul.f32 %v5098_v29, %v51_v3  ;;  %v76_v32 = vmul.f32 %v5098_v29, %v50_v2  ;;  %v75_v33 = vmul.f32 %v5098_v29, %v49_v1  ;;  %v223_v1 = vld [vmem:[%s5856_s2 + $0x30] sm:$0xff]  ;;  %v224_v2 = vld [vmem:[%s5856_s2 + $0x38] sm:$0xff]  ;;  %v354_v3 = vld [vmem:[%s5856_s2 + $0x40] sm:$0xff] }
  0x44   :  { %v5165_v4 = vmov 0  }
  0x45   :  { %4368 = vmatprep.subr.mxu0 %v78_v30  ;;  %4925 = vset.pattern.permute.xlu0 %v5165_v4 }
  0x46   :  { %4369 = vmatpush3.msra.mxu0 %v78_v30  ;;  %4924 = vset.pattern.permute.xlu1 %v5165_v4 }
  0x47   :  { %4370 = vmatprep.subr.mxu0 %v77_v31  ;;  %381 = vperm.xlu0 %4925, %v5239_v14  }
  0x48   :  { %4371 = vmatpush3.msra.mxu0 %v77_v31  ;;  %376 = vperm.xlu1 %4924, %v5251_v18   ;;  %v355_v31 = vld [vmem:[%s5856_s2 + $0x48] sm:$0xff] }
  0x49   :  { %4372 = vmatprep.subr.mxu0 %v76_v32 }
  0x4a   :  { %4373 = vmatpush3.msra.mxu0 %v76_v32  ;;  %v356_v32 = vld [vmem:[%s5856_s2 + $0x50] sm:$0xff] }
  0x4b   :  { %4374 = vmatprep.subr.mxu0 %v75_v33 }
  0x4c   :  { %4375 = vmatpush3.msra.mxu0 %v75_v33  ;;  %4926 = vset.pattern.permute.xlu1 %v5163_v0  ;;  %v357_v33 = vld [vmem:[%s5856_s2 + $0x58] sm:$0xff] }
  0x4d   :  { %4377 = vmatmul.mubr.msk.f32.vlgmr.msra.gmra.mxu0 %vm107_vm0, %v80_v34 }
  0x4e   :  { %4379 = vmatprep.mubr.msk.f32.mxu0 %vm107_vm0, %v81_v35 }
  0x51   :  { %4380 = vmatmul.mubr.msk.f32.gmra.mxu0 %vm107_vm0, %v82_v36 }
  0x52   :  { %4404 = vmatprep.mubr.msk.f32.mxu0 %vm107_vm0, %v354_v3  ;;  %v358_v3 = vld [vmem:[%s5856_s2 + $0x60] sm:$0xff] }
  0x99   :  { %v95_v39 = vpop.permute.xlu1 %94  ;;  %v105_v40 = vpop.permute.xlu0 %104 }
  0x9d   :  { %v90_v42 = vpop.permute.xlu1 %89  ;;  %v100_v48 = vpop.permute.xlu0 %99 }
  0xa2   :  { %v235_v5 = vpop.permute.xlu1 %234  ;;  %v239_v6 = vpop.permute.xlu0 %238 }
  0xa6   :  { %v231_v7 = vpop.permute.xlu1 %230  ;;  %v227_v9 = vpop.permute.xlu0 %226 }
  0xc2   :  { %v382_v34 = vpop.permute.xlu0 %381 }
  0xc3   :  { %v377_v36 = vpop.permute.xlu1 %376 }
 0x10d   :  { %v4378_v41 = vpop.f32.mrf.mxu0 }
 0x10e   :  { %v192_v44 = vadd.f32 %v4378_v41, %v95_v39  ;;  %v363_v41 = vld [vmem:[%s5856_s2 + $0x88] sm:$0xff] }
 0x10f   :  { %v186_v43 = vpop.f32.mrf.mxu0 }
 0x110   :  { %v187_v46 = vadd.f32 %v186_v43, %v90_v42  ;;  %v210_v50 = vmul.f32 0.2, %v192_v44  ;;  %vm206_vm3 = vcmp.ge.f32.partialorder %v192_v44, 0.0  ;;  %v5166_v42 = vmov 0.0  }
 0x111   :  { %v4381_v45 = vpop.f32.mrf.mxu0 }
 0x112   :  { %v202_v47 = vadd.f32 %v4381_v45, %v105_v40  ;;  %v209_v53 = vmul.f32 0.2, %v187_v46  ;;  %vm205_vm5 = vcmp.ge.f32.partialorder %v187_v46, 0.0  ;;  %v214_v58 = vsel %vm206_vm3, %v192_v44, %v210_v50  ;;  %v362_v40 = vld [vmem:[%s5856_s2 + $0x80] sm:$0xff] }
 0x113   :  { %v196_v49 = vpop.f32.mrf.mxu0  ;;  %v218_v61 = vmul.f32 1.4142135, %v214_v58  ;;  %v4961_v58 = vld [vmem:[#allocation2 + $0x8] sm:$0xff]  }
 0x114   :  { %v212_v51 = vmul.f32 0.2, %v202_v47  ;;  %v197_v52 = vadd.f32 %v196_v49, %v100_v48  ;;  %vm208_vm2 = vcmp.ge.f32.partialorder %v202_v47, 0.0  ;;  %v213_v60 = vsel %vm205_vm5, %v187_v46, %v209_v53  ;;  %v574_v49 = vld [vmem:[%s5856_s2 + $0x98] sm:$0xff] }
 0x115   :  { %v217_v62 = vmul.f32 1.4142135, %v213_v60  ;;  %v4963_v60 = vld [vmem:[#allocation2 + $0x18] sm:$0xff]  }
 0x116   :  { %vm207_vm4 = vcmp.ge.f32.partialorder %v197_v52, 0.0  ;;  %v211_v54 = vmul.f32 0.2, %v197_v52  ;;  %v216_v55 = vsel %vm208_vm2, %v202_v47, %v212_v51  ;;  %v573_v47 = vld [vmem:[%s5856_s2 + $0x90] sm:$0xff] }
 0x117   :  { %v220_v56 = vmul.f32 1.4142135, %v216_v55  ;;  %v4959_v55 = vld [vmem:[#allocation4 + $0x78] sm:$0xff]  }
 0x118   :  { %v215_v57 = vsel %vm207_vm4, %v197_v52, %v211_v54  ;;  %v4958_v54 = vld [vmem:[#allocation2] sm:$0xff]  }
 0x119   :  { %4382 = vmatprep.subr.mxu1 %v220_v56  ;;  %v219_v59 = vmul.f32 1.4142135, %v215_v57 }
 0x11a   :  { %4383 = vmatpush3.msra.mxu1 %v220_v56  ;;  %v4960_v56 = vld [vmem:[#allocation4 + $0x70] sm:$0xff]  }
 0x11b   :  { %4384 = vmatprep.subr.mxu1 %v219_v59 }
 0x11c   :  { %4385 = vmatpush3.msra.mxu1 %v219_v59  ;;  %v4962_v59 = vld [vmem:[#allocation2 + $0x10] sm:$0xff]  }
 0x11d   :  { %4386 = vmatprep.subr.mxu1 %v218_v61 }
 0x11e   :  { %4387 = vmatpush3.msra.mxu1 %v218_v61  ;;  %v4964_v61 = vld [vmem:[#allocation2 + $0x20] sm:$0xff]  }
 0x11f   :  { %4388 = vmatprep.subr.mxu1 %v217_v62 }
 0x120   :  { %4389 = vmatpush3.msra.mxu1 %v217_v62  ;;  %v4965_v62 = vld [vmem:[#allocation2 + $0x28] sm:$0xff]  }
 0x121   :  { %4391 = vmatmul.mubr.msk.f32.vlgmr.msra.gmra.mxu1 %vm107_vm0, %v222_v63  ;;  %v4966_v63 = vld [vmem:[#allocation2 + $0x30] sm:$0xff]  }
 0x122   :  { %4393 = vmatprep.mubr.msk.f32.mxu1 %vm107_vm0, %v223_v1  ;;  %v4967_v1 = vld [vmem:[#allocation2 + $0x38] sm:$0xff]  }
 0x125   :  { %4394 = vmatmul.mubr.msk.f32.gmra.mxu1 %vm107_vm0, %v224_v2  ;;  %v4968_v2 = vld [vmem:[#allocation2 + $0x40] sm:$0xff]  }
 0x126   :  { %4416 = vmatprep.mubr.msk.f32.mxu1 %vm107_vm0, %v362_v40  ;;  %v4976_v40 = vld [vmem:[#allocation4 + $0x30] sm:$0xff]  }
 0x1e1   :  { %v4392_v8 = vpop.f32.mrf.mxu1 }
 0x1e2   :  { %v325_v12 = vadd.f32 %v4392_v8, %v231_v7  ;;  %v360_v7 = vld [vmem:[%s5856_s2 + $0x70] sm:$0xff]  ;;  %v361_v8 = vld [vmem:[%s5856_s2 + $0x78] sm:$0xff] }
 0x1e3   :  { %v319_v11 = vpop.f32.mrf.mxu1 }
 0x1e4   :  { %v320_v16 = vadd.f32 %v319_v11, %v227_v9  ;;  %v343_v20 = vmul.f32 0.2, %v325_v12  ;;  %vm339_vm7 = vcmp.ge.f32.partialorder %v325_v12, 0.0  ;;  %v4970_v9 = vld [vmem:[#allocation4 + $0x10] sm:$0xff]  }
 0x1e5   :  { %v4395_v13 = vpop.f32.mrf.mxu1 }
 0x1e6   :  { %v335_v17 = vadd.f32 %v4395_v13, %v239_v6  ;;  %v342_v14 = vmul.f32 0.2, %v320_v16  ;;  %vm338_vm9 = vcmp.ge.f32.partialorder %v320_v16, 0.0  ;;  %v347_v25 = vsel %vm339_vm7, %v325_v12, %v343_v20  ;;  %v4969_v6 = vld [vmem:[#allocation4 + $0x18] sm:$0xff]  }
 0x1e7   :  { %v329_v19 = vpop.f32.mrf.mxu1  ;;  %v351_v29 = vmul.f32 1.4142135, %v347_v25  ;;  %v4972_v25 = vld [vmem:[#allocation4] sm:$0xff]  }
 0x1e8   :  { %vm341_vm6 = vcmp.ge.f32.partialorder %v335_v17, 0.0  ;;  %v345_v21 = vmul.f32 0.2, %v335_v17  ;;  %v330_v22 = vadd.f32 %v329_v19, %v235_v5  ;;  %v346_v28 = vsel %vm338_vm9, %v320_v16, %v342_v14  ;;  %v359_v5 = vld [vmem:[%s5856_s2 + $0x68] sm:$0xff]  ;;  %v4971_v14 = vld [vmem:[#allocation4 + $0x8] sm:$0xff]  }
 0x1e9   :  { %v350_v30 = vmul.f32 1.4142135, %v346_v28  ;;  %v4973_v28 = vld [vmem:[#allocation4 + $0x28] sm:$0xff]  }
 0x1ea   :  { %v349_v18 = vsel %vm341_vm6, %v335_v17, %v345_v21  ;;  %vm340_vm8 = vcmp.ge.f32.partialorder %v330_v22, 0.0  ;;  %v344_v23 = vmul.f32 0.2, %v330_v22 }
 0x1eb   :  { %v353_v24 = vmul.f32 1.4142135, %v349_v18 }
 0x1ec   :  { %v348_v26 = vsel %vm340_vm8, %v330_v22, %v344_v23 }
 0x1ed   :  { %v352_v27 = vmul.f32 1.4142135, %v348_v26  ;;  %4396 = vmatprep.subr.mxu0 %v353_v24  ;;  %4898 = vmatprep.subr.mxu1 %v353_v24 }
 0x1ee   :  { %4397 = vmatpush3.msra.mxu0 %v353_v24  ;;  %4902 = vmatpush3.msra.mxu1 %v353_v24 }
 0x1ef   :  { %4398 = vmatprep.subr.mxu0 %v352_v27  ;;  %4899 = vmatprep.subr.mxu1 %v352_v27 }
 0x1f0   :  { %4399 = vmatpush3.msra.mxu0 %v352_v27  ;;  %4903 = vmatpush3.msra.mxu1 %v352_v27 }
 0x1f1   :  { %4400 = vmatprep.subr.mxu0 %v351_v29  ;;  %4900 = vmatprep.subr.mxu1 %v351_v29 }
 0x1f2   :  { %4401 = vmatpush3.msra.mxu0 %v351_v29  ;;  %4904 = vmatpush3.msra.mxu1 %v351_v29 }
 0x1f3   :  { %4402 = vmatprep.subr.mxu0 %v350_v30  ;;  %4901 = vmatprep.subr.mxu1 %v350_v30 }
 0x1f4   :  { %4403 = vmatpush3.msra.mxu0 %v350_v30  ;;  %4905 = vmatpush3.msra.mxu1 %v350_v30 }
 0x1f5   :  { %4405 = vmatmul.mubr.msk.f32.vlgmr.msra.gmra.mxu0 %vm107_vm0, %v355_v31  ;;  %4417 = vmatmul.mubr.msk.f32.vlgmr.msra.gmra.mxu1 %vm107_vm0, %v363_v41 }
 0x1f6   :  { %4407 = vmatprep.mubr.msk.f32.mxu0 %vm107_vm0, %v356_v32  ;;  %4419 = vmatprep.subr.bf16.mxu1 %v5166_v42  ;;  %v4974_v32 = vld [vmem:[#allocation4 + $0x20] sm:$0xff]  }
 0x1f7   :  { %4457 = vmatprep.subr.bf16.mxu0 %v5166_v42  ;;  %4421 = vmatprep.mubr.msk.bf16.mxu1 %vm5167_vm10, %v5166_v42 }
 0x1f8   :  { %4458 = vmatpush3.bf16.msra.mxu0 %v4969_v6 }
 0x1f9   :  { %4408 = vmatmul.mubr.msk.f32.gmra.mxu0 %vm107_vm0, %v357_v33  ;;  %4459 = vmatprep.subr.bf16.mxu0 %v5166_v42 }
 0x1fa   :  { %4410 = vmatprep.mubr.msk.f32.mxu0 %vm107_vm0, %v358_v3 }
 0x1fc   :  { %4460 = vmatpush3.bf16.msra.mxu0 %v4970_v9  ;;  %v4984_v9 = vld [vmem:[#allocation4 + $0x80] sm:$0xff]  }
 0x1fd   :  { %4411 = vmatmul.mubr.msk.f32.gmra.mxu0 %vm107_vm0, %v359_v5  ;;  %4465 = vmatprep.subr.bf16.mxu0 %v5166_v42 }
 0x1fe   :  { %4413 = vmatprep.mubr.msk.f32.mxu0 %vm107_vm0, %v360_v7 }
 0x201   :  { %4414 = vmatmul.mubr.msk.f32.gmra.mxu0 %vm107_vm0, %v361_v8 }
 0x202   :  { %4461 = vmatprep.mubr.msk.bf16.mxu0 %vm5167_vm10, %v5166_v42 }
 0x2b5   :  { %v4406_v35 = vpop.f32.mrf.mxu0  ;;  %v5392_v11 = vpop.f32.mrf.mxu1 }
 0x2b6   :  { %v526_v37 = vadd.f32 %v4406_v35, %v382_v34  ;;  %v4975_v35 = vld [vmem:[#allocation4 + $0x38] sm:$0xff]  }
 0x2b7   :  { %v520_v38 = vpop.f32.mrf.mxu0  ;;  %v5394_v12 = vpop.f32.mrf.mxu1 }
 0x2b8   :  { %v5308_v39 = vadd.f32 %v520_v38, %v377_v36  ;;  %586 = vperm.xlu1 %4926, %v526_v37   ;;  %v5345_v57 = vmul.f32 %v526_v37, %v526_v37 }
 0x2ba   :  { %590 = vperm.xlu0 %4925, %v5308_v39   ;;  %v1363_v7 = vmul.f32 %v5308_v39, %v5308_v39 }
 0x2bc   :  { %581 = vperm.xlu1 %4926, %v5308_v39  }
 0x2be   :  { %386 = vperm.xlu0 %4925, %v5244_v15   ;;  %v569_v15 = vlaneseq }
 0x2c0   :  { %4927 = vset.pattern.permute.xlu1 %v5165_v4  ;;  %v5327_v44 = vand.u32 127, %v569_v15 }
 0x2c1   :  { %594 = vperm.xlu1 %4927, %v526_v37  }
 0x2c2   :  { %vm571_vm11 = vcmp.ge.s32.totalorder %v5327_v44, 16  ;;  %vm572_vm15 = vcmp.ge.s32.totalorder %v5327_v44, 64 }
 0x2c5   :  { %391 = vperm.xlu1 %4927, %v5230_v10  }
 0x333   :  { %v587_v43 = vpop.permute.xlu1 %586 }
 0x335   :  { %v591_v46 = vpop.permute.xlu0 %590 }
 0x337   :  { %v582_v45 = vpop.permute.xlu1 %581 }
 0x338   :  { %v597_v48 = vsel %vm571_vm11, %v582_v45, %v591_v46 }
 0x339   :  { %v599_v51 = vmul.f32 %v597_v48, %v573_v47  ;;  %v4978_v48 = vld [vmem:[#allocation4 + $0x40] sm:$0xff]  }
 0x33c   :  { %v595_v10 = vpop.permute.xlu1 %594 }
 0x33d   :  { %v598_v50 = vsel %vm571_vm11, %v587_v43, %v595_v10  ;;  %v4977_v43 = vld [vmem:[#allocation4 + $0x48] sm:$0xff]  }
 0x33e   :  { %v600_v52 = vmul.f32 %v598_v50, %v574_v49  ;;  %v4979_v50 = vld [vmem:[#allocation4 + $0x58] sm:$0xff]  }
 0x340   :  { %v601_v53 = vpack.c.bf16 %v600_v52, %v599_v51 }
 0x342   :  { %4420 = vmatpush3.bf16.msra.mxu1 %v601_v53 }
 0x343   :  { %4513 = vmatprep.subr.bf16.mxu1 %v5166_v42 }
 0x345   :  { %4422 = vmatmul.mubr.msk.bf16.vlgmr.msra.gmra.mxu1 %vm665_vm12, %v4958_v54  ;;  %v4980_v54 = vld [vmem:[#allocation4 + $0x50] sm:$0xff]  }
 0x346   :  { %4514 = vmatpush3.bf16.msra.mxu1 %v4959_v55  ;;  %4425 = vmatprep.mubr.msk.bf16.mxu1 %vm5167_vm10, %v5166_v42 }
 0x347   :  { %4515 = vmatprep.subr.bf16.mxu1 %v5166_v42 }
 0x34a   :  { %4516 = vmatpush3.bf16.msra.mxu1 %v4960_v56 }
 0x34b   :  { %4529 = vmatprep.subr.mxu1 %v5345_v57 }
 0x34d   :  { %4426 = vmatmul.mubr.msk.bf16.gmra.mxu1 %vm665_vm12, %v4961_v58  ;;  %v4981_v58 = vld [vmem:[#allocation4 + $0x68] sm:$0xff]  }
 0x34e   :  { %4429 = vmatprep.mubr.msk.bf16.mxu1 %vm5167_vm10, %v5166_v42 }
 0x355   :  { %4430 = vmatmul.mubr.msk.bf16.gmra.mxu1 %vm665_vm12, %v4962_v59 }
 0x356   :  { %4433 = vmatprep.mubr.msk.bf16.mxu1 %vm5167_vm10, %v5166_v42 }
 0x35d   :  { %4434 = vmatmul.mubr.msk.bf16.gmra.mxu1 %vm665_vm12, %v4963_v60 }
 0x35e   :  { %4437 = vmatprep.mubr.msk.bf16.mxu1 %vm5167_vm10, %v5166_v42 }
 0x365   :  { %4438 = vmatmul.mubr.msk.bf16.gmra.mxu1 %vm665_vm12, %v4964_v61 }
 0x366   :  { %4441 = vmatprep.mubr.msk.bf16.mxu1 %vm5167_vm10, %v5166_v42 }
 0x36d   :  { %4442 = vmatmul.mubr.msk.bf16.gmra.mxu1 %vm665_vm12, %v4965_v62  ;;  %v4982_v62 = vld [vmem:[#allocation4 + $0x60] sm:$0xff]  }
 0x36e   :  { %4445 = vmatprep.mubr.msk.bf16.mxu1 %vm5167_vm10, %v5166_v42 }
 0x375   :  { %4446 = vmatmul.mubr.msk.bf16.gmra.mxu1 %vm665_vm12, %v4966_v63 }
 0x376   :  { %4449 = vmatprep.mubr.msk.bf16.mxu1 %vm5167_vm10, %v5166_v42 }
 0x37d   :  { %4450 = vmatmul.mubr.msk.bf16.gmra.mxu1 %vm665_vm12, %v4967_v1 }
 0x37e   :  { %4453 = vmatprep.mubr.msk.bf16.mxu1 %vm5167_vm10, %v5166_v42 }
 0x385   :  { %4454 = vmatmul.mubr.msk.bf16.gmra.mxu1 %vm665_vm12, %v4968_v2  ;;  %v4983_v2 = vld [vmem:[#allocation4 + $0x88] sm:$0xff]  }
 0x386   :  { %4517 = vmatprep.mubr.msk.bf16.mxu1 %vm5167_vm10, %v5166_v42 }
 0x405   :  { %v727_v13 = vpop.f32.mrf.mxu1 }
 0x407   :  { %v4423_v16 = vpop.f32.mrf.mxu1 }
 0x409   :  { %v730_v17 = vpop.f32.mrf.mxu1 }
 0x40a   :  { %v802_v29 = vpack.c.bf16 %v730_v17, %v727_v13  ;;  %v1361_v13 = vld [vmem:[%s5856_s2 + $0xa0] sm:$0xff] }
 0x40b   :  { %v4424_v19 = vpop.f32.mrf.mxu1 }
 0x40d   :  { %v735_v20 = vpop.f32.mrf.mxu1 }
 0x40f   :  { %v4427_v21 = vpop.f32.mrf.mxu1 }
 0x410   :  { %v5453_v21 = vld [vmem:[%s5856_s2 + $0xd0] sm:$0xff] }
 0x411   :  { %v738_v22 = vpop.f32.mrf.mxu1 }
 0x412   :  { %v807_v18 = vpack.c.bf16 %v738_v22, %v735_v20  ;;  %v5168_v20 = vmov 3   ;;  %v5457_v22 = vpop.f32.mrf.mxu0 }
 0x413   :  { %v4428_v23 = vpop.f32.mrf.mxu1  ;;  %4928 = vset.pattern.permute.xlu1 %v5168_v20 }
 0x414   :  { %4462 = vmatmul.mubr.msk.bf16.vlgmr.msra.gmra.mxu0 %vm107_vm0, %v807_v18  ;;  %1472 = vperm.xlu1 %4928, %v5453_v21  }
 0x415   :  { %v743_v24 = vpop.f32.mrf.mxu1  ;;  %4466 = vmatpush3.bf16.msra.mxu0 %v4971_v14  ;;  %4469 = vmatprep.mubr.msk.bf16.mxu0 %vm5167_vm10, %v5166_v42  ;;  %v5459_v14 = vpop.f32.mrf.mxu0 }
 0x416   :  { %4467 = vmatprep.subr.bf16.mxu0 %v5166_v42 }
 0x417   :  { %v4431_v26 = vpop.f32.mrf.mxu1  ;;  %v5461_v18 = vpop.f32.mrf.mxu0 }
 0x418   :  { %4929 = vset.pattern.permute.xlu1 %v5163_v0 }
 0x419   :  { %v746_v27 = vpop.f32.mrf.mxu1  ;;  %4468 = vmatpush3.bf16.msra.mxu0 %v4972_v25  ;;  %v5463_v23 = vpop.f32.mrf.mxu0 }
 0x41a   :  { %4473 = vmatprep.subr.bf16.mxu0 %v5166_v42  ;;  %v924_v36 = vpack.c.bf16 %v746_v27, %v743_v24 }
 0x41b   :  { %v4432_v30 = vpop.f32.mrf.mxu1  ;;  %v5465_v24 = vpop.f32.mrf.mxu0 }
 0x41c   :  { %4470 = vmatmul.mubr.msk.bf16.vlgmr.msra.gmra.mxu0 %vm107_vm0, %v802_v29 }
 0x41d   :  { %v751_v31 = vpop.f32.mrf.mxu1  ;;  %4474 = vmatpush3.bf16.msra.mxu0 %v4973_v28  ;;  %4477 = vmatprep.mubr.msk.bf16.mxu0 %vm5167_vm10, %v5166_v42  ;;  %v5467_v25 = vpop.f32.mrf.mxu0 }
 0x41e   :  { %4475 = vmatprep.subr.bf16.mxu0 %v5166_v42 }
 0x41f   :  { %v4435_v33 = vpop.f32.mrf.mxu1 }
 0x421   :  { %v754_v34 = vpop.f32.mrf.mxu1  ;;  %4476 = vmatpush3.bf16.msra.mxu0 %v4974_v32 }
 0x422   :  { %4481 = vmatprep.subr.bf16.mxu0 %v5166_v42  ;;  %v987_v45 = vpack.c.bf16 %v754_v34, %v751_v31 }
 0x423   :  { %v4436_v37 = vpop.f32.mrf.mxu1 }
 0x424   :  { %4478 = vmatmul.mubr.msk.bf16.vlgmr.msra.gmra.mxu0 %vm107_vm0, %v924_v36 }
 0x425   :  { %v759_v38 = vpop.f32.mrf.mxu1  ;;  %4482 = vmatpush3.bf16.msra.mxu0 %v4975_v35  ;;  %4485 = vmatprep.mubr.msk.bf16.mxu0 %vm5167_vm10, %v5166_v42 }
 0x426   :  { %4483 = vmatprep.subr.bf16.mxu0 %v5166_v42 }
 0x427   :  { %v4439_v41 = vpop.f32.mrf.mxu1 }
 0x429   :  { %v762_v15 = vpop.f32.mrf.mxu1  ;;  %4484 = vmatpush3.bf16.msra.mxu0 %v4976_v40 }
 0x42a   :  { %4489 = vmatprep.subr.bf16.mxu0 %v5166_v42  ;;  %v1050_v51 = vpack.c.bf16 %v762_v15, %v759_v38 }
 0x42b   :  { %v4440_v46 = vpop.f32.mrf.mxu1 }
 0x42c   :  { %4486 = vmatmul.mubr.msk.bf16.vlgmr.msra.gmra.mxu0 %vm107_vm0, %v987_v45 }
 0x42d   :  { %v767_v47 = vpop.f32.mrf.mxu1  ;;  %4490 = vmatpush3.bf16.msra.mxu0 %v4977_v43  ;;  %4493 = vmatprep.mubr.msk.bf16.mxu0 %vm5167_vm10, %v5166_v42 }
 0x42e   :  { %4491 = vmatprep.subr.bf16.mxu0 %v5166_v42 }
 0x42f   :  { %v4443_v49 = vpop.f32.mrf.mxu1 }
 0x431   :  { %v770_v10 = vpop.f32.mrf.mxu1  ;;  %4492 = vmatpush3.bf16.msra.mxu0 %v4978_v48 }
 0x432   :  { %4497 = vmatprep.subr.bf16.mxu0 %v5166_v42  ;;  %v1113_v59 = vpack.c.bf16 %v770_v10, %v767_v47 }
 0x433   :  { %v4444_v52 = vpop.f32.mrf.mxu1 }
 0x434   :  { %4494 = vmatmul.mubr.msk.bf16.vlgmr.msra.gmra.mxu0 %vm107_vm0, %v1050_v51 }
 0x435   :  { %v775_v53 = vpop.f32.mrf.mxu1  ;;  %4498 = vmatpush3.bf16.msra.mxu0 %v4979_v50  ;;  %4501 = vmatprep.mubr.msk.bf16.mxu0 %vm5167_vm10, %v5166_v42 }
 0x436   :  { %4499 = vmatprep.subr.bf16.mxu0 %v5166_v42 }
 0x437   :  { %v4447_v55 = vpop.f32.mrf.mxu1 }
 0x439   :  { %v778_v56 = vpop.f32.mrf.mxu1  ;;  %4500 = vmatpush3.bf16.msra.mxu0 %v4980_v54 }
 0x43a   :  { %4505 = vmatprep.subr.bf16.mxu0 %v5166_v42  ;;  %v1176_v3 = vpack.c.bf16 %v778_v56, %v775_v53 }
 0x43b   :  { %v4448_v60 = vpop.f32.mrf.mxu1 }
 0x43c   :  { %4502 = vmatmul.mubr.msk.bf16.vlgmr.msra.gmra.mxu0 %vm107_vm0, %v1113_v59 }
 0x43d   :  { %v783_v61 = vpop.f32.mrf.mxu1  ;;  %4506 = vmatpush3.bf16.msra.mxu0 %v4981_v58  ;;  %4509 = vmatprep.mubr.msk.bf16.mxu0 %vm5167_vm10, %v5166_v42 }
 0x43e   :  { %4507 = vmatprep.subr.bf16.mxu0 %v5166_v42 }
 0x43f   :  { %v4451_v63 = vpop.f32.mrf.mxu1 }
 0x441   :  { %v786_v1 = vpop.f32.mrf.mxu1  ;;  %4508 = vmatpush3.bf16.msra.mxu0 %v4982_v62 }
 0x442   :  { %v1239_v5 = vpack.c.bf16 %v786_v1, %v783_v61  ;;  %4521 = vmatprep.subr.bf16.mxu0 %v5166_v42 }
 0x443   :  { %v4452_v6 = vpop.f32.mrf.mxu1 }
 0x444   :  { %4510 = vmatmul.mubr.msk.bf16.vlgmr.msra.gmra.mxu0 %vm107_vm0, %v1176_v3  ;;  %4518 = vmatmul.mubr.msk.bf16.vlgmr.msra.gmra.mxu1 %vm107_vm0, %v1239_v5 }
 0x445   :  { %4530 = vmatpush3.msra.mxu1 %v5345_v57  ;;  %v791_v8 = vpop.f32.mrf.mxu1  ;;  %4522 = vmatpush3.bf16.msra.mxu0 %v4983_v2  ;;  %v1362_v57 = vld [vmem:[%s5856_s2 + $0xa8] sm:$0xff] }
 0x446   :  { %4531 = vmatprep.subr.mxu1 %v1363_v7  ;;  %4523 = vmatprep.subr.bf16.mxu0 %v5166_v42 }
 0x447   :  { %4532 = vmatpush3.msra.mxu1 %v1363_v7  ;;  %v4455_v16 = vpop.f32.mrf.mxu1  ;;  %4525 = vmatprep.mubr.msk.bf16.mxu0 %vm5167_vm10, %v5166_v42 }
 0x448   :  { %4533 = vmatprep.mubr.msk.f32.mxu1 %vm665_vm12, %v1361_v13  ;;  %4542 = vmatprep.subr.bf16.mxu1 %v5166_v42 }
 0x449   :  { %v794_v39 = vpop.f32.mrf.mxu1  ;;  %4524 = vmatpush3.bf16.msra.mxu0 %v4984_v9 }
 0x44a   :  { %v1302_v17 = vpack.c.bf16 %v794_v39, %v791_v8  ;;  %4536 = vmatprep.subr.bf16.mxu0 %v5166_v42 }
 0x44b   :  { %v4456_v19 = vpop.f32.mrf.mxu1 }
 0x44c   :  { %4526 = vmatmul.mubr.msk.bf16.vlgmr.msra.gmra.mxu0 %vm107_vm0, %v1302_v17  ;;  %4534 = vmatmul.mubr.msk.f32.vlgmr.msra.gmra.mxu1 %vm665_vm12, %v1362_v57 }
 0x44d   :  { %4544 = vmatprep.mubr.msk.bf16.mxu1 %vm5167_vm10, %v5166_v42  ;;  %4538 = vmatprep.mubr.msk.bf16.mxu0 %vm5167_vm10, %v5166_v42 }
 0x4d4   :  { %v857_v26 = vpop.f32.mrf.mxu0 }
 0x4d6   :  { %v4463_v27 = vpop.f32.mrf.mxu0 }
 0x4d8   :  { %v860_v28 = vpop.f32.mrf.mxu0 }
 0x4da   :  { %v4464_v29 = vpop.f32.mrf.mxu0 }
 0x4dc   :  { %v913_v30 = vpop.f32.mrf.mxu0 }
 0x4dd   :  { %v914_v31 = vadd.f32 %v913_v30, %v857_v26 }
 0x4de   :  { %v4471_v32 = vpop.f32.mrf.mxu0 }
 0x4e0   :  { %v916_v33 = vpop.f32.mrf.mxu0 }
 0x4e1   :  { %v917_v34 = vadd.f32 %v916_v33, %v860_v28 }
 0x4e2   :  { %v4472_v35 = vpop.f32.mrf.mxu0 }
 0x4e4   :  { %v974_v36 = vpop.f32.mrf.mxu0 }
 0x4e5   :  { %v981_v37 = vadd.f32 %v974_v36, %v914_v31  ;;  %v392_v36 = vpop.permute.xlu1 %391 }
 0x4e6   :  { %v4479_v38 = vpop.f32.mrf.mxu0 }
 0x4e7   :  { %v536_v38 = vadd.f32 %v5457_v22, %v392_v36  ;;  %v371_v22 = vld [vmem:[%s5856_s2 + $0x108] sm:$0xff] }
 0x4e8   :  { %v977_v40 = vpop.f32.mrf.mxu0 }
 0x4e9   :  { %v982_v41 = vadd.f32 %v977_v40, %v917_v34  ;;  %v387_v34 = vpop.permute.xlu0 %386 }
 0x4ea   :  { %v4480_v15 = vpop.f32.mrf.mxu0  ;;  %v531_v35 = vadd.f32 %v5459_v14, %v387_v34  ;;  %v1473_v14 = vpop.permute.xlu1 %1472 }
 0x4ec   :  { %v1037_v43 = vpop.f32.mrf.mxu0 }
 0x4ed   :  { %v1044_v45 = vadd.f32 %v1037_v43, %v981_v37  ;;  %v5476_v37 = vld [vmem:[%s5856_s2 + $0xd8] sm:$0xff] }
 0x4ee   :  { %v4487_v46 = vpop.f32.mrf.mxu0 }
 0x4f0   :  { %v1040_v47 = vpop.f32.mrf.mxu0 }
 0x4f1   :  { %v1045_v48 = vadd.f32 %v1040_v47, %v982_v41 }
 0x4f2   :  { %v4488_v49 = vpop.f32.mrf.mxu0 }
 0x4f4   :  { %v1100_v10 = vpop.f32.mrf.mxu0 }
 0x4f5   :  { %v1107_v50 = vadd.f32 %v1100_v10, %v1044_v45 }
 0x4f6   :  { %v4495_v51 = vpop.f32.mrf.mxu0 }
 0x4f8   :  { %v1103_v52 = vpop.f32.mrf.mxu0 }
 0x4f9   :  { %v1108_v53 = vadd.f32 %v1103_v52, %v1045_v48 }
 0x4fa   :  { %v4496_v54 = vpop.f32.mrf.mxu0 }
 0x4fc   :  { %v1163_v55 = vpop.f32.mrf.mxu0 }
 0x4fd   :  { %v1170_v56 = vadd.f32 %v1163_v55, %v1107_v50 }
 0x4fe   :  { %v4503_v58 = vpop.f32.mrf.mxu0 }
 0x500   :  { %v1166_v59 = vpop.f32.mrf.mxu0 }
 0x501   :  { %v1171_v60 = vadd.f32 %v1166_v59, %v1108_v53 }
 0x502   :  { %v4504_v61 = vpop.f32.mrf.mxu0 }
 0x504   :  { %v1226_v62 = vpop.f32.mrf.mxu0  ;;  %v1289_v63 = vpop.f32.mrf.mxu1 }
 0x505   :  { %v1233_v1 = vadd.f32 %v1226_v62, %v1170_v56 }
 0x506   :  { %v4511_v2 = vpop.f32.mrf.mxu0  ;;  %v4519_v3 = vpop.f32.mrf.mxu1 }
 0x507   :  { %v1296_v5 = vadd.f32 %v1289_v63, %v1233_v1 }
 0x508   :  { %v1229_v6 = vpop.f32.mrf.mxu0  ;;  %v1292_v7 = vpop.f32.mrf.mxu1 }
 0x509   :  { %v1234_v8 = vadd.f32 %v1229_v6, %v1171_v60 }
 0x50a   :  { %v4512_v9 = vpop.f32.mrf.mxu0  ;;  %v4520_v13 = vpop.f32.mrf.mxu1 }
 0x50b   :  { %v1297_v16 = vadd.f32 %v1292_v7, %v1234_v8  ;;  %v2356_v7 = vmul.f32 %v536_v38, %v536_v38  ;;  %v4985_v8 = vld [vmem:[#allocation2 + $0x48] sm:$0xff]  }
 0x50c   :  { %v1352_v39 = vpop.f32.mrf.mxu0  ;;  %v4535_v57 = vpop.f32.mrf.mxu1 }
 0x50d   :  { %v1359_v17 = vadd.f32 %v1352_v39, %v1296_v5  ;;  %v1443_v19 = vadd.f32 1e-08, %v4535_v57  ;;  %v369_v39 = vld [vmem:[%s5856_s2 + $0xf8] sm:$0xff] }
 0x50e   :  { %v4527_v26 = vpop.f32.mrf.mxu0  ;;  %v1437_v27 = vpop.f32.mrf.mxu1  ;;  %v4987_v57 = vld [vmem:[#allocation2 + $0x58] sm:$0xff]  }
 0x50f   :  { %5099 = vrsqrt.f32 %v1443_v19  ;;  %v1438_v28 = vadd.f32 1e-08, %v1437_v27  ;;  %v4989_v19 = vld [vmem:[#allocation2 + $0x68] sm:$0xff]   ;;  %v4990_v26 = vld [vmem:[#allocation2 + $0x70] sm:$0xff]   ;;  %v4991_v27 = vld [vmem:[#allocation2 + $0x78] sm:$0xff]  }
 0x510   :  { %v1355_v29 = vpop.f32.mrf.mxu0 }
 0x511   :  { %v1360_v30 = vadd.f32 %v1355_v29, %v1297_v16  ;;  %5101 = vrsqrt.f32 %v1438_v28  ;;  %v2355_v16 = vmul.f32 %v531_v35, %v531_v35  ;;  %v4992_v28 = vld [vmem:[#allocation2 + $0x80] sm:$0xff]   ;;  %v4993_v29 = vld [vmem:[#allocation2 + $0x88] sm:$0xff]  }
 0x512   :  { %v4528_v31 = vpop.f32.mrf.mxu0 }
 0x513   :  { %v2354_v31 = vld [vmem:[%s5856_s2 + $0xb8] sm:$0xff] }
 0x51c   :  { %v5100_v32 = vpop.eup %5099 }
 0x51d   :  { %1463 = vperm.xlu0 %4925, %v5100_v32   ;;  %1455 = vperm.xlu1 %4929, %v5100_v32  }
 0x51e   :  { %v5102_v33 = vpop.eup %5101 }
 0x521   :  { %4930 = vset.pattern.permute.xlu0 %v5163_v0  ;;  %4931 = vset.pattern.permute.xlu1 %v5165_v4 }
 0x522   :  { %1459 = vperm.xlu1 %4931, %v5102_v33   ;;  %1450 = vperm.xlu0 %4930, %v5102_v33  }
 0x526   :  { %4932 = vset.pattern.permute.xlu1 %v5168_v20  ;;  %1574 = vperm.xlu0 %4930, %v531_v35   ;;  %v370_v20 = vld [vmem:[%s5856_s2 + $0x100] sm:$0xff] }
 0x527   :  { %1477 = vperm.xlu1 %4932, %v5476_v37  }
 0x52a   :  { %4935 = vset.pattern.permute.xlu0 %v5165_v4 }
 0x52b   :  { %4933 = vset.pattern.permute.xlu1 %v5163_v0  ;;  %1587 = vperm.xlu0 %4935, %v536_v38  }
 0x52c   :  { %1579 = vperm.xlu1 %4933, %v536_v38  }
 0x52f   :  { %4936 = vset.pattern.permute.xlu0 %v5163_v0 }
 0x530   :  { %4934 = vset.pattern.permute.xlu1 %v5165_v4 }
 0x531   :  { %1583 = vperm.xlu1 %4934, %v531_v35  }
 0x535   :  { %406 = vperm.xlu1 %4934, %v370_v20  }
 0x539   :  { %411 = vperm.xlu1 %4934, %v371_v22  }
 0x53d   :  { %4937 = vset.pattern.permute.xlu1 %v5163_v0 }
 0x598   :  { %v1464_v40 = vpop.permute.xlu0 %1463  ;;  %v1456_v41 = vpop.permute.xlu1 %1455 }
 0x599   :  { %v1467_v45 = vsel %vm571_vm11, %v1456_v41, %v1464_v40  ;;  %v4994_v40 = vld [vmem:[#allocation2 + $0xd8] sm:$0xff]   ;;  %v4995_v41 = vld [vmem:[#allocation4 + $0xa8] sm:$0xff]  }
 0x59a   :  { %v1469_v49 = vmul.f32 %v1467_v45, %v1360_v30  ;;  %v2353_v30 = vld [vmem:[%s5856_s2 + $0xb0] sm:$0xff] }
 0x59d   :  { %v1460_v15 = vpop.permute.xlu1 %1459  ;;  %v1451_v43 = vpop.permute.xlu0 %1450 }
 0x59e   :  { %v1466_v46 = vsel %vm571_vm11, %v1451_v43, %v1460_v15  ;;  %v4996_v15 = vld [vmem:[#allocation4 + $0xa0] sm:$0xff]   ;;  %v5169_v43 = vmov 4  }
 0x59f   :  { %v1468_v47 = vmul.f32 %v1466_v46, %v1359_v17  ;;  %v4988_v17 = vld [vmem:[#allocation2 + $0x60] sm:$0xff]  }
 0x5a1   :  { %v1480_v48 = vadd.f32 %v1473_v14, %v1468_v47  ;;  %v1575_v10 = vpop.permute.xlu0 %1574 }
 0x5a2   :  { %v1478_v50 = vpop.permute.xlu1 %1477 }
 0x5a3   :  { %v1481_v51 = vadd.f32 %v1478_v50, %v1469_v49  ;;  %v1484_v52 = vmul.f32 0.2, %v1480_v48  ;;  %vm1482_vm14 = vcmp.ge.f32.partialorder %v1480_v48, 0.0 }
 0x5a5   :  { %vm1483_vm13 = vcmp.ge.f32.partialorder %v1481_v51, 0.0  ;;  %v1485_v53 = vmul.f32 0.2, %v1481_v51  ;;  %v1486_v58 = vsel %vm1482_vm14, %v1480_v48, %v1484_v52 }
 0x5a6   :  { %v1588_v56 = vpop.permute.xlu0 %1587  ;;  %v5499_v62 = vmul.f32 1.4142135, %v1486_v58  ;;  %v4999_v58 = vld [vmem:[#allocation4 + $0xb8] sm:$0xff]  }
 0x5a7   :  { %v1487_v54 = vsel %vm1483_vm13, %v1481_v51, %v1485_v53  ;;  %v1580_v55 = vpop.permute.xlu1 %1579  ;;  %v4997_v51 = vld [vmem:[#allocation4 + $0x98] sm:$0xff]  }
 0x5a8   :  { %v5495_v59 = vmul.f32 1.4142135, %v1487_v54  ;;  %v1591_v60 = vsel %vm571_vm11, %v1580_v55, %v1588_v56  ;;  %v4998_v55 = vld [vmem:[#allocation4 + $0x90] sm:$0xff]  }
 0x5aa   :  { %v1593_v1 = vmul.f32 %v1591_v60, %v5495_v59 }
 0x5ac   :  { %v1584_v61 = vpop.permute.xlu1 %1583 }
 0x5ad   :  { %v1590_v63 = vsel %vm571_vm11, %v1575_v10, %v1584_v61 }
 0x5ae   :  { %v1592_v2 = vmul.f32 %v1590_v63, %v5499_v62 }
 0x5b0   :  { %v1594_v3 = vpack.c.bf16 %v1593_v1, %v1592_v2  ;;  %v407_v5 = vpop.permute.xlu1 %406  ;;  %v5001_v2 = vld [vmem:[#allocation4 + $0xc8] sm:$0xff]  }
 0x5b1   :  { %v551_v6 = vadd.f32 %v5467_v25, %v407_v5  ;;  %v4986_v25 = vld [vmem:[#allocation2 + $0x50] sm:$0xff]  }
 0x5b2   :  { %4543 = vmatpush3.bf16.msra.mxu1 %v1594_v3 }
 0x5b3   :  { %1492 = vperm.xlu0 %4936, %v551_v6   ;;  %4652 = vmatprep.subr.mxu1 %v2356_v7 }
 0x5b4   :  { %v412_v9 = vpop.permute.xlu1 %411 }
 0x5b5   :  { %v556_v13 = vadd.f32 %v5465_v24, %v412_v9  ;;  %4545 = vmatmul.mubr.msk.bf16.vlgmr.msra.gmra.mxu1 %vm665_vm12, %v4985_v8  ;;  %v368_v24 = vld [vmem:[%s5856_s2 + $0xf0] sm:$0xff] }
 0x5b6   :  { %4653 = vmatpush3.msra.mxu1 %v2356_v7  ;;  %4548 = vmatprep.mubr.msk.bf16.mxu1 %vm5167_vm10, %v5166_v42  ;;  %v5002_v7 = vld [vmem:[#allocation4 + $0xc0] sm:$0xff]  }
 0x5b7   :  { %1497 = vperm.xlu1 %4937, %v556_v13   ;;  %4939 = vset.pattern.permute.xlu0 %v5165_v4 }
 0x5b8   :  { %4654 = vmatprep.subr.mxu1 %v2355_v16  ;;  %1505 = vperm.xlu0 %4939, %v556_v13   ;;  %v5003_v13 = vld [vmem:[#allocation4 + $0xd8] sm:$0xff]  }
 0x5b9   :  { %4655 = vmatpush3.msra.mxu1 %v2355_v16 }
 0x5ba   :  { %4659 = vmatprep.subr.bf16.mxu1 %v5166_v42 }
 0x5bb   :  { %4938 = vset.pattern.permute.xlu1 %v5165_v4 }
 0x5bc   :  { %1501 = vperm.xlu1 %4938, %v551_v6  }
 0x5bd   :  { %4549 = vmatmul.mubr.msk.bf16.gmra.mxu1 %vm665_vm12, %v4986_v25 }
 0x5be   :  { %4552 = vmatprep.mubr.msk.bf16.mxu1 %vm5167_vm10, %v5166_v42 }
 0x5c0   :  { %396 = vperm.xlu1 %4938, %v368_v24  }
 0x5c4   :  { %401 = vperm.xlu1 %4938, %v369_v39   ;;  %v5004_v39 = vld [vmem:[#allocation4 + $0xd0] sm:$0xff]  }
 0x5c5   :  { %4553 = vmatmul.mubr.msk.bf16.gmra.mxu1 %vm665_vm12, %v4987_v57 }
 0x5c6   :  { %4556 = vmatprep.mubr.msk.bf16.mxu1 %vm5167_vm10, %v5166_v42 }
 0x5c8   :  { %4940 = vset.pattern.permute.xlu1 %v5169_v43 }
 0x5c9   :  { %2465 = vperm.xlu1 %4940, %v5453_v21  }
 0x5cd   :  { %4557 = vmatmul.mubr.msk.bf16.gmra.mxu1 %vm665_vm12, %v4988_v17  ;;  %4941 = vset.pattern.permute.xlu1 %v5163_v0 }
 0x5ce   :  { %4560 = vmatprep.mubr.msk.bf16.mxu1 %vm5167_vm10, %v5166_v42 }
 0x5d5   :  { %4561 = vmatmul.mubr.msk.bf16.gmra.mxu1 %vm665_vm12, %v4989_v19  ;;  %v5005_v19 = vld [vmem:[#allocation4 + $0xe8] sm:$0xff]  }
 0x5d6   :  { %4564 = vmatprep.mubr.msk.bf16.mxu1 %vm5167_vm10, %v5166_v42 }
 0x5dd   :  { %4565 = vmatmul.mubr.msk.bf16.gmra.mxu1 %vm665_vm12, %v4990_v26 }
 0x5de   :  { %4568 = vmatprep.mubr.msk.bf16.mxu1 %vm5167_vm10, %v5166_v42 }
 0x5e5   :  { %4569 = vmatmul.mubr.msk.bf16.gmra.mxu1 %vm665_vm12, %v4991_v27 }
 0x5e6   :  { %4572 = vmatprep.mubr.msk.bf16.mxu1 %vm5167_vm10, %v5166_v42 }
 0x5ed   :  { %4573 = vmatmul.mubr.msk.bf16.gmra.mxu1 %vm665_vm12, %v4992_v28 }
 0x5ee   :  { %4576 = vmatprep.mubr.msk.bf16.mxu1 %vm5167_vm10, %v5166_v42 }
 0x5f5   :  { %4577 = vmatmul.mubr.msk.bf16.gmra.mxu1 %vm665_vm12, %v4993_v29  ;;  %v5006_v29 = vld [vmem:[#allocation4 + $0xe0] sm:$0xff]  }
 0x5f6   :  { %4656 = vmatprep.mubr.msk.f32.mxu1 %vm665_vm12, %v2353_v30 }
 0x5fd   :  { %4657 = vmatmul.mubr.msk.f32.vlgmr.msra.gmra.mxu1 %vm665_vm12, %v2354_v31 }
 0x5fe   :  { %4661 = vmatprep.mubr.msk.bf16.mxu1 %vm5167_vm10, %v5166_v42 }
 0x62e   :  { %v1493_v32 = vpop.permute.xlu0 %1492 }
 0x632   :  { %v1498_v33 = vpop.permute.xlu1 %1497 }
 0x633   :  { %v1506_v34 = vpop.permute.xlu0 %1505 }
 0x634   :  { %v1509_v35 = vsel %vm571_vm11, %v1498_v33, %v1506_v34 }
 0x635   :  { %v1511_v20 = vmul.f32 %v1509_v35, %v5495_v59 }
 0x637   :  { %v1502_v36 = vpop.permute.xlu1 %1501 }
 0x638   :  { %v1508_v38 = vsel %vm571_vm11, %v1493_v32, %v1502_v36  ;;  %v5007_v32 = vld [vmem:[#allocation4 + $0xf8] sm:$0xff]   ;;  %v5008_v36 = vld [vmem:[#allocation4 + $0xf0] sm:$0xff]  }
 0x639   :  { %v1510_v22 = vmul.f32 %v1508_v38, %v5499_v62  ;;  %v5000_v62 = vld [vmem:[#allocation4 + $0xb0] sm:$0xff]  }
 0x63b   :  { %v1512_v14 = vpack.c.bf16 %v1511_v20, %v1510_v22  ;;  %v5009_v22 = vld [vmem:[#allocation4 + $0x108] sm:$0xff]  }
 0x63d   :  { %4537 = vmatpush3.bf16.msra.mxu0 %v1512_v14 }
 0x63e   :  { %4580 = vmatprep.subr.bf16.mxu0 %v5166_v42 }
 0x640   :  { %4539 = vmatmul.mubr.msk.bf16.vlgmr.msra.gmra.mxu0 %vm665_vm12, %v4994_v40 }
 0x641   :  { %4581 = vmatpush3.bf16.msra.mxu0 %v4995_v41  ;;  %4584 = vmatprep.mubr.msk.bf16.mxu0 %vm5167_vm10, %v5166_v42 }
 0x642   :  { %4582 = vmatprep.subr.bf16.mxu0 %v5166_v42 }
 0x645   :  { %4583 = vmatpush3.bf16.msra.mxu0 %v4996_v15  ;;  %v5010_v15 = vld [vmem:[#allocation4 + $0x100] sm:$0xff]  }
 0x646   :  { %4588 = vmatprep.subr.bf16.mxu0 %v5166_v42 }
 0x675   :  { %v1719_v45 = vpop.f32.mrf.mxu1 }
 0x677   :  { %v4546_v46 = vpop.f32.mrf.mxu1 }
 0x679   :  { %v1722_v47 = vpop.f32.mrf.mxu1 }
 0x67a   :  { %v1794_v59 = vpack.c.bf16 %v1722_v47, %v1719_v45  ;;  %v5011_v47 = vld [vmem:[#allocation4 + $0x118] sm:$0xff]  }
 0x67b   :  { %v4547_v48 = vpop.f32.mrf.mxu1 }
 0x67d   :  { %v1727_v49 = vpop.f32.mrf.mxu1 }
 0x67f   :  { %v4550_v10 = vpop.f32.mrf.mxu1 }
 0x681   :  { %v1730_v50 = vpop.f32.mrf.mxu1 }
 0x682   :  { %v1799_v52 = vpack.c.bf16 %v1730_v50, %v1727_v49  ;;  %v5012_v50 = vld [vmem:[#allocation4 + $0x110] sm:$0xff]  }
 0x683   :  { %v4551_v53 = vpop.f32.mrf.mxu1 }
 0x684   :  { %4585 = vmatmul.mubr.msk.bf16.vlgmr.msra.gmra.mxu0 %vm107_vm0, %v1799_v52 }
 0x685   :  { %v1735_v54 = vpop.f32.mrf.mxu1  ;;  %4589 = vmatpush3.bf16.msra.mxu0 %v4997_v51  ;;  %4592 = vmatprep.mubr.msk.bf16.mxu0 %vm5167_vm10, %v5166_v42 }
 0x686   :  { %4590 = vmatprep.subr.bf16.mxu0 %v5166_v42 }
 0x687   :  { %v4554_v21 = vpop.f32.mrf.mxu1 }
 0x689   :  { %v1738_v56 = vpop.f32.mrf.mxu1  ;;  %4591 = vmatpush3.bf16.msra.mxu0 %v4998_v55 }
 0x68a   :  { %4596 = vmatprep.subr.bf16.mxu0 %v5166_v42  ;;  %v1916_v3 = vpack.c.bf16 %v1738_v56, %v1735_v54  ;;  %v397_v56 = vpop.permute.xlu1 %396 }
 0x68b   :  { %v4555_v60 = vpop.f32.mrf.mxu1 }
 0x68c   :  { %4593 = vmatmul.mubr.msk.bf16.vlgmr.msra.gmra.mxu0 %vm107_vm0, %v1794_v59 }
 0x68d   :  { %v1743_v61 = vpop.f32.mrf.mxu1  ;;  %4597 = vmatpush3.bf16.msra.mxu0 %v4999_v58  ;;  %4600 = vmatprep.mubr.msk.bf16.mxu0 %vm5167_vm10, %v5166_v42  ;;  %v5612_v58 = vadd.f32 %v5463_v23, %v397_v56  ;;  %v372_v23 = vld [vmem:[%s5856_s2 + $0x110] sm:$0xff] }
 0x68e   :  { %4598 = vmatprep.subr.bf16.mxu0 %v5166_v42  ;;  %v402_v59 = vpop.permute.xlu1 %401 }
 0x68f   :  { %v4558_v63 = vpop.f32.mrf.mxu1  ;;  %v5618_v60 = vadd.f32 %v5461_v18, %v402_v59  ;;  %v373_v18 = vld [vmem:[%s5856_s2 + $0x118] sm:$0xff] }
 0x691   :  { %v1746_v1 = vpop.f32.mrf.mxu1  ;;  %4599 = vmatpush3.bf16.msra.mxu0 %v5000_v62 }
 0x692   :  { %4604 = vmatprep.subr.bf16.mxu0 %v5166_v42  ;;  %v1979_v16 = vpack.c.bf16 %v1746_v1, %v1743_v61 }
 0x693   :  { %v4559_v5 = vpop.f32.mrf.mxu1 }
 0x694   :  { %4601 = vmatmul.mubr.msk.bf16.vlgmr.msra.gmra.mxu0 %vm107_vm0, %v1916_v3 }
 0x695   :  { %v1751_v6 = vpop.f32.mrf.mxu1  ;;  %4605 = vmatpush3.bf16.msra.mxu0 %v5001_v2  ;;  %4608 = vmatprep.mubr.msk.bf16.mxu0 %vm5167_vm10, %v5166_v42 }
 0x696   :  { %4606 = vmatprep.subr.bf16.mxu0 %v5166_v42 }
 0x697   :  { %v4562_v8 = vpop.f32.mrf.mxu1 }
 0x699   :  { %v1754_v9 = vpop.f32.mrf.mxu1  ;;  %4607 = vmatpush3.bf16.msra.mxu0 %v5002_v7 }
 0x69a   :  { %4612 = vmatprep.subr.bf16.mxu0 %v5166_v42  ;;  %v2042_v26 = vpack.c.bf16 %v1754_v9, %v1751_v6 }
 0x69b   :  { %v4563_v25 = vpop.f32.mrf.mxu1 }
 0x69c   :  { %4609 = vmatmul.mubr.msk.bf16.vlgmr.msra.gmra.mxu0 %vm107_vm0, %v1979_v16 }
 0x69d   :  { %v1759_v24 = vpop.f32.mrf.mxu1  ;;  %4613 = vmatpush3.bf16.msra.mxu0 %v5003_v13  ;;  %4616 = vmatprep.mubr.msk.bf16.mxu0 %vm5167_vm10, %v5166_v42 }
 0x69e   :  { %4614 = vmatprep.subr.bf16.mxu0 %v5166_v42 }
 0x69f   :  { %v4566_v57 = vpop.f32.mrf.mxu1 }
 0x6a0   :  { %v5023_v57 = vld [vmem:[#allocation4 + $0x190] sm:$0xff]  }
 0x6a1   :  { %v1762_v17 = vpop.f32.mrf.mxu1  ;;  %4615 = vmatpush3.bf16.msra.mxu0 %v5004_v39 }
 0x6a2   :  { %4620 = vmatprep.subr.bf16.mxu0 %v5166_v42  ;;  %v2105_v33 = vpack.c.bf16 %v1762_v17, %v1759_v24  ;;  %v5022_v24 = vld [vmem:[#allocation4 + $0x198] sm:$0xff]  }
 0x6a3   :  { %v4567_v27 = vpop.f32.mrf.mxu1 }
 0x6a4   :  { %4617 = vmatmul.mubr.msk.bf16.vlgmr.msra.gmra.mxu0 %vm107_vm0, %v2042_v26  ;;  %v5024_v26 = vld [vmem:[#allocation4 + $0x188] sm:$0xff]  }
 0x6a5   :  { %v1767_v28 = vpop.f32.mrf.mxu1  ;;  %4621 = vmatpush3.bf16.msra.mxu0 %v5005_v19  ;;  %4624 = vmatprep.mubr.msk.bf16.mxu0 %vm5167_vm10, %v5166_v42 }
 0x6a6   :  { %4622 = vmatprep.subr.bf16.mxu0 %v5166_v42 }
 0x6a7   :  { %v4570_v30 = vpop.f32.mrf.mxu1 }
 0x6a9   :  { %v1770_v31 = vpop.f32.mrf.mxu1  ;;  %4623 = vmatpush3.bf16.msra.mxu0 %v5006_v29  ;;  %v5025_v29 = vld [vmem:[#allocation4 + $0x180] sm:$0xff]  }
 0x6aa   :  { %4628 = vmatprep.subr.bf16.mxu0 %v5166_v42  ;;  %v2168_v14 = vpack.c.bf16 %v1770_v31, %v1767_v28 }
 0x6ab   :  { %v4571_v34 = vpop.f32.mrf.mxu1 }
 0x6ac   :  { %4625 = vmatmul.mubr.msk.bf16.vlgmr.msra.gmra.mxu0 %vm107_vm0, %v2105_v33 }
 0x6ad   :  { %v1775_v35 = vpop.f32.mrf.mxu1  ;;  %4629 = vmatpush3.bf16.msra.mxu0 %v5007_v32  ;;  %4632 = vmatprep.mubr.msk.bf16.mxu0 %vm5167_vm10, %v5166_v42  ;;  %v5026_v32 = vld [vmem:[#allocation4 + $0x178] sm:$0xff]  }
 0x6ae   :  { %4630 = vmatprep.subr.bf16.mxu0 %v5166_v42 }
 0x6af   :  { %v4574_v38 = vpop.f32.mrf.mxu1 }
 0x6b1   :  { %v1778_v20 = vpop.f32.mrf.mxu1  ;;  %4631 = vmatpush3.bf16.msra.mxu0 %v5008_v36 }
 0x6b2   :  { %4636 = vmatprep.subr.bf16.mxu0 %v5166_v42  ;;  %v2231_v48 = vpack.c.bf16 %v1778_v20, %v1775_v35  ;;  %v2466_v20 = vpop.permute.xlu1 %2465 }
 0x6b3   :  { %v4575_v40 = vpop.f32.mrf.mxu1 }
 0x6b4   :  { %4633 = vmatmul.mubr.msk.bf16.vlgmr.msra.gmra.mxu0 %vm107_vm0, %v2168_v14 }
 0x6b5   :  { %v1783_v41 = vpop.f32.mrf.mxu1  ;;  %4637 = vmatpush3.bf16.msra.mxu0 %v5009_v22  ;;  %4640 = vmatprep.mubr.msk.bf16.mxu0 %vm5167_vm10, %v5166_v42 }
 0x6b6   :  { %4638 = vmatprep.subr.bf16.mxu0 %v5166_v42 }
 0x6b7   :  { %v4578_v45 = vpop.f32.mrf.mxu1 }
 0x6b9   :  { %v1786_v46 = vpop.f32.mrf.mxu1  ;;  %4639 = vmatpush3.bf16.msra.mxu0 %v5010_v15 }
 0x6ba   :  { %4644 = vmatprep.subr.bf16.mxu0 %v5166_v42  ;;  %v2294_v54 = vpack.c.bf16 %v1786_v46, %v1783_v41 }
 0x6bb   :  { %v4579_v49 = vpop.f32.mrf.mxu1 }
 0x6bc   :  { %4641 = vmatmul.mubr.msk.bf16.vlgmr.msra.gmra.mxu0 %vm107_vm0, %v2231_v48 }
 0x6bd   :  { %4645 = vmatpush3.bf16.msra.mxu0 %v5011_v47  ;;  %v4658_v10 = vpop.f32.mrf.mxu1  ;;  %4648 = vmatprep.mubr.msk.bf16.mxu0 %vm5167_vm10, %v5166_v42 }
 0x6be   :  { %v2435_v51 = vadd.f32 1e-08, %v4658_v10  ;;  %4646 = vmatprep.subr.bf16.mxu0 %v5166_v42 }
 0x6bf   :  { %v2429_v52 = vpop.f32.mrf.mxu1 }
 0x6c0   :  { %5103 = vrsqrt.f32 %v2435_v51  ;;  %v2430_v53 = vadd.f32 1e-08, %v2429_v52 }
 0x6c1   :  { %4647 = vmatpush3.bf16.msra.mxu0 %v5012_v50 }
 0x6c2   :  { %4697 = vmatprep.subr.bf16.mxu0 %v5166_v42  ;;  %5105 = vrsqrt.f32 %v2430_v53 }
 0x6c4   :  { %4649 = vmatmul.mubr.msk.bf16.vlgmr.msra.gmra.mxu0 %vm107_vm0, %v2294_v54 }
 0x6c5   :  { %4713 = vmatprep.mubr.msk.bf16.mxu0 %vm5167_vm10, %v5166_v42  ;;  %4698 = vmatpush3.bf16.msra.mxu0 %v5022_v24 }
 0x6c6   :  { %4699 = vmatprep.subr.bf16.mxu0 %v5166_v42 }
 0x6c9   :  { %4700 = vmatpush3.bf16.msra.mxu0 %v5023_v57 }
 0x6ca   :  { %4701 = vmatprep.subr.bf16.mxu0 %v5166_v42 }
 0x6cd   :  { %v5104_v55 = vpop.eup %5103  ;;  %4702 = vmatpush3.bf16.msra.mxu0 %v5024_v26 }
 0x6ce   :  { %2457 = vperm.xlu0 %4939, %v5104_v55   ;;  %2449 = vperm.xlu1 %4941, %v5104_v55  }
 0x6cf   :  { %v5106_v21 = vpop.eup %5105  ;;  %4703 = vmatprep.subr.bf16.mxu0 %v5166_v42 }
 0x6d1   :  { %4704 = vmatpush3.bf16.msra.mxu0 %v5025_v29 }
 0x6d2   :  { %4942 = vset.pattern.permute.xlu0 %v5163_v0  ;;  %4943 = vset.pattern.permute.xlu1 %v5165_v4 }
 0x6d3   :  { %2453 = vperm.xlu1 %4943, %v5106_v21   ;;  %2444 = vperm.xlu0 %4942, %v5106_v21  }
 0x6d4   :  { %4705 = vmatprep.subr.bf16.mxu0 %v5166_v42 }
 0x6d5   :  { %4706 = vmatpush3.bf16.msra.mxu0 %v5026_v32 }
 0x6d6   :  { %4707 = vmatprep.subr.bf16.mxu0 %v5166_v42 }
 0x6d7   :  { %4944 = vset.pattern.permute.xlu1 %v5169_v43  ;;  %2484 = vperm.xlu0 %4942, %v5612_v58  }
 0x6d8   :  { %2469 = vperm.xlu1 %4944, %v5476_v37  }
 0x6db   :  { %4947 = vset.pattern.permute.xlu0 %v5165_v4 }
 0x6dc   :  { %4945 = vset.pattern.permute.xlu1 %v5163_v0  ;;  %2497 = vperm.xlu0 %4947, %v5618_v60  }
 0x6dd   :  { %2489 = vperm.xlu1 %4945, %v5618_v60  }
 0x6e1   :  { %4946 = vset.pattern.permute.xlu1 %v5165_v4 }
 0x6e2   :  { %2493 = vperm.xlu1 %4946, %v5612_v58  }
 0x6e6   :  { %416 = vperm.xlu1 %4946, %v372_v23  }
 0x6ea   :  { %421 = vperm.xlu1 %4946, %v373_v18  }
 0x700   :  { %v5632_v37 = vpop.f32.mrf.mxu0 }
 0x702   :  { %v4540_v43 = vpop.f32.mrf.mxu0 }
 0x704   :  { %v5634_v61 = vpop.f32.mrf.mxu0 }
 0x706   :  { %v4541_v62 = vpop.f32.mrf.mxu0 }
 0x744   :  { %v1849_v63 = vpop.f32.mrf.mxu0 }
 0x746   :  { %v4586_v1 = vpop.f32.mrf.mxu0 }
 0x748   :  { %v1852_v2 = vpop.f32.mrf.mxu0 }
 0x749   :  { %v2450_v45 = vpop.permute.xlu1 %2449  ;;  %v2458_v10 = vpop.permute.xlu0 %2457 }
 0x74a   :  { %v4587_v3 = vpop.f32.mrf.mxu0  ;;  %v2461_v24 = vsel %vm572_vm15, %v2450_v45, %v2458_v10  ;;  %v5018_v45 = vld [vmem:[#allocation2 + $0xb8] sm:$0xff]   ;;  %v5028_v10 = vld [vmem:[#allocation4 + $0x168] sm:$0xff]  }
 0x74c   :  { %v1905_v5 = vpop.f32.mrf.mxu0 }
 0x74d   :  { %v1906_v40 = vadd.f32 %v1905_v5, %v1849_v63 }
 0x74e   :  { %v4594_v6 = vpop.f32.mrf.mxu0  ;;  %v2454_v52 = vpop.permute.xlu1 %2453 }
 0x74f   :  { %v2445_v18 = vpop.permute.xlu0 %2444 }
 0x750   :  { %v1908_v7 = vpop.f32.mrf.mxu0  ;;  %v2460_v5 = vsel %vm572_vm15, %v2445_v18, %v2454_v52  ;;  %v5033_v52 = vld [vmem:[#allocation4 + $0x1d0] sm:$0xff]  }
 0x751   :  { %v1909_v47 = vadd.f32 %v1908_v7, %v1852_v2 }
 0x752   :  { %v4595_v8 = vpop.f32.mrf.mxu0 }
 0x753   :  { %v2470_v63 = vpop.permute.xlu1 %2469 }
 0x754   :  { %v1966_v9 = vpop.f32.mrf.mxu0 }
 0x755   :  { %v1973_v15 = vadd.f32 %v1966_v9, %v1906_v40  ;;  %v5015_v40 = vld [vmem:[#allocation2 + $0xa0] sm:$0xff]  }
 0x756   :  { %v4602_v13 = vpop.f32.mrf.mxu0 }
 0x757   :  { %v2485_v13 = vpop.permute.xlu0 %2484 }
 0x758   :  { %v1969_v16 = vpop.f32.mrf.mxu0 }
 0x759   :  { %v1974_v50 = vadd.f32 %v1969_v16, %v1909_v47  ;;  %v5020_v47 = vld [vmem:[#allocation2 + $0xc8] sm:$0xff]  }
 0x75a   :  { %v4603_v25 = vpop.f32.mrf.mxu0 }
 0x75b   :  { %v2498_v29 = vpop.permute.xlu0 %2497 }
 0x75c   :  { %v2029_v39 = vpop.f32.mrf.mxu0 }
 0x75d   :  { %v2036_v48 = vadd.f32 %v2029_v39, %v1973_v15  ;;  %v2490_v39 = vpop.permute.xlu1 %2489  ;;  %v5017_v15 = vld [vmem:[#allocation2 + $0xb0] sm:$0xff]  }
 0x75e   :  { %v4610_v17 = vpop.f32.mrf.mxu0 }
 0x760   :  { %v2032_v19 = vpop.f32.mrf.mxu0 }
 0x761   :  { %v2037_v54 = vadd.f32 %v2032_v19, %v1974_v50  ;;  %v5029_v50 = vld [vmem:[#allocation4 + $0x160] sm:$0xff]  }
 0x762   :  { %v4611_v27 = vpop.f32.mrf.mxu0 }
 0x764   :  { %v2092_v28 = vpop.f32.mrf.mxu0 }
 0x765   :  { %v2099_v51 = vadd.f32 %v2092_v28, %v2036_v48  ;;  %v5021_v48 = vld [vmem:[#allocation2 + $0xd0] sm:$0xff]  }
 0x766   :  { %v4618_v30 = vpop.f32.mrf.mxu0 }
 0x767   :  { %v2494_v30 = vpop.permute.xlu1 %2493 }
 0x768   :  { %v2095_v31 = vpop.f32.mrf.mxu0 }
 0x769   :  { %v2100_v56 = vadd.f32 %v2095_v31, %v2037_v54  ;;  %v5037_v54 = vld [vmem:[#allocation4 + $0x1c0] sm:$0xff]  }
 0x76a   :  { %v4619_v33 = vpop.f32.mrf.mxu0 }
 0x76c   :  { %v2155_v34 = vpop.f32.mrf.mxu0 }
 0x76d   :  { %v2162_v55 = vadd.f32 %v2155_v34, %v2099_v51  ;;  %v2501_v34 = vsel %vm572_vm15, %v2490_v39, %v2498_v29  ;;  %v5031_v51 = vld [vmem:[#allocation4 + $0x1d8] sm:$0xff]  }
 0x76e   :  { %v4626_v35 = vpop.f32.mrf.mxu0 }
 0x76f   :  { %v2500_v35 = vsel %vm572_vm15, %v2485_v13, %v2494_v30  ;;  %v5034_v13 = vld [vmem:[#allocation4 + $0x148] sm:$0xff]  }
 0x770   :  { %v2158_v36 = vpop.f32.mrf.mxu0 }
 0x771   :  { %v2163_v43 = vadd.f32 %v2158_v36, %v2100_v56  ;;  %v5043_v56 = vld [vmem:[#allocation4 + $0x1a8] sm:$0xff]  }
 0x772   :  { %v4627_v38 = vpop.f32.mrf.mxu0 }
 0x774   :  { %v2218_v22 = vpop.f32.mrf.mxu0 }
 0x775   :  { %v2225_v59 = vadd.f32 %v2218_v22, %v2162_v55  ;;  %v5013_v22 = vld [vmem:[#allocation2 + $0x90] sm:$0xff]   ;;  %v5039_v55 = vld [vmem:[#allocation4 + $0x1b8] sm:$0xff]  }
 0x776   :  { %v4634_v14 = vpop.f32.mrf.mxu0 }
 0x777   :  { %v5014_v14 = vld [vmem:[#allocation2 + $0x98] sm:$0xff]  }
 0x778   :  { %v2221_v41 = vpop.f32.mrf.mxu0 }
 0x779   :  { %v2226_v2 = vadd.f32 %v2221_v41, %v2163_v43  ;;  %v5016_v41 = vld [vmem:[#allocation2 + $0xa8] sm:$0xff]  }
 0x77a   :  { %v4635_v46 = vpop.f32.mrf.mxu0 }
 0x77b   :  { %v5019_v46 = vld [vmem:[#allocation2 + $0xc0] sm:$0xff]  }
 0x77c   :  { %v2281_v49 = vpop.f32.mrf.mxu0 }
 0x77d   :  { %v2288_v62 = vadd.f32 %v2281_v49, %v2225_v59  ;;  %v5027_v49 = vld [vmem:[#allocation4 + $0x170] sm:$0xff]   ;;  %v5045_v59 = vld [vmem:[#allocation4 + $0x1a0] sm:$0xff]  }
 0x77e   :  { %v4642_v53 = vpop.f32.mrf.mxu0  ;;  %4708 = vmatpush3.bf16.msra.mxu0 %v5027_v49 }
 0x77f   :  { %4709 = vmatprep.subr.bf16.mxu0 %v5166_v42  ;;  %v5035_v53 = vld [vmem:[#allocation4 + $0x1c8] sm:$0xff]  }
 0x780   :  { %v2284_v21 = vpop.f32.mrf.mxu0 }
 0x781   :  { %v2289_v7 = vadd.f32 %v2284_v21, %v2226_v2  ;;  %v5041_v21 = vld [vmem:[#allocation4 + $0x1b0] sm:$0xff]  }
 0x782   :  { %v4643_v23 = vpop.f32.mrf.mxu0  ;;  %4710 = vmatpush3.bf16.msra.mxu0 %v5028_v10  ;;  %v5048_v10 = vld [vmem:[#allocation4 + $0x210] sm:$0xff]  }
 0x783   :  { %4711 = vmatprep.subr.bf16.mxu0 %v5166_v42 }
 0x784   :  { %v2344_v1 = vpop.f32.mrf.mxu0 }
 0x785   :  { %v2351_v3 = vadd.f32 %v2344_v1, %v2288_v62 }
 0x786   :  { %v4650_v6 = vpop.f32.mrf.mxu0  ;;  %4712 = vmatpush3.bf16.msra.mxu0 %v5029_v50  ;;  %v5061_v50 = vld [vmem:[#allocation4 + $0x220] sm:$0xff]  }
 0x787   :  { %v2462_v8 = vmul.f32 %v2460_v5, %v2351_v3  ;;  %4717 = vmatprep.subr.bf16.mxu0 %v5166_v42  ;;  %v5030_v3 = vld [vmem:[#allocation4 + $0x158] sm:$0xff]  }
 0x788   :  { %v2347_v9 = vpop.f32.mrf.mxu0 }
 0x789   :  { %v2472_v16 = vadd.f32 %v2466_v20, %v2462_v8  ;;  %v2352_v25 = vadd.f32 %v2347_v9, %v2289_v7  ;;  %v5032_v7 = vld [vmem:[#allocation4 + $0x150] sm:$0xff]  }
 0x78a   :  { %v4651_v57 = vpop.f32.mrf.mxu0 }
 0x78b   :  { %vm2474_vm1 = vcmp.ge.f32.partialorder %v2472_v16, 0.0  ;;  %v2476_v17 = vmul.f32 0.2, %v2472_v16  ;;  %v2463_v19 = vmul.f32 %v2461_v24, %v2352_v25  ;;  %v5047_v25 = vld [vmem:[#allocation4 + $0x258] sm:$0xff]   ;;  %v5036_v57 = vld [vmem:[#allocation4 + $0x140] sm:$0xff]  }
 0x78d   :  { %v2478_v26 = vsel %vm2474_vm1, %v2472_v16, %v2476_v17  ;;  %v2473_v27 = vadd.f32 %v2470_v63, %v2463_v19  ;;  %v5049_v17 = vld [vmem:[#allocation4 + $0x250] sm:$0xff]  }
 0x78e   :  { %v2480_v31 = vmul.f32 1.4142135, %v2478_v26 }
 0x78f   :  { %vm2475_vm2 = vcmp.ge.f32.partialorder %v2473_v27, 0.0  ;;  %v2477_v28 = vmul.f32 0.2, %v2473_v27 }
 0x790   :  { %v2502_v36 = vmul.f32 %v2500_v35, %v2480_v31  ;;  %v5040_v31 = vld [vmem:[#allocation4 + $0x130] sm:$0xff]   ;;  %v5042_v35 = vld [vmem:[#allocation4 + $0x128] sm:$0xff]  }
 0x791   :  { %v2479_v32 = vsel %vm2475_vm2, %v2473_v27, %v2477_v28  ;;  %v5038_v27 = vld [vmem:[#allocation4 + $0x138] sm:$0xff]   ;;  %v5051_v28 = vld [vmem:[#allocation4 + $0x248] sm:$0xff]  }
 0x792   :  { %v2481_v33 = vmul.f32 1.4142135, %v2479_v32  ;;  %v5053_v32 = vld [vmem:[#allocation4 + $0x240] sm:$0xff]  }
 0x794   :  { %v2503_v38 = vmul.f32 %v2501_v34, %v2481_v33 }
 0x796   :  { %v2504_v20 = vpack.c.bf16 %v2503_v38, %v2502_v36  ;;  %v5055_v36 = vld [vmem:[#allocation4 + $0x238] sm:$0xff]  }
 0x798   :  { %4660 = vmatpush3.bf16.msra.mxu1 %v2504_v20 }
 0x799   :  { %4737 = vmatprep.subr.bf16.mxu1 %v5166_v42 }
 0x79b   :  { %4662 = vmatmul.mubr.msk.bf16.vlgmr.msra.gmra.mxu1 %vm665_vm12, %v5013_v22  ;;  %v5044_v22 = vld [vmem:[#allocation4 + $0x120] sm:$0xff]  }
 0x79c   :  { %4665 = vmatprep.mubr.msk.bf16.mxu1 %vm5167_vm10, %v5166_v42  ;;  %4738 = vmatpush3.bf16.msra.mxu1 %v5031_v51 }
 0x79d   :  { %4739 = vmatprep.subr.bf16.mxu1 %v5166_v42 }
 0x7a0   :  { %4740 = vmatpush3.bf16.msra.mxu1 %v5033_v52 }
 0x7a1   :  { %4741 = vmatprep.subr.bf16.mxu1 %v5166_v42 }
 0x7a3   :  { %4666 = vmatmul.mubr.msk.bf16.gmra.mxu1 %vm665_vm12, %v5014_v14  ;;  %v5057_v14 = vld [vmem:[#allocation4 + $0x230] sm:$0xff]  }
 0x7a4   :  { %4669 = vmatprep.mubr.msk.bf16.mxu1 %vm5167_vm10, %v5166_v42  ;;  %4742 = vmatpush3.bf16.msra.mxu1 %v5035_v53 }
 0x7a5   :  { %4743 = vmatprep.subr.bf16.mxu1 %v5166_v42 }
 0x7a8   :  { %4744 = vmatpush3.bf16.msra.mxu1 %v5037_v54  ;;  %v5050_v54 = vld [vmem:[#allocation4 + $0x208] sm:$0xff]  }
 0x7a9   :  { %4745 = vmatprep.subr.bf16.mxu1 %v5166_v42 }
 0x7ab   :  { %4670 = vmatmul.mubr.msk.bf16.gmra.mxu1 %vm665_vm12, %v5015_v40 }
 0x7ac   :  { %4673 = vmatprep.mubr.msk.bf16.mxu1 %vm5167_vm10, %v5166_v42  ;;  %4746 = vmatpush3.bf16.msra.mxu1 %v5039_v55  ;;  %v5063_v55 = vld [vmem:[#allocation4 + $0x2d8] sm:$0xff]  }
 0x7ad   :  { %4747 = vmatprep.subr.bf16.mxu1 %v5166_v42 }
 0x7b0   :  { %4748 = vmatpush3.bf16.msra.mxu1 %v5041_v21 }
 0x7b1   :  { %4749 = vmatprep.subr.bf16.mxu1 %v5166_v42 }
 0x7b3   :  { %4674 = vmatmul.mubr.msk.bf16.gmra.mxu1 %vm665_vm12, %v5016_v41 }
 0x7b4   :  { %4677 = vmatprep.mubr.msk.bf16.mxu1 %vm5167_vm10, %v5166_v42  ;;  %4750 = vmatpush3.bf16.msra.mxu1 %v5043_v56 }
 0x7b5   :  { %4751 = vmatprep.subr.bf16.mxu1 %v5166_v42 }
 0x7b8   :  { %4752 = vmatpush3.bf16.msra.mxu1 %v5045_v59  ;;  %v5052_v59 = vld [vmem:[#allocation4 + $0x200] sm:$0xff]  }
 0x7b9   :  { %4777 = vmatprep.subr.bf16.mxu1 %v5166_v42 }
 0x7bb   :  { %4678 = vmatmul.mubr.msk.bf16.gmra.mxu1 %vm665_vm12, %v5017_v15  ;;  %v5046_v15 = vld [vmem:[#allocation4 + $0x218] sm:$0xff]  }
 0x7bc   :  { %4681 = vmatprep.mubr.msk.bf16.mxu1 %vm5167_vm10, %v5166_v42 }
 0x7c3   :  { %4682 = vmatmul.mubr.msk.bf16.gmra.mxu1 %vm665_vm12, %v5018_v45  ;;  %v5059_v45 = vld [vmem:[#allocation4 + $0x228] sm:$0xff]  }
 0x7c4   :  { %4685 = vmatprep.mubr.msk.bf16.mxu1 %vm5167_vm10, %v5166_v42 }
 0x7cb   :  { %4686 = vmatmul.mubr.msk.bf16.gmra.mxu1 %vm665_vm12, %v5019_v46 }
 0x7cc   :  { %4689 = vmatprep.mubr.msk.bf16.mxu1 %vm5167_vm10, %v5166_v42 }
 0x7d3   :  { %4690 = vmatmul.mubr.msk.bf16.gmra.mxu1 %vm665_vm12, %v5020_v47 }
 0x7d4   :  { %4693 = vmatprep.mubr.msk.bf16.mxu1 %vm5167_vm10, %v5166_v42 }
 0x7db   :  { %4694 = vmatmul.mubr.msk.bf16.gmra.mxu1 %vm665_vm12, %v5021_v48 }
 0x7dc   :  { %4753 = vmatprep.mubr.msk.bf16.mxu1 %vm5167_vm10, %v5166_v42 }
 0x85b   :  { %v5689_v23 = vpop.f32.mrf.mxu1 }
 0x85d   :  { %v4663_v18 = vpop.f32.mrf.mxu1 }
 0x85f   :  { %v5691_v43 = vpop.f32.mrf.mxu1 }
 0x860   :  { %v2716_v47 = vpack.c.bf16 %v5691_v43, %v5689_v23  ;;  %v5065_v23 = vld [vmem:[#allocation4 + $0x2d0] sm:$0xff]  }
 0x861   :  { %v4664_v62 = vpop.f32.mrf.mxu1 }
 0x862   :  { %v5054_v62 = vld [vmem:[#allocation4 + $0x1f8] sm:$0xff]  }
 0x863   :  { %v2637_v63 = vpop.f32.mrf.mxu1 }
 0x865   :  { %v4667_v1 = vpop.f32.mrf.mxu1 }
 0x867   :  { %v2640_v2 = vpop.f32.mrf.mxu1 }
 0x868   :  { %v2733_v5 = vpack.c.bf16 %v2640_v2, %v2637_v63  ;;  %v5067_v63 = vld [vmem:[#allocation4 + $0x2c8] sm:$0xff]  }
 0x869   :  { %v4668_v6 = vpop.f32.mrf.mxu1 }
 0x86a   :  { %4714 = vmatmul.mubr.bf16.vlgmr.msra.gmra.mxu0 %v2733_v5  ;;  %v5056_v5 = vld [vmem:[#allocation4 + $0x1f0] sm:$0xff]   ;;  %v5069_v6 = vld [vmem:[#allocation4 + $0x2c0] sm:$0xff]  }
 0x86b   :  { %4718 = vmatpush3.bf16.msra.mxu0 %v5030_v3  ;;  %v2645_v8 = vpop.f32.mrf.mxu1  ;;  %4733 = vmatprep.mubr.msk.bf16.mxu0 %vm5167_vm10, %v5166_v42 }
 0x86c   :  { %4719 = vmatprep.subr.bf16.mxu0 %v5166_v42 }
 0x86d   :  { %v4671_v9 = vpop.f32.mrf.mxu1 }
 0x86e   :  { %v5058_v9 = vld [vmem:[#allocation4 + $0x1e8] sm:$0xff]  }
 0x86f   :  { %4720 = vmatpush3.bf16.msra.mxu0 %v5032_v7  ;;  %v2648_v16 = vpop.f32.mrf.mxu1 }
 0x870   :  { %4721 = vmatprep.subr.bf16.mxu0 %v5166_v42  ;;  %v2928_v24 = vpack.c.bf16 %v2648_v16, %v2645_v8 }
 0x871   :  { %v4672_v39 = vpop.f32.mrf.mxu1 }
 0x872   :  { %4754 = vmatmul.mubr.bf16.vlgmr.msra.gmra.mxu1 %v2928_v24  ;;  %v5060_v24 = vld [vmem:[#allocation4 + $0x1e0] sm:$0xff]   ;;  %v5073_v39 = vld [vmem:[#allocation4 + $0x2b0] sm:$0xff]  }
 0x873   :  { %4722 = vmatpush3.bf16.msra.mxu0 %v5034_v13  ;;  %4778 = vmatpush3.bf16.msra.mxu1 %v5047_v25  ;;  %v5697_v19 = vpop.f32.mrf.mxu1  ;;  %v5071_v13 = vld [vmem:[#allocation4 + $0x2b8] sm:$0xff]  }
 0x874   :  { %4723 = vmatprep.subr.bf16.mxu0 %v5166_v42  ;;  %4779 = vmatprep.subr.bf16.mxu1 %v5166_v42 }
 0x875   :  { %v4675_v26 = vpop.f32.mrf.mxu1  ;;  %4793 = vmatprep.mubr.msk.bf16.mxu1 %vm5167_vm10, %v5166_v42 }
 0x877   :  { %4724 = vmatpush3.bf16.msra.mxu0 %v5036_v57  ;;  %4780 = vmatpush3.bf16.msra.mxu1 %v5049_v17  ;;  %v5703_v29 = vpop.f32.mrf.mxu1  ;;  %v5062_v57 = vld [vmem:[#allocation4 + $0x298] sm:$0xff]   ;;  %v5075_v17 = vld [vmem:[#allocation4 + $0x2a8] sm:$0xff]  }
 0x878   :  { %4725 = vmatprep.subr.bf16.mxu0 %v5166_v42  ;;  %4781 = vmatprep.subr.bf16.mxu1 %v5166_v42  ;;  %v3036_v26 = vpack.c.bf16 %v5703_v29, %v5697_v19  ;;  %v5066_v19 = vld [vmem:[#allocation4 + $0x288] sm:$0xff]   ;;  %v5079_v29 = vld [vmem:[#allocation4 + $0x358] sm:$0xff]  }
 0x879   :  { %v4676_v30 = vpop.f32.mrf.mxu1 }
 0x87b   :  { %4726 = vmatpush3.bf16.msra.mxu0 %v5038_v27  ;;  %4782 = vmatpush3.bf16.msra.mxu1 %v5051_v28  ;;  %v2661_v33 = vpop.f32.mrf.mxu1  ;;  %v5064_v27 = vld [vmem:[#allocation4 + $0x290] sm:$0xff]   ;;  %v5077_v28 = vld [vmem:[#allocation4 + $0x2a0] sm:$0xff]  }
 0x87c   :  { %4727 = vmatprep.subr.bf16.mxu0 %v5166_v42  ;;  %4783 = vmatprep.subr.bf16.mxu1 %v5166_v42 }
 0x87d   :  { %v4679_v34 = vpop.f32.mrf.mxu1 }
 0x87e   :  { %v5083_v34 = vld [vmem:[#allocation4 + $0x348] sm:$0xff]  }
 0x87f   :  { %4728 = vmatpush3.bf16.msra.mxu0 %v5040_v31  ;;  %4784 = vmatpush3.bf16.msra.mxu1 %v5053_v32  ;;  %v2664_v38 = vpop.f32.mrf.mxu1  ;;  %v5068_v31 = vld [vmem:[#allocation4 + $0x280] sm:$0xff]   ;;  %v5081_v32 = vld [vmem:[#allocation4 + $0x350] sm:$0xff]  }
 0x880   :  { %4729 = vmatprep.subr.bf16.mxu0 %v5166_v42  ;;  %4785 = vmatprep.subr.bf16.mxu1 %v5166_v42  ;;  %v3144_v53 = vpack.c.bf16 %v2664_v38, %v2661_v33  ;;  %v5070_v33 = vld [vmem:[#allocation4 + $0x278] sm:$0xff]   ;;  %v5074_v38 = vld [vmem:[#allocation4 + $0x268] sm:$0xff]  }
 0x881   :  { %v4680_v20 = vpop.f32.mrf.mxu1 }
 0x882   :  { %v5087_v20 = vld [vmem:[#allocation4 + $0x338] sm:$0xff]  }
 0x883   :  { %4730 = vmatpush3.bf16.msra.mxu0 %v5042_v35  ;;  %4786 = vmatpush3.bf16.msra.mxu1 %v5055_v36  ;;  %v5711_v40 = vpop.f32.mrf.mxu1  ;;  %v5072_v35 = vld [vmem:[#allocation4 + $0x270] sm:$0xff]   ;;  %v5085_v36 = vld [vmem:[#allocation4 + $0x340] sm:$0xff]  }
 0x884   :  { %4731 = vmatprep.subr.bf16.mxu0 %v5166_v42  ;;  %4787 = vmatprep.subr.bf16.mxu1 %v5166_v42 }
 0x885   :  { %v4683_v41 = vpop.f32.mrf.mxu1 }
 0x886   :  { %v5078_v41 = vld [vmem:[#allocation4 + $0x318] sm:$0xff]  }
 0x887   :  { %4732 = vmatpush3.bf16.msra.mxu0 %v5044_v22  ;;  %4788 = vmatpush3.bf16.msra.mxu1 %v5057_v14  ;;  %v5715_v46 = vpop.f32.mrf.mxu1  ;;  %v5076_v22 = vld [vmem:[#allocation4 + $0x260] sm:$0xff]   ;;  %v5089_v14 = vld [vmem:[#allocation4 + $0x330] sm:$0xff]  }
 0x888   :  { %4757 = vmatprep.subr.bf16.mxu0 %v5166_v42  ;;  %4789 = vmatprep.subr.bf16.mxu1 %v5166_v42  ;;  %v3252_v48 = vpack.c.bf16 %v5715_v46, %v5711_v40  ;;  %v5084_v40 = vld [vmem:[#allocation4 + $0x300] sm:$0xff]   ;;  %v5086_v46 = vld [vmem:[#allocation4 + $0x2f8] sm:$0xff]  }
 0x889   :  { %v4684_v49 = vpop.f32.mrf.mxu1 }
 0x88a   :  { %4734 = vmatmul.mubr.bf16.vlgmr.msra.gmra.mxu0 %v2716_v47  ;;  %v5093_v47 = vld [vmem:[#allocation4 + $0x320] sm:$0xff]  }
 0x88b   :  { %4758 = vmatpush3.bf16.msra.mxu0 %v5046_v15  ;;  %4790 = vmatpush3.bf16.msra.mxu1 %v5059_v45  ;;  %v5723_v51 = vpop.f32.mrf.mxu1  ;;  %v5091_v15 = vld [vmem:[#allocation4 + $0x328] sm:$0xff]   ;;  %v5080_v45 = vld [vmem:[#allocation4 + $0x310] sm:$0xff]  }
 0x88c   :  { %4759 = vmatprep.subr.bf16.mxu0 %v5166_v42  ;;  %4791 = vmatprep.subr.bf16.mxu1 %v5166_v42 }
 0x88d   :  { %4773 = vmatprep.mubr.msk.bf16.mxu0 %vm5167_vm10, %v5166_v42  ;;  %v4687_v52 = vpop.f32.mrf.mxu1 }
 0x88e   :  { %v3671_v52 = vmul.f32 %v5618_v60, %v5618_v60  ;;  %v3669_v60 = vld [vmem:[%s5856_s2 + $0xc8] sm:$0xff] }
 0x88f   :  { %4760 = vmatpush3.bf16.msra.mxu0 %v5048_v10  ;;  %4792 = vmatpush3.bf16.msra.mxu1 %v5061_v50  ;;  %v5729_v21 = vpop.f32.mrf.mxu1  ;;  %v5082_v10 = vld [vmem:[#allocation4 + $0x308] sm:$0xff]  }
 0x890   :  { %4761 = vmatprep.subr.bf16.mxu0 %v5166_v42  ;;  %4817 = vmatprep.subr.bf16.mxu1 %v5166_v42  ;;  %v3360_v30 = vpack.c.bf16 %v5729_v21, %v5723_v51  ;;  %v5090_v50 = vld [vmem:[#allocation4 + $0x2e8] sm:$0xff]   ;;  %v5092_v51 = vld [vmem:[#allocation4 + $0x2e0] sm:$0xff]  }
 0x891   :  { %v4688_v56 = vpop.f32.mrf.mxu1 }
 0x892   :  { %4794 = vmatmul.mubr.bf16.vlgmr.msra.gmra.mxu1 %v3144_v53  ;;  %v3668_v53 = vld [vmem:[%s5856_s2 + $0xc0] sm:$0xff] }
 0x893   :  { %4762 = vmatpush3.bf16.msra.mxu0 %v5050_v54  ;;  %4818 = vmatpush3.bf16.msra.mxu1 %v5063_v55  ;;  %v5733_v18 = vpop.f32.mrf.mxu1  ;;  %v3670_v54 = vmul.f32 %v5612_v58, %v5612_v58 }
 0x894   :  { %4763 = vmatprep.subr.bf16.mxu0 %v5166_v42  ;;  %4819 = vmatprep.subr.bf16.mxu1 %v5166_v42 }
 0x895   :  { %4833 = vmatprep.mubr.msk.bf16.mxu1 %vm5167_vm10, %v5166_v42  ;;  %v4691_v43 = vpop.f32.mrf.mxu1 }
 0x897   :  { %4764 = vmatpush3.bf16.msra.mxu0 %v5052_v59  ;;  %4820 = vmatpush3.bf16.msra.mxu1 %v5065_v23  ;;  %v5739_v1 = vpop.f32.mrf.mxu1 }
 0x898   :  { %4765 = vmatprep.subr.bf16.mxu0 %v5166_v42  ;;  %4821 = vmatprep.subr.bf16.mxu1 %v5166_v42  ;;  %v3468_v2 = vpack.c.bf16 %v5739_v1, %v5733_v18 }
 0x899   :  { %v4692_v3 = vpop.f32.mrf.mxu1 }
 0x89b   :  { %4766 = vmatpush3.bf16.msra.mxu0 %v5054_v62  ;;  %4822 = vmatpush3.bf16.msra.mxu1 %v5067_v63  ;;  %v5745_v7 = vpop.f32.mrf.mxu1  ;;  %v5170_v62 = vmov 5   ;;  %v5818_v63 = vld [vmem:[%s5856_s2 + $0xd0] sm:$0xff] }
 0x89c   :  { %4767 = vmatprep.subr.bf16.mxu0 %v5166_v42  ;;  %4823 = vmatprep.subr.bf16.mxu1 %v5166_v42 }
 0x89d   :  { %v4695_v8 = vpop.f32.mrf.mxu1  ;;  %4948 = vset.pattern.permute.xlu1 %v5170_v62 }
 0x89e   :  { %3778 = vperm.xlu1 %4948, %v5818_v63  }
 0x89f   :  { %4768 = vmatpush3.bf16.msra.mxu0 %v5056_v5  ;;  %4824 = vmatpush3.bf16.msra.mxu1 %v5069_v6  ;;  %v5749_v16 = vpop.f32.mrf.mxu1 }
 0x8a0   :  { %4769 = vmatprep.subr.bf16.mxu0 %v5166_v42  ;;  %4825 = vmatprep.subr.bf16.mxu1 %v5166_v42  ;;  %v3576_v49 = vpack.c.bf16 %v5749_v16, %v5745_v7 }
 0x8a1   :  { %v4696_v25 = vpop.f32.mrf.mxu1 }
 0x8a2   :  { %4949 = vset.pattern.permute.xlu1 %v5163_v0 }
 0x8a3   :  { %4770 = vmatpush3.bf16.msra.mxu0 %v5058_v9  ;;  %4826 = vmatpush3.bf16.msra.mxu1 %v5071_v13 }
 0x8a4   :  { %4771 = vmatprep.subr.bf16.mxu0 %v5166_v42  ;;  %4827 = vmatprep.subr.bf16.mxu1 %v5166_v42 }
 0x8a7   :  { %4772 = vmatpush3.bf16.msra.mxu0 %v5060_v24  ;;  %4828 = vmatpush3.bf16.msra.mxu1 %v5073_v39 }
 0x8a8   :  { %4797 = vmatprep.subr.bf16.mxu0 %v5166_v42  ;;  %4829 = vmatprep.subr.bf16.mxu1 %v5166_v42 }
 0x8aa   :  { %4774 = vmatmul.mubr.bf16.vlgmr.msra.gmra.mxu0 %v3036_v26 }
 0x8ab   :  { %4798 = vmatpush3.bf16.msra.mxu0 %v5062_v57  ;;  %4830 = vmatpush3.bf16.msra.mxu1 %v5075_v17 }
 0x8ac   :  { %4799 = vmatprep.subr.bf16.mxu0 %v5166_v42  ;;  %4831 = vmatprep.subr.bf16.mxu1 %v5166_v42 }
 0x8ad   :  { %4813 = vmatprep.mubr.msk.bf16.mxu0 %vm5167_vm10, %v5166_v42 }
 0x8af   :  { %4800 = vmatpush3.bf16.msra.mxu0 %v5064_v27  ;;  %4832 = vmatpush3.bf16.msra.mxu1 %v5077_v28 }
 0x8b0   :  { %4801 = vmatprep.subr.bf16.mxu0 %v5166_v42  ;;  %4857 = vmatprep.subr.bf16.mxu1 %v5166_v42 }
 0x8b2   :  { %4834 = vmatmul.mubr.bf16.vlgmr.msra.gmra.mxu1 %v3360_v30 }
 0x8b3   :  { %4802 = vmatpush3.bf16.msra.mxu0 %v5066_v19  ;;  %4858 = vmatpush3.bf16.msra.mxu1 %v5079_v29 }
 0x8b4   :  { %4803 = vmatprep.subr.bf16.mxu0 %v5166_v42  ;;  %4859 = vmatprep.subr.bf16.mxu1 %v5166_v42 }
 0x8b5   :  { %4873 = vmatprep.mubr.msk.bf16.mxu1 %vm5167_vm10, %v5166_v42 }
 0x8b7   :  { %4804 = vmatpush3.bf16.msra.mxu0 %v5068_v31  ;;  %4860 = vmatpush3.bf16.msra.mxu1 %v5081_v32 }
 0x8b8   :  { %4805 = vmatprep.subr.bf16.mxu0 %v5166_v42  ;;  %4861 = vmatprep.subr.bf16.mxu1 %v5166_v42 }
 0x8bb   :  { %4806 = vmatpush3.bf16.msra.mxu0 %v5070_v33  ;;  %4862 = vmatpush3.bf16.msra.mxu1 %v5083_v34 }
 0x8bc   :  { %4807 = vmatprep.subr.bf16.mxu0 %v5166_v42  ;;  %4863 = vmatprep.subr.bf16.mxu1 %v5166_v42 }
 0x8bf   :  { %4808 = vmatpush3.bf16.msra.mxu0 %v5072_v35  ;;  %4864 = vmatpush3.bf16.msra.mxu1 %v5085_v36 }
 0x8c0   :  { %4809 = vmatprep.subr.bf16.mxu0 %v5166_v42  ;;  %4865 = vmatprep.subr.bf16.mxu1 %v5166_v42 }
 0x8c3   :  { %4810 = vmatpush3.bf16.msra.mxu0 %v5074_v38  ;;  %4866 = vmatpush3.bf16.msra.mxu1 %v5087_v20 }
 0x8c4   :  { %4811 = vmatprep.subr.bf16.mxu0 %v5166_v42  ;;  %4867 = vmatprep.subr.bf16.mxu1 %v5166_v42 }
 0x8c7   :  { %4812 = vmatpush3.bf16.msra.mxu0 %v5076_v22  ;;  %4868 = vmatpush3.bf16.msra.mxu1 %v5089_v14 }
 0x8c8   :  { %4837 = vmatprep.subr.bf16.mxu0 %v5166_v42  ;;  %4869 = vmatprep.subr.bf16.mxu1 %v5166_v42 }
 0x8ca   :  { %4814 = vmatmul.mubr.bf16.vlgmr.msra.gmra.mxu0 %v3252_v48  ;;  %v5088_v48 = vld [vmem:[#allocation4 + $0x2f0] sm:$0xff]  }
 0x8cb   :  { %4838 = vmatpush3.bf16.msra.mxu0 %v5078_v41  ;;  %4870 = vmatpush3.bf16.msra.mxu1 %v5091_v15 }
 0x8cc   :  { %4839 = vmatprep.subr.bf16.mxu0 %v5166_v42  ;;  %4871 = vmatprep.subr.bf16.mxu1 %v5166_v42 }
 0x8cd   :  { %4853 = vmatprep.mubr.msk.bf16.mxu0 %vm5167_vm10, %v5166_v42 }
 0x8cf   :  { %4840 = vmatpush3.bf16.msra.mxu0 %v5080_v45  ;;  %4872 = vmatpush3.bf16.msra.mxu1 %v5093_v47 }
 0x8d0   :  { %4841 = vmatprep.subr.bf16.mxu0 %v5166_v42 }
 0x8d2   :  { %4874 = vmatmul.mubr.bf16.vlgmr.msra.gmra.mxu1 %v3576_v49 }
 0x8d3   :  { %4842 = vmatpush3.bf16.msra.mxu0 %v5082_v10 }
 0x8d4   :  { %4843 = vmatprep.subr.bf16.mxu0 %v5166_v42 }
 0x8d7   :  { %4844 = vmatpush3.bf16.msra.mxu0 %v5084_v40 }
 0x8d8   :  { %4845 = vmatprep.subr.bf16.mxu0 %v5166_v42 }
 0x8db   :  { %4846 = vmatpush3.bf16.msra.mxu0 %v5086_v46 }
 0x8dc   :  { %4847 = vmatprep.subr.bf16.mxu0 %v5166_v42 }
 0x8df   :  { %4848 = vmatpush3.bf16.msra.mxu0 %v5088_v48 }
 0x8e0   :  { %4849 = vmatprep.subr.bf16.mxu0 %v5166_v42 }
 0x8e3   :  { %4850 = vmatpush3.bf16.msra.mxu0 %v5090_v50 }
 0x8e4   :  { %4851 = vmatprep.subr.bf16.mxu0 %v5166_v42 }
 0x8e7   :  { %4852 = vmatpush3.bf16.msra.mxu0 %v5092_v51 }
 0x8e8   :  { %4877 = vmatprep.subr.mxu0 %v3671_v52 }
 0x8ea   :  { %4854 = vmatmul.mubr.bf16.vlgmr.msra.gmra.mxu0 %v3468_v2 }
 0x8eb   :  { %4878 = vmatpush3.msra.mxu0 %v3671_v52  ;;  %4881 = vmatprep.mubr.msk.f32.mxu0 %vm665_vm12, %v3668_v53 }
 0x8ec   :  { %4879 = vmatprep.subr.mxu0 %v3670_v54 }
 0x8ed   :  { %4880 = vmatpush3.msra.mxu0 %v3670_v54 }
 0x8ee   :  { %4884 = vmatprep.subr.bf16.mxu0 %v5166_v42 }
 0x8f2   :  { %4882 = vmatmul.mubr.msk.f32.vlgmr.msra.gmra.mxu0 %vm665_vm12, %v3669_v60 }
 0x8f3   :  { %4886 = vmatprep.mubr.msk.bf16.mxu0 %vm5167_vm10, %v5166_v42 }
 0x92a   :  { %v2816_v55 = vpop.f32.mrf.mxu0 }
 0x92c   :  { %v4715_v21 = vpop.f32.mrf.mxu0 }
 0x92e   :  { %v2819_v56 = vpop.f32.mrf.mxu0 }
 0x930   :  { %v4716_v58 = vpop.f32.mrf.mxu0 }
 0x931   :  { %v417_v58 = vpop.permute.xlu1 %416 }
 0x932   :  { %v3011_v59 = vpop.f32.mrf.mxu1 }
 0x934   :  { %v4755_v23 = vpop.f32.mrf.mxu1 }
 0x935   :  { %v561_v23 = vadd.f32 %v5394_v12, %v417_v58  ;;  %v5171_v12 = vmov 6  }
 0x936   :  { %v3014_v18 = vpop.f32.mrf.mxu1 }
 0x938   :  { %v4756_v43 = vpop.f32.mrf.mxu1 }
 0x939   :  { %v5114_v43 = vld [vmem:[%s5856_s2 + $0xd8] sm:$0xff] }
 0x94a   :  { %v2905_v1 = vpop.f32.mrf.mxu0 }
 0x94b   :  { %v2906_v2 = vadd.f32 %v2905_v1, %v2816_v55 }
 0x94c   :  { %v4735_v3 = vpop.f32.mrf.mxu0 }
 0x94d   :  { %v3018_v5 = vadd.f32 %v3011_v59, %v2906_v2 }
 0x94e   :  { %v2908_v6 = vpop.f32.mrf.mxu0 }
 0x94f   :  { %v2909_v7 = vadd.f32 %v2908_v6, %v2819_v56 }
 0x950   :  { %v4736_v8 = vpop.f32.mrf.mxu0 }
 0x951   :  { %v3019_v9 = vadd.f32 %v3014_v18, %v2909_v7  ;;  %v422_v18 = vpop.permute.xlu1 %421 }
 0x952   :  { %v3227_v13 = vpop.f32.mrf.mxu1  ;;  %v566_v1 = vadd.f32 %v5392_v11, %v422_v18 }
 0x954   :  { %v4795_v16 = vpop.f32.mrf.mxu1 }
 0x955   :  { %v3779_v2 = vpop.permute.xlu1 %3778 }
 0x956   :  { %v3230_v25 = vpop.f32.mrf.mxu1 }
 0x958   :  { %v4796_v24 = vpop.f32.mrf.mxu1 }
 0x96a   :  { %v3119_v39 = vpop.f32.mrf.mxu0 }
 0x96b   :  { %v3126_v57 = vadd.f32 %v3119_v39, %v3018_v5 }
 0x96c   :  { %v4775_v17 = vpop.f32.mrf.mxu0 }
 0x96d   :  { %v3234_v26 = vadd.f32 %v3227_v13, %v3126_v57 }
 0x96e   :  { %v3122_v27 = vpop.f32.mrf.mxu0 }
 0x96f   :  { %v3127_v28 = vadd.f32 %v3122_v27, %v3019_v9 }
 0x970   :  { %v4776_v30 = vpop.f32.mrf.mxu0 }
 0x971   :  { %v3235_v19 = vadd.f32 %v3230_v25, %v3127_v28 }
 0x972   :  { %v3443_v29 = vpop.f32.mrf.mxu1 }
 0x974   :  { %v4835_v31 = vpop.f32.mrf.mxu1 }
 0x976   :  { %v3446_v32 = vpop.f32.mrf.mxu1 }
 0x978   :  { %v4836_v33 = vpop.f32.mrf.mxu1 }
 0x98a   :  { %v3335_v34 = vpop.f32.mrf.mxu0 }
 0x98b   :  { %v3342_v35 = vadd.f32 %v3335_v34, %v3234_v26 }
 0x98c   :  { %v4815_v36 = vpop.f32.mrf.mxu0 }
 0x98d   :  { %v3450_v38 = vadd.f32 %v3443_v29, %v3342_v35  ;;  %v5094_v35 = vld [vmem:[#allocation2 + $0xe0] sm:$0xff]   ;;  %v5095_v36 = vld [vmem:[#allocation4 + $0x368] sm:$0xff]  }
 0x98e   :  { %v3338_v20 = vpop.f32.mrf.mxu0 }
 0x98f   :  { %v3343_v22 = vadd.f32 %v3338_v20, %v3235_v19  ;;  %v5096_v20 = vld [vmem:[#allocation4 + $0x360] sm:$0xff]  }
 0x990   :  { %v4816_v14 = vpop.f32.mrf.mxu0 }
 0x991   :  { %v3451_v41 = vadd.f32 %v3446_v32, %v3343_v22 }
 0x992   :  { %v3659_v15 = vpop.f32.mrf.mxu1 }
 0x994   :  { %v4875_v45 = vpop.f32.mrf.mxu1 }
 0x996   :  { %v3662_v47 = vpop.f32.mrf.mxu1 }
 0x998   :  { %v4876_v49 = vpop.f32.mrf.mxu1 }
 0x9aa   :  { %v3551_v10 = vpop.f32.mrf.mxu0 }
 0x9ab   :  { %v3558_v40 = vadd.f32 %v3551_v10, %v3450_v38 }
 0x9ac   :  { %v4855_v46 = vpop.f32.mrf.mxu0 }
 0x9ad   :  { %v3666_v48 = vadd.f32 %v3659_v15, %v3558_v40 }
 0x9ae   :  { %v3554_v50 = vpop.f32.mrf.mxu0 }
 0x9af   :  { %v3559_v51 = vadd.f32 %v3554_v50, %v3451_v41 }
 0x9b0   :  { %v4856_v52 = vpop.f32.mrf.mxu0 }
 0x9b1   :  { %v3667_v53 = vadd.f32 %v3662_v47, %v3559_v51 }
 0x9b2   :  { %v4883_v54 = vpop.f32.mrf.mxu0 }
 0x9b3   :  { %v3750_v60 = vadd.f32 1e-08, %v4883_v54 }
 0x9b4   :  { %v3744_v55 = vpop.f32.mrf.mxu0 }
 0x9b5   :  { %5107 = vrsqrt.f32 %v3750_v60  ;;  %v3745_v21 = vadd.f32 1e-08, %v3744_v55 }
 0x9b7   :  { %5109 = vrsqrt.f32 %v3745_v21 }
 0x9c2   :  { %v5108_v56 = vpop.eup %5107 }
 0x9c3   :  { %3770 = vperm.xlu0 %4947, %v5108_v56   ;;  %3762 = vperm.xlu1 %4949, %v5108_v56  }
 0x9c4   :  { %v5110_v59 = vpop.eup %5109 }
 0x9c7   :  { %4950 = vset.pattern.permute.xlu0 %v5163_v0  ;;  %4951 = vset.pattern.permute.xlu1 %v5165_v4 }
 0x9c8   :  { %3766 = vperm.xlu1 %4951, %v5110_v59   ;;  %3757 = vperm.xlu0 %4950, %v5110_v59  }
 0x9cc   :  { %4952 = vset.pattern.permute.xlu1 %v5170_v62  ;;  %3797 = vperm.xlu0 %4950, %v561_v23   ;;  %v5172_v62 = vmov 7  }
 0x9cd   :  { %3782 = vperm.xlu1 %4952, %v5114_v43  }
 0x9d0   :  { %4955 = vset.pattern.permute.xlu0 %v5165_v4 }
 0x9d1   :  { %4953 = vset.pattern.permute.xlu1 %v5163_v0  ;;  %3810 = vperm.xlu0 %4955, %v566_v1  }
 0x9d2   :  { %3802 = vperm.xlu1 %4953, %v566_v1  }
 0x9d5   :  { %4957 = vset.pattern.permute.xlu0 %v5172_v62 }
 0x9d6   :  { %4954 = vset.pattern.permute.xlu1 %v5165_v4  ;;  %3821 = vperm.xlu0 %4957, %v5818_v63  }
 0x9d7   :  { %3806 = vperm.xlu1 %4954, %v561_v23  }
 0x9db   :  { %4956 = vset.pattern.permute.xlu1 %v5171_v12 }
 0x9dc   :  { %1516 = vperm.xlu1 %4956, %v5818_v63  }
 0x9e0   :  { %1520 = vperm.xlu1 %4956, %v5114_v43  }
 0xa3e   :  { %v3771_v11 = vpop.permute.xlu0 %3770  ;;  %v3763_v3 = vpop.permute.xlu1 %3762 }
 0xa3f   :  { %v3774_v0 = vsel %vm572_vm15, %v3763_v3, %v3771_v11 }
 0xa40   :  { %v3776_v9 = vmul.f32 %v3774_v0, %v3667_v53 }
 0xa43   :  { %v3767_v5 = vpop.permute.xlu1 %3766  ;;  %v3758_v6 = vpop.permute.xlu0 %3757 }
 0xa44   :  { %v3773_v4 = vsel %vm572_vm15, %v3758_v6, %v3767_v5 }
 0xa45   :  { %v3775_v7 = vmul.f32 %v3773_v4, %v3666_v48 }
 0xa47   :  { %v3785_v8 = vadd.f32 %v3779_v2, %v3775_v7  ;;  %v3798_v13 = vpop.permute.xlu0 %3797 }
 0xa48   :  { %v3783_v16 = vpop.permute.xlu1 %3782 }
 0xa49   :  { %v3786_v25 = vadd.f32 %v3783_v16, %v3776_v9  ;;  %v3789_v24 = vmul.f32 0.2, %v3785_v8  ;;  %vm3787_vm4 = vcmp.ge.f32.partialorder %v3785_v8, 0.0 }
 0xa4b   :  { %vm3788_vm3 = vcmp.ge.f32.partialorder %v3786_v25, 0.0  ;;  %v3790_v63 = vmul.f32 0.2, %v3786_v25  ;;  %v3791_v26 = vsel %vm3787_vm4, %v3785_v8, %v3789_v24 }
 0xa4c   :  { %v3811_v17 = vpop.permute.xlu0 %3810  ;;  %v3793_v19 = vmul.f32 1.4142135, %v3791_v26 }
 0xa4d   :  { %v3803_v39 = vpop.permute.xlu1 %3802  ;;  %v3792_v57 = vsel %vm3788_vm3, %v3786_v25, %v3790_v63 }
 0xa4e   :  { %v3794_v27 = vmul.f32 1.4142135, %v3792_v57  ;;  %v3814_v28 = vsel %vm572_vm15, %v3803_v39, %v3811_v17 }
 0xa50   :  { %v3816_v31 = vmul.f32 %v3814_v28, %v3794_v27 }
 0xa51   :  { %v3822_v45 = vpop.permute.xlu0 %3821 }
 0xa52   :  { %v3807_v30 = vpop.permute.xlu1 %3806 }
 0xa53   :  { %v3813_v29 = vsel %vm572_vm15, %v3798_v13, %v3807_v30 }
 0xa54   :  { %v3815_v32 = vmul.f32 %v3813_v29, %v3793_v19 }
 0xa56   :  { %v3817_v33 = vpack.c.bf16 %v3816_v31, %v3815_v32 }
 0xa57   :  { %v1517_v34 = vpop.permute.xlu1 %1516 }
 0xa58   :  { %4885 = vmatpush3.bf16.msra.mxu0 %v3817_v33  ;;  %v1566_v22 = vadd.f32 %v5632_v37, %v1517_v34 }
 0xa59   :  { %4890 = vmatprep.subr.bf16.mxu0 %v5166_v42 }
 0xa5b   :  { %v1521_v38 = vpop.permute.xlu1 %1520  ;;  %4887 = vmatmul.mubr.msk.bf16.vlgmr.msra.gmra.mxu0 %vm665_vm12, %v5094_v35 }
 0xa5c   :  { %4891 = vmatpush3.bf16.msra.mxu0 %v5095_v36  ;;  %4894 = vmatprep.mubr.msk.bf16.mxu0 %vm5167_vm10, %v5166_v42  ;;  %v1569_v44 = vadd.f32 %v5634_v61, %v1521_v38 }
 0xa5d   :  { %4892 = vmatprep.subr.bf16.mxu0 %v5166_v42 }
 0xa5e   :  { %v3875_v14 = vpack.c.bf16 %v1569_v44, %v1566_v22 }
 0xa60   :  { %4893 = vmatpush3.bf16.msra.mxu0 %v5096_v20 }
 0xa63   :  { %4895 = vmatmul.mubr.msk.bf16.vlgmr.msra.gmra.mxu0 %vm107_vm0, %v3875_v14 }
 0xb1b   :  { %v3869_v41 = vpop.f32.mrf.mxu0 }
 0xb1c   :  { %v3870_v10 = vadd.f32 %v3869_v41, %v3822_v45 }
 0xb1d   :  { %v4888_v15 = vpop.f32.mrf.mxu0 }
 0xb1f   :  { %v3872_v47 = vpop.f32.mrf.mxu0 }
 0xb21   :  { %v4889_v49 = vpop.f32.mrf.mxu0 }
 0xb23   :  { %v3929_v40 = vpop.f32.mrf.mxu0 }
 0xb24   :  { %v3935_v46 = vadd.f32 %v3929_v40, %v3870_v10 }
 0xb25   :  { %v4896_v48 = vpop.f32.mrf.mxu0 }
 0xb26   :  { %3936 = vst [vmem:[%s5859_s5] sm:$0x7] %v3935_v46 }
 0xb27   :  { %v3932_v42 = vpop.f32.mrf.mxu0 }
 0xb29   :  { %v4897_v61 = vpop.f32.mrf.mxu0 }
 0xb2a   :  { %3941 = vsyncpa [#allocation3], 1 }
 0xb2b   :  { %3942 = vsyncpa [#allocation5], 1 }

</bundles_post_ra>
